<compile_context>
chip_gen: v7x
topology: tpu7x:2x2x1
jax: 0.10.0
libtpu: 0.0.40
codegen_flags: <defaults>
</compile_context>

<pallas_src>
import jax
import jax.numpy as jnp
from jax.experimental import pallas as pl
from jax.experimental.pallas import tpu as pltpu


def _round_up(x, m):
    return (x + m - 1) // m * m


def _cdiv(a, b):
    return (a + b - 1) // b


def _nt_dot(a, b):
    """a[M, C] @ b[N, C]^T -> [M, N], f32 accumulation (MXU, no explicit transpose)."""
    return jax.lax.dot_general(a, b, (((1,), (1,)), ((), ())),
                               preferred_element_type=jnp.float32)


def _rvq_kernel(x_ref, win_ref, bin_ref, cnt_ref, cbt_ref, wout_ref, bout_ref,
                zq_ref, lat_ref, codes_ref, sq_ref):
    """Fused residual-VQ forward on one [TILE_BT, D] token tile.

    x_ref    : [TILE_BT, D]     residual input tokens (tile), f32
    win_ref  : [N, Dc, D]       effective (weight-normalized) in_proj weights, transposed
    bin_ref  : [N, 1, Dc]       in_proj biases (f32)
    cnt_ref  : [N, Dc, K]       l2-normalized codebooks, transposed
    cbt_ref  : [N, Dc, K]       raw codebooks (nn.Embedding weights), transposed
    wout_ref : [N, Dc, D]       effective out_proj weights
    bout_ref : [N, 1, D]        out_proj biases (f32)
    zq_ref   : [TILE_BT, D]     sum over stages of out-projected quantized vectors
    lat_ref  : [TILE_BT, N*Dc]  per-stage projected latents (stage-major channels)
    codes_ref: [TILE_BT, N]     codebook indices (int32)
    sq_ref   : [TILE_BT, N]     per-token sum over Dc of (z_e - z_q)^2 per stage
    """
    n_stages = win_ref.shape[0]
    k_codes = cnt_ref.shape[2]
    mm_dtype = win_ref.dtype                     # bf16 (fast path) or f32 (exact path)

    residual = x_ref[...]                        # [T, D] f32
    zq_acc = jnp.zeros_like(residual)
    k_iota = jax.lax.broadcasted_iota(jnp.int32, (1, k_codes), 1)   # [1, K] broadcast row

    lat_parts, code_parts, sq_parts = [], [], []

    for n in range(n_stages):                    # static unroll over codebooks
        # --- in_proj: 1x1 WN-conv == NT matmul over channels (MXU, f32 acc) ---
        ze = _nt_dot(residual.astype(mm_dtype), win_ref[n]) + bin_ref[n]   # [T, Dc]

        # --- nearest neighbor: argmax_k  z_e . c_norm_k  (the ||e||^2 row term
        #     and the constant ||c_norm||^2 == 1 are argmax-invariant) ---
        score = jnp.dot(ze.astype(mm_dtype), cnt_ref[n],
                        preferred_element_type=jnp.float32)               # [T, K]
        m = jnp.max(score, axis=1, keepdims=True)
        idx = jnp.min(jnp.where(score == m, k_iota, k_codes),
                      axis=1, keepdims=True)                               # first max on ties
        idx = jnp.minimum(idx, k_codes - 1)                                # NaN-row safety clamp

        # --- gather raw codebook rows via one-hot matmul (exact in bf16) ---
        oh = (k_iota == idx).astype(mm_dtype)                              # [T, K]
        zqp = _nt_dot(oh, cbt_ref[n])                                      # [T, Dc]

        # --- per-token squared error (commitment / codebook loss numerator) ---
        diff = ze - zqp
        sq_parts.append(jnp.sum(diff * diff, axis=1, keepdims=True))       # [T, 1]
        code_parts.append(idx)
        lat_parts.append(ze)

        # --- straight-through forward value is z_q; out_proj back to D ---
        zq_i = jnp.dot(zqp.astype(mm_dtype), wout_ref[n],
                       preferred_element_type=jnp.float32) + bout_ref[n]   # [T, D]
        zq_acc = zq_acc + zq_i
        residual = residual - zq_i

    # One batched store per output (instead of N narrow masked stores each).
    zq_ref[...] = zq_acc
    lat_ref[...] = jnp.concatenate(lat_parts, axis=1)
    codes_ref[...] = jnp.concatenate(code_parts, axis=1).astype(jnp.int32)
    sq_ref[...] = jnp.concatenate(sq_parts, axis=1)


def _pick_vmem_limit_bytes():
    cap = None
    try:
        cap = getattr(pltpu.get_tpu_info(), "vmem_capacity_bytes", None)
    except Exception:
        cap = None
    if not cap:
        cap = 64 * 1024 * 1024          # conservative fallback (v7x per-TC physical)
    return int(min(96 * 1024 * 1024, cap * 3 // 4))


def residual_vq_forward(z, quantizer_params, n_quantizers=None,
                        mxu_bf16=True, tile_bt=None):
    """ResidualVectorQuantize.forward (eval mode).

    z : [B, D, T] float32 (PyTorch NCW layout)
    quantizer_params : list of (w_in[D,Dc], b_in[1,Dc], codebook[K,Dc],
                                w_out[Dc,D], b_out[1,D])
    Returns (z_q[B,D,T], codes[B,N,T] int32, latents[B,N*Dc,T],
             commitment_loss scalar, codebook_loss scalar)
    """
    B, D, T = z.shape
    n_total = len(quantizer_params)
    if n_quantizers is None:
        n_quantizers = n_total
    n_use = int(min(n_quantizers, n_total))
    params = quantizer_params[:n_use]

    w_in = jnp.stack([p[0] for p in params])                 # [N, D, Dc]
    b_in = jnp.stack([p[1] for p in params]).astype(jnp.float32)    # [N, 1, Dc]
    cb = jnp.stack([p[2] for p in params])                   # [N, K, Dc]
    w_out = jnp.stack([p[3] for p in params])                # [N, Dc, D]
    b_out = jnp.stack([p[4] for p in params]).astype(jnp.float32)   # [N, 1, D]
    N, K, Dc = cb.shape

    mm_dtype = jnp.bfloat16 if mxu_bf16 else jnp.float32

    # Padding-free, lane-dense VMEM layouts: every weight has its big dim last.
    win_t = jnp.transpose(w_in, (0, 2, 1)).astype(mm_dtype)  # [N, Dc, D]
    cn = cb / jnp.maximum(jnp.sqrt(jnp.sum(cb * cb, axis=-1, keepdims=True)), 1e-12)
    cnt = jnp.transpose(cn, (0, 2, 1)).astype(mm_dtype)      # [N, Dc, K] (normalized)
    cbt = jnp.transpose(cb, (0, 2, 1)).astype(mm_dtype)      # [N, Dc, K] (raw)
    wout = w_out.astype(mm_dtype)                            # [N, Dc, D]

    # NCW -> (b t) d and pad tokens up to a tile multiple.
    x = jnp.transpose(z, (0, 2, 1)).reshape(B * T, D).astype(jnp.float32)
    BT = B * T

    vmem_limit = _pick_vmem_limit_bytes()
    if tile_bt is None:
        cap_tile = 1024 if vmem_limit >= 80 * 1024 * 1024 else 512
        tile_bt = min(cap_tile, _round_up(BT, 128))
        # Keep >= 2 grid steps when the problem allows, so the "parallel" grid
        # axis can shard tiles across v7x's two TensorCores.
        if tile_bt > 128 and _cdiv(BT, tile_bt) < 2:
            tile_bt = max(128, _round_up(_cdiv(BT, 2), 128))
    bt_pad = _round_up(BT, tile_bt)
    if bt_pad != BT:
        x = jnp.pad(x, ((0, bt_pad - BT), (0, 0)))
    grid = (bt_pad // tile_bt,)

    def _rep(arr):  # whole array resident in VMEM, same block every grid step
        nd = arr.ndim
        return pl.BlockSpec(arr.shape, lambda i, _nd=nd: (0,) * _nd)

    out_shapes = (
        jax.ShapeDtypeStruct((bt_pad, D), jnp.float32),       # z_q (summed over stages)
        jax.ShapeDtypeStruct((bt_pad, N * Dc), jnp.float32),  # latents, stage-major channels
        jax.ShapeDtypeStruct((bt_pad, N), jnp.int32),         # codes
        jax.ShapeDtypeStruct((bt_pad, N), jnp.float32),       # per-token sq-err sums
    )
    out_specs = (
        pl.BlockSpec((tile_bt, D), lambda i: (i, 0)),
        pl.BlockSpec((tile_bt, N * Dc), lambda i: (i, 0)),
        pl.BlockSpec((tile_bt, N), lambda i: (i, 0)),
        pl.BlockSpec((tile_bt, N), lambda i: (i, 0)),
    )
    in_specs = [
        pl.BlockSpec((tile_bt, D), lambda i: (i, 0)),         # x, tiled over tokens
        _rep(win_t), _rep(b_in), _rep(cnt), _rep(cbt), _rep(wout), _rep(b_out),
    ]

    zq_flat, lat_flat, codes_flat, sq_flat = pl.pallas_call(
        _rvq_kernel,
        out_shape=out_shapes,
        grid_spec=pltpu.PrefetchScalarGridSpec(
            num_scalar_prefetch=0,
            grid=grid,
            in_specs=in_specs,
            out_specs=out_specs,
        ),
        compiler_params=pltpu.CompilerParams(
            dimension_semantics=("parallel",),     # shard tiles across TCs on v7x
            vmem_limit_bytes=vmem_limit,
        ),
    )(x, win_t, b_in, cnt, cbt, wout, b_out)

    # Drop padded rows, reshape back to NCW layouts.
    zq_flat = zq_flat[:BT]
    lat_flat = lat_flat[:BT]
    codes_flat = codes_flat[:BT]
    sq_flat = sq_flat[:BT]

    z_q = jnp.transpose(zq_flat.reshape(B, T, D), (0, 2, 1))            # [B, D, T]
    codes = jnp.transpose(codes_flat.reshape(B, T, N), (0, 2, 1))       # [B, N, T]
    latents = jnp.transpose(lat_flat.reshape(B, T, N * Dc), (0, 2, 1))  # [B, N*Dc, T]

    # mse_loss(z_e, z_q).mean([1,2]) per batch then .mean() over batch
    #   == global mean over (B, T, Dc); summed over stages.
    per_stage = jnp.sum(sq_flat, axis=0) / (B * T * Dc)                 # [N]
    commitment_loss = jnp.sum(per_stage)
    codebook_loss = jnp.sum(per_stage)   # identical forward value (detach differs only in grad)
    return z_q, codes, latents, commitment_loss, codebook_loss


def _make_wn_conv1x1(key, out_dim, in_dim, scale=0.2):
    """weight_norm(nn.Conv1d(in, out, 1)): W = g * v/||v||, g init = ||v|| (per out channel)."""
    kv, kb = jax.random.split(key)
    v = jax.random.normal(kv, (out_dim, in_dim), jnp.float32) * scale
    norm = jnp.sqrt(jnp.sum(v * v, axis=1, keepdims=True))
    g = norm                                              # PyTorch weight_norm init value of g
    w_eff = g * v / jnp.maximum(norm, 1e-12)              # == v at init
    b = jax.random.normal(kb, (out_dim,), jnp.float32) * 0.05
    return w_eff, b


def make_rvq_params(key, input_dim, n_codebooks, codebook_size, codebook_dim):
    params = []
    for i in range(n_codebooks):
        k_in, k_out, k_cb, key = jax.random.split(jax.random.fold_in(key, i), 4)
        w_in, b_in = _make_wn_conv1x1(k_in, codebook_dim, input_dim)
        w_out, b_out = _make_wn_conv1x1(k_out, input_dim, codebook_dim)
        codebook = jax.random.normal(k_cb, (codebook_size, codebook_dim), jnp.float32)
        params.append((
            jnp.transpose(w_in),                 # [D, Dc]
            b_in.reshape(1, codebook_dim),       # [1, Dc]
            codebook,                            # [K, Dc]
            jnp.transpose(w_out),                # [Dc, D]
            b_out.reshape(1, input_dim),         # [1, D]
        ))
    return params


def _reference_forward(z, quantizer_params):
    """Pure-JAX reference of the eval-mode forward (for correctness check)."""
    B, D, T = z.shape
    x = jnp.transpose(z, (0, 2, 1)).reshape(B * T, D)
    residual, zq_acc = x, jnp.zeros_like(x)
    commit = 0.0
    codes, lats = [], []
    for (w_in, b_in, cb, w_out, b_out) in quantizer_params:
        ze = residual @ w_in + b_in
        en = ze / jnp.maximum(jnp.linalg.norm(ze, axis=1, keepdims=True), 1e-12)
        cn = cb / jnp.maximum(jnp.linalg.norm(cb, axis=1, keepdims=True), 1e-12)
        dist = (en * en).sum(1, keepdims=True) - 2 * en @ cn.T + (cn * cn).sum(1, keepdims=True).T
        idx = jnp.argmax(-dist, axis=1)
        zqp = cb[idx]
        per_b = ((ze - zqp) ** 2).reshape(B, T, -1).mean(axis=(1, 2))
        commit = commit + per_b.mean()
        zq = zqp @ w_out + b_out
        zq_acc = zq_acc + zq
        residual = residual - zq
        codes.append(idx.reshape(B, T))
        lats.append(jnp.transpose(ze.reshape(B, T, -1), (0, 2, 1)))
    z_q = jnp.transpose(zq_acc.reshape(B, T, D), (0, 2, 1))
    return z_q, jnp.stack(codes, 1), jnp.concatenate(lats, 1), commit, commit


if __name__ == "__main__":
    # small, module-consistent shapes
    B, D, T = 2, 32, 16            # input_dim = 32
    n_codebooks = 4
    codebook_size = 64
    codebook_dim = 8

    key = jax.random.PRNGKey(0)
    k_z, k_p = jax.random.split(key)
    z = jax.random.normal(k_z, (B, D, T), jnp.float32)
    params = make_rvq_params(k_p, D, n_codebooks, codebook_size, codebook_dim)

    # --- exact path (f32 MXU operands): strict check vs pure-JAX reference ---
    out = residual_vq_forward(z, params, mxu_bf16=False)
    out = jax.block_until_ready(out)
    z_q, codes, latents, commit, cb_loss = out

    assert z_q.shape == (B, D, T)
    assert codes.shape == (B, n_codebooks, T)
    assert latents.shape == (B, n_codebooks * codebook_dim, T)
    assert commit.shape == () and cb_loss.shape == ()

    ref = _reference_forward(z, params)
    assert jnp.array_equal(codes, ref[1].astype(jnp.int32))
    assert jnp.allclose(z_q, ref[0], atol=1e-3, rtol=1e-3)
    assert jnp.allclose(latents, ref[2], atol=1e-3, rtol=1e-3)
    assert jnp.allclose(commit, ref[3], atol=1e-3, rtol=1e-3)

    # --- fast path (bf16 MXU operands, f32 accumulation): sanity check only
    #     (near-ties may legitimately pick a different code in bf16) ---
    out_bf = residual_vq_forward(z, params, mxu_bf16=True)
    out_bf = jax.block_until_ready(out_bf)
    zq_bf, codes_bf = out_bf[0], out_bf[1]
    assert zq_bf.shape == z_q.shape and codes_bf.shape == codes.shape
    assert bool(jnp.all(jnp.isfinite(zq_bf)))
    code_match = float(jnp.mean((codes_bf == codes).astype(jnp.float32)))
    assert code_match >= 0.9

    print("KERNEL_OK")
</pallas_src>

<mosaic_0001>
module attributes {stable_mosaic.version = 11 : i64} {
  func.func @_rvq_kernel(%arg0: i32, %arg1: memref<128x32xf32, #tpu.memory_space<vmem>>, %arg2: memref<4x8x32xf32, #tpu.memory_space<vmem>>, %arg3: memref<4x1x8xf32, #tpu.memory_space<vmem>>, %arg4: memref<4x8x64xf32, #tpu.memory_space<vmem>>, %arg5: memref<4x8x64xf32, #tpu.memory_space<vmem>>, %arg6: memref<4x8x32xf32, #tpu.memory_space<vmem>>, %arg7: memref<4x1x32xf32, #tpu.memory_space<vmem>>, %arg8: memref<128x32xf32, #tpu.memory_space<vmem>>, %arg9: memref<128x32xf32, #tpu.memory_space<vmem>>, %arg10: memref<128x4xi32, #tpu.memory_space<vmem>>, %arg11: memref<128x4xf32, #tpu.memory_space<vmem>>) attributes {dimension_semantics = [#tpu.dimension_semantics<parallel>], iteration_bounds = array<i64: 1>, scalar_prefetch = 0 : i64, scratch_operands = 0 : i64, tpu.core_type = #tpu.core_type<tc>, window_params = [{transform_indices = @transform_0, window_bounds = array<i64: 128, 32>}, {pipeline_mode = #tpu.pipeline_mode<synchronous>, transform_indices = @transform_1, window_bounds = array<i64: 4, 8, 32>}, {pipeline_mode = #tpu.pipeline_mode<synchronous>, transform_indices = @transform_2, window_bounds = array<i64: 4, 1, 8>}, {pipeline_mode = #tpu.pipeline_mode<synchronous>, transform_indices = @transform_3, window_bounds = array<i64: 4, 8, 64>}, {pipeline_mode = #tpu.pipeline_mode<synchronous>, transform_indices = @transform_4, window_bounds = array<i64: 4, 8, 64>}, {pipeline_mode = #tpu.pipeline_mode<synchronous>, transform_indices = @transform_5, window_bounds = array<i64: 4, 8, 32>}, {pipeline_mode = #tpu.pipeline_mode<synchronous>, transform_indices = @transform_6, window_bounds = array<i64: 4, 1, 32>}, {transform_indices = @transform_7, window_bounds = array<i64: 128, 32>}, {transform_indices = @transform_8, window_bounds = array<i64: 128, 32>}, {transform_indices = @transform_9, window_bounds = array<i64: 128, 4>}, {transform_indices = @transform_10, window_bounds = array<i64: 128, 4>}]} {
    %c0 = arith.constant 0 : index
    %c0_0 = arith.constant 0 : index
    %0 = vector.load %arg1[%c0, %c0_0] : memref<128x32xf32, #tpu.memory_space<vmem>>, vector<128x32xf32>
    %cst = arith.constant 0.000000e+00 : f32
    %1 = vector.broadcast %cst : f32 to vector<128x32xf32>
    %2 = tpu.iota {dimensions = array<i32: 1>} : vector<1x64xi32>
    %c0_1 = arith.constant 0 : index
    %c0_2 = arith.constant 0 : index
    %c0_3 = arith.constant 0 : index
    %3 = vector.load %arg2[%c0_1, %c0_2, %c0_3] : memref<4x8x32xf32, #tpu.memory_space<vmem>>, vector<1x8x32xf32>
    %4 = vector.shape_cast %3 : vector<1x8x32xf32> to vector<8x32xf32>
    %cst_4 = arith.constant dense<0.000000e+00> : vector<128x8xf32>
    %5 = tpu.matmul %0, %4, %cst_4 {dimension_numbers = #tpu.dot_dimension_numbers<[1], [1], [0], [0], [0, 0, 1, 0], [], []>} : vector<128x32xf32>, vector<8x32xf32>, vector<128x8xf32> -> vector<128x8xf32>
    %c0_5 = arith.constant 0 : index
    %c0_6 = arith.constant 0 : index
    %c0_7 = arith.constant 0 : index
    %6 = vector.load %arg3[%c0_5, %c0_6, %c0_7] : memref<4x1x8xf32, #tpu.memory_space<vmem>>, vector<1x1x8xf32>
    %7 = vector.shape_cast %6 : vector<1x1x8xf32> to vector<1x8xf32>
    %8 = vector.broadcast %7 : vector<1x8xf32> to vector<128x8xf32>
    %9 = arith.addf %5, %8 : vector<128x8xf32>
    %c0_8 = arith.constant 0 : index
    %c0_9 = arith.constant 0 : index
    %c0_10 = arith.constant 0 : index
    %10 = vector.load %arg4[%c0_8, %c0_9, %c0_10] : memref<4x8x64xf32, #tpu.memory_space<vmem>>, vector<1x8x64xf32>
    %11 = vector.shape_cast %10 : vector<1x8x64xf32> to vector<8x64xf32>
    %cst_11 = arith.constant dense<0.000000e+00> : vector<128x64xf32>
    %12 = tpu.matmul %9, %11, %cst_11 {dimension_numbers = #tpu.dot_dimension_numbers<[1], [0], [0], [1], [0, 0, 1, 1], [], []>} : vector<128x8xf32>, vector<8x64xf32>, vector<128x64xf32> -> vector<128x64xf32>
    %cst_12 = arith.constant dense<0xFF800000> : vector<128xf32>
    %13 = vector.multi_reduction <maximumf>, %12, %cst_12 [1] : vector<128x64xf32> to vector<128xf32>
    %14 = vector.shape_cast %13 : vector<128xf32> to vector<128x1xf32>
    %15 = vector.broadcast %14 : vector<128x1xf32> to vector<128x64xf32>
    %16 = arith.cmpf oeq, %12, %15 : vector<128x64xf32>
    %c64_i32 = arith.constant 64 : i32
    %17 = vector.shape_cast %2 : vector<1x64xi32> to vector<1x64xi32>
    %18 = vector.broadcast %17 : vector<1x64xi32> to vector<128x64xi32>
    %19 = vector.broadcast %c64_i32 : i32 to vector<128x64xi32>
    %20 = arith.select %16, %18, %19 : vector<128x64xi1>, vector<128x64xi32>
    %cst_13 = arith.constant dense<2147483647> : vector<128xi32>
    %21 = vector.multi_reduction <minsi>, %20, %cst_13 [1] : vector<128x64xi32> to vector<128xi32>
    %22 = vector.shape_cast %21 : vector<128xi32> to vector<128x1xi32>
    %c63_i32 = arith.constant 63 : i32
    %23 = vector.broadcast %c63_i32 : i32 to vector<128x1xi32>
    %24 = arith.minsi %22, %23 : vector<128x1xi32>
    %25 = vector.broadcast %2 : vector<1x64xi32> to vector<128x64xi32>
    %26 = vector.broadcast %24 : vector<128x1xi32> to vector<128x64xi32>
    %27 = arith.cmpi eq, %25, %26 : vector<128x64xi32>
    %28 = arith.extui %27 : vector<128x64xi1> to vector<128x64xi32>
    %29 = arith.sitofp %28 : vector<128x64xi32> to vector<128x64xf32>
    %c0_14 = arith.constant 0 : index
    %c0_15 = arith.constant 0 : index
    %c0_16 = arith.constant 0 : index
    %30 = vector.load %arg5[%c0_14, %c0_15, %c0_16] : memref<4x8x64xf32, #tpu.memory_space<vmem>>, vector<1x8x64xf32>
    %31 = vector.shape_cast %30 : vector<1x8x64xf32> to vector<8x64xf32>
    %cst_17 = arith.constant dense<0.000000e+00> : vector<128x8xf32>
    %32 = tpu.matmul %29, %31, %cst_17 {dimension_numbers = #tpu.dot_dimension_numbers<[1], [1], [0], [0], [0, 0, 1, 0], [], []>} : vector<128x64xf32>, vector<8x64xf32>, vector<128x8xf32> -> vector<128x8xf32>
    %33 = arith.subf %9, %32 : vector<128x8xf32>
    %34 = arith.mulf %33, %33 : vector<128x8xf32>
    %cst_18 = arith.constant dense<0.000000e+00> : vector<128xf32>
    %35 = vector.multi_reduction <add>, %34, %cst_18 [1] : vector<128x8xf32> to vector<128xf32>
    %36 = vector.shape_cast %35 : vector<128xf32> to vector<128x1xf32>
    %c0_19 = arith.constant 0 : index
    %c0_20 = arith.constant 0 : index
    %c0_21 = arith.constant 0 : index
    %37 = vector.load %arg6[%c0_19, %c0_20, %c0_21] : memref<4x8x32xf32, #tpu.memory_space<vmem>>, vector<1x8x32xf32>
    %38 = vector.shape_cast %37 : vector<1x8x32xf32> to vector<8x32xf32>
    %cst_22 = arith.constant dense<0.000000e+00> : vector<128x32xf32>
    %39 = tpu.matmul %32, %38, %cst_22 {dimension_numbers = #tpu.dot_dimension_numbers<[1], [0], [0], [1], [0, 0, 1, 1], [], []>} : vector<128x8xf32>, vector<8x32xf32>, vector<128x32xf32> -> vector<128x32xf32>
    %c0_23 = arith.constant 0 : index
    %c0_24 = arith.constant 0 : index
    %c0_25 = arith.constant 0 : index
    %40 = vector.load %arg7[%c0_23, %c0_24, %c0_25] : memref<4x1x32xf32, #tpu.memory_space<vmem>>, vector<1x1x32xf32>
    %41 = vector.shape_cast %40 : vector<1x1x32xf32> to vector<1x32xf32>
    %42 = vector.broadcast %41 : vector<1x32xf32> to vector<128x32xf32>
    %43 = arith.addf %39, %42 : vector<128x32xf32>
    %44 = arith.addf %1, %43 : vector<128x32xf32>
    %45 = arith.subf %0, %43 : vector<128x32xf32>
    %c1 = arith.constant 1 : index
    %c0_26 = arith.constant 0 : index
    %c0_27 = arith.constant 0 : index
    %46 = vector.load %arg2[%c1, %c0_26, %c0_27] : memref<4x8x32xf32, #tpu.memory_space<vmem>>, vector<1x8x32xf32>
    %47 = vector.shape_cast %46 : vector<1x8x32xf32> to vector<8x32xf32>
    %cst_28 = arith.constant dense<0.000000e+00> : vector<128x8xf32>
    %48 = tpu.matmul %45, %47, %cst_28 {dimension_numbers = #tpu.dot_dimension_numbers<[1], [1], [0], [0], [0, 0, 1, 0], [], []>} : vector<128x32xf32>, vector<8x32xf32>, vector<128x8xf32> -> vector<128x8xf32>
    %c1_29 = arith.constant 1 : index
    %c0_30 = arith.constant 0 : index
    %c0_31 = arith.constant 0 : index
    %49 = vector.load %arg3[%c1_29, %c0_30, %c0_31] : memref<4x1x8xf32, #tpu.memory_space<vmem>>, vector<1x1x8xf32>
    %50 = vector.shape_cast %49 : vector<1x1x8xf32> to vector<1x8xf32>
    %51 = vector.broadcast %50 : vector<1x8xf32> to vector<128x8xf32>
    %52 = arith.addf %48, %51 : vector<128x8xf32>
    %c1_32 = arith.constant 1 : index
    %c0_33 = arith.constant 0 : index
    %c0_34 = arith.constant 0 : index
    %53 = vector.load %arg4[%c1_32, %c0_33, %c0_34] : memref<4x8x64xf32, #tpu.memory_space<vmem>>, vector<1x8x64xf32>
    %54 = vector.shape_cast %53 : vector<1x8x64xf32> to vector<8x64xf32>
    %cst_35 = arith.constant dense<0.000000e+00> : vector<128x64xf32>
    %55 = tpu.matmul %52, %54, %cst_35 {dimension_numbers = #tpu.dot_dimension_numbers<[1], [0], [0], [1], [0, 0, 1, 1], [], []>} : vector<128x8xf32>, vector<8x64xf32>, vector<128x64xf32> -> vector<128x64xf32>
    %cst_36 = arith.constant dense<0xFF800000> : vector<128xf32>
    %56 = vector.multi_reduction <maximumf>, %55, %cst_36 [1] : vector<128x64xf32> to vector<128xf32>
    %57 = vector.shape_cast %56 : vector<128xf32> to vector<128x1xf32>
    %58 = vector.broadcast %57 : vector<128x1xf32> to vector<128x64xf32>
    %59 = arith.cmpf oeq, %55, %58 : vector<128x64xf32>
    %c64_i32_37 = arith.constant 64 : i32
    %60 = vector.shape_cast %2 : vector<1x64xi32> to vector<1x64xi32>
    %61 = vector.broadcast %60 : vector<1x64xi32> to vector<128x64xi32>
    %62 = vector.broadcast %c64_i32_37 : i32 to vector<128x64xi32>
    %63 = arith.select %59, %61, %62 : vector<128x64xi1>, vector<128x64xi32>
    %cst_38 = arith.constant dense<2147483647> : vector<128xi32>
    %64 = vector.multi_reduction <minsi>, %63, %cst_38 [1] : vector<128x64xi32> to vector<128xi32>
    %65 = vector.shape_cast %64 : vector<128xi32> to vector<128x1xi32>
    %c63_i32_39 = arith.constant 63 : i32
    %66 = vector.broadcast %c63_i32_39 : i32 to vector<128x1xi32>
    %67 = arith.minsi %65, %66 : vector<128x1xi32>
    %68 = vector.broadcast %2 : vector<1x64xi32> to vector<128x64xi32>
    %69 = vector.broadcast %67 : vector<128x1xi32> to vector<128x64xi32>
    %70 = arith.cmpi eq, %68, %69 : vector<128x64xi32>
    %71 = arith.extui %70 : vector<128x64xi1> to vector<128x64xi32>
    %72 = arith.sitofp %71 : vector<128x64xi32> to vector<128x64xf32>
    %c1_40 = arith.constant 1 : index
    %c0_41 = arith.constant 0 : index
    %c0_42 = arith.constant 0 : index
    %73 = vector.load %arg5[%c1_40, %c0_41, %c0_42] : memref<4x8x64xf32, #tpu.memory_space<vmem>>, vector<1x8x64xf32>
    %74 = vector.shape_cast %73 : vector<1x8x64xf32> to vector<8x64xf32>
    %cst_43 = arith.constant dense<0.000000e+00> : vector<128x8xf32>
    %75 = tpu.matmul %72, %74, %cst_43 {dimension_numbers = #tpu.dot_dimension_numbers<[1], [1], [0], [0], [0, 0, 1, 0], [], []>} : vector<128x64xf32>, vector<8x64xf32>, vector<128x8xf32> -> vector<128x8xf32>
    %76 = arith.subf %52, %75 : vector<128x8xf32>
    %77 = arith.mulf %76, %76 : vector<128x8xf32>
    %cst_44 = arith.constant dense<0.000000e+00> : vector<128xf32>
    %78 = vector.multi_reduction <add>, %77, %cst_44 [1] : vector<128x8xf32> to vector<128xf32>
    %79 = vector.shape_cast %78 : vector<128xf32> to vector<128x1xf32>
    %c1_45 = arith.constant 1 : index
    %c0_46 = arith.constant 0 : index
    %c0_47 = arith.constant 0 : index
    %80 = vector.load %arg6[%c1_45, %c0_46, %c0_47] : memref<4x8x32xf32, #tpu.memory_space<vmem>>, vector<1x8x32xf32>
    %81 = vector.shape_cast %80 : vector<1x8x32xf32> to vector<8x32xf32>
    %cst_48 = arith.constant dense<0.000000e+00> : vector<128x32xf32>
    %82 = tpu.matmul %75, %81, %cst_48 {dimension_numbers = #tpu.dot_dimension_numbers<[1], [0], [0], [1], [0, 0, 1, 1], [], []>} : vector<128x8xf32>, vector<8x32xf32>, vector<128x32xf32> -> vector<128x32xf32>
    %c1_49 = arith.constant 1 : index
    %c0_50 = arith.constant 0 : index
    %c0_51 = arith.constant 0 : index
    %83 = vector.load %arg7[%c1_49, %c0_50, %c0_51] : memref<4x1x32xf32, #tpu.memory_space<vmem>>, vector<1x1x32xf32>
    %84 = vector.shape_cast %83 : vector<1x1x32xf32> to vector<1x32xf32>
    %85 = vector.broadcast %84 : vector<1x32xf32> to vector<128x32xf32>
    %86 = arith.addf %82, %85 : vector<128x32xf32>
    %87 = arith.addf %44, %86 : vector<128x32xf32>
    %88 = arith.subf %45, %86 : vector<128x32xf32>
    %c2 = arith.constant 2 : index
    %c0_52 = arith.constant 0 : index
    %c0_53 = arith.constant 0 : index
    %89 = vector.load %arg2[%c2, %c0_52, %c0_53] : memref<4x8x32xf32, #tpu.memory_space<vmem>>, vector<1x8x32xf32>
    %90 = vector.shape_cast %89 : vector<1x8x32xf32> to vector<8x32xf32>
    %cst_54 = arith.constant dense<0.000000e+00> : vector<128x8xf32>
    %91 = tpu.matmul %88, %90, %cst_54 {dimension_numbers = #tpu.dot_dimension_numbers<[1], [1], [0], [0], [0, 0, 1, 0], [], []>} : vector<128x32xf32>, vector<8x32xf32>, vector<128x8xf32> -> vector<128x8xf32>
    %c2_55 = arith.constant 2 : index
    %c0_56 = arith.constant 0 : index
    %c0_57 = arith.constant 0 : index
    %92 = vector.load %arg3[%c2_55, %c0_56, %c0_57] : memref<4x1x8xf32, #tpu.memory_space<vmem>>, vector<1x1x8xf32>
    %93 = vector.shape_cast %92 : vector<1x1x8xf32> to vector<1x8xf32>
    %94 = vector.broadcast %93 : vector<1x8xf32> to vector<128x8xf32>
    %95 = arith.addf %91, %94 : vector<128x8xf32>
    %c2_58 = arith.constant 2 : index
    %c0_59 = arith.constant 0 : index
    %c0_60 = arith.constant 0 : index
    %96 = vector.load %arg4[%c2_58, %c0_59, %c0_60] : memref<4x8x64xf32, #tpu.memory_space<vmem>>, vector<1x8x64xf32>
    %97 = vector.shape_cast %96 : vector<1x8x64xf32> to vector<8x64xf32>
    %cst_61 = arith.constant dense<0.000000e+00> : vector<128x64xf32>
    %98 = tpu.matmul %95, %97, %cst_61 {dimension_numbers = #tpu.dot_dimension_numbers<[1], [0], [0], [1], [0, 0, 1, 1], [], []>} : vector<128x8xf32>, vector<8x64xf32>, vector<128x64xf32> -> vector<128x64xf32>
    %cst_62 = arith.constant dense<0xFF800000> : vector<128xf32>
    %99 = vector.multi_reduction <maximumf>, %98, %cst_62 [1] : vector<128x64xf32> to vector<128xf32>
    %100 = vector.shape_cast %99 : vector<128xf32> to vector<128x1xf32>
    %101 = vector.broadcast %100 : vector<128x1xf32> to vector<128x64xf32>
    %102 = arith.cmpf oeq, %98, %101 : vector<128x64xf32>
    %c64_i32_63 = arith.constant 64 : i32
    %103 = vector.shape_cast %2 : vector<1x64xi32> to vector<1x64xi32>
    %104 = vector.broadcast %103 : vector<1x64xi32> to vector<128x64xi32>
    %105 = vector.broadcast %c64_i32_63 : i32 to vector<128x64xi32>
    %106 = arith.select %102, %104, %105 : vector<128x64xi1>, vector<128x64xi32>
    %cst_64 = arith.constant dense<2147483647> : vector<128xi32>
    %107 = vector.multi_reduction <minsi>, %106, %cst_64 [1] : vector<128x64xi32> to vector<128xi32>
    %108 = vector.shape_cast %107 : vector<128xi32> to vector<128x1xi32>
    %c63_i32_65 = arith.constant 63 : i32
    %109 = vector.broadcast %c63_i32_65 : i32 to vector<128x1xi32>
    %110 = arith.minsi %108, %109 : vector<128x1xi32>
    %111 = vector.broadcast %2 : vector<1x64xi32> to vector<128x64xi32>
    %112 = vector.broadcast %110 : vector<128x1xi32> to vector<128x64xi32>
    %113 = arith.cmpi eq, %111, %112 : vector<128x64xi32>
    %114 = arith.extui %113 : vector<128x64xi1> to vector<128x64xi32>
    %115 = arith.sitofp %114 : vector<128x64xi32> to vector<128x64xf32>
    %c2_66 = arith.constant 2 : index
    %c0_67 = arith.constant 0 : index
    %c0_68 = arith.constant 0 : index
    %116 = vector.load %arg5[%c2_66, %c0_67, %c0_68] : memref<4x8x64xf32, #tpu.memory_space<vmem>>, vector<1x8x64xf32>
    %117 = vector.shape_cast %116 : vector<1x8x64xf32> to vector<8x64xf32>
    %cst_69 = arith.constant dense<0.000000e+00> : vector<128x8xf32>
    %118 = tpu.matmul %115, %117, %cst_69 {dimension_numbers = #tpu.dot_dimension_numbers<[1], [1], [0], [0], [0, 0, 1, 0], [], []>} : vector<128x64xf32>, vector<8x64xf32>, vector<128x8xf32> -> vector<128x8xf32>
    %119 = arith.subf %95, %118 : vector<128x8xf32>
    %120 = arith.mulf %119, %119 : vector<128x8xf32>
    %cst_70 = arith.constant dense<0.000000e+00> : vector<128xf32>
    %121 = vector.multi_reduction <add>, %120, %cst_70 [1] : vector<128x8xf32> to vector<128xf32>
    %122 = vector.shape_cast %121 : vector<128xf32> to vector<128x1xf32>
    %c2_71 = arith.constant 2 : index
    %c0_72 = arith.constant 0 : index
    %c0_73 = arith.constant 0 : index
    %123 = vector.load %arg6[%c2_71, %c0_72, %c0_73] : memref<4x8x32xf32, #tpu.memory_space<vmem>>, vector<1x8x32xf32>
    %124 = vector.shape_cast %123 : vector<1x8x32xf32> to vector<8x32xf32>
    %cst_74 = arith.constant dense<0.000000e+00> : vector<128x32xf32>
    %125 = tpu.matmul %118, %124, %cst_74 {dimension_numbers = #tpu.dot_dimension_numbers<[1], [0], [0], [1], [0, 0, 1, 1], [], []>} : vector<128x8xf32>, vector<8x32xf32>, vector<128x32xf32> -> vector<128x32xf32>
    %c2_75 = arith.constant 2 : index
    %c0_76 = arith.constant 0 : index
    %c0_77 = arith.constant 0 : index
    %126 = vector.load %arg7[%c2_75, %c0_76, %c0_77] : memref<4x1x32xf32, #tpu.memory_space<vmem>>, vector<1x1x32xf32>
    %127 = vector.shape_cast %126 : vector<1x1x32xf32> to vector<1x32xf32>
    %128 = vector.broadcast %127 : vector<1x32xf32> to vector<128x32xf32>
    %129 = arith.addf %125, %128 : vector<128x32xf32>
    %130 = arith.addf %87, %129 : vector<128x32xf32>
    %131 = arith.subf %88, %129 : vector<128x32xf32>
    %c3 = arith.constant 3 : index
    %c0_78 = arith.constant 0 : index
    %c0_79 = arith.constant 0 : index
    %132 = vector.load %arg2[%c3, %c0_78, %c0_79] : memref<4x8x32xf32, #tpu.memory_space<vmem>>, vector<1x8x32xf32>
    %133 = vector.shape_cast %132 : vector<1x8x32xf32> to vector<8x32xf32>
    %cst_80 = arith.constant dense<0.000000e+00> : vector<128x8xf32>
    %134 = tpu.matmul %131, %133, %cst_80 {dimension_numbers = #tpu.dot_dimension_numbers<[1], [1], [0], [0], [0, 0, 1, 0], [], []>} : vector<128x32xf32>, vector<8x32xf32>, vector<128x8xf32> -> vector<128x8xf32>
    %c3_81 = arith.constant 3 : index
    %c0_82 = arith.constant 0 : index
    %c0_83 = arith.constant 0 : index
    %135 = vector.load %arg3[%c3_81, %c0_82, %c0_83] : memref<4x1x8xf32, #tpu.memory_space<vmem>>, vector<1x1x8xf32>
    %136 = vector.shape_cast %135 : vector<1x1x8xf32> to vector<1x8xf32>
    %137 = vector.broadcast %136 : vector<1x8xf32> to vector<128x8xf32>
    %138 = arith.addf %134, %137 : vector<128x8xf32>
    %c3_84 = arith.constant 3 : index
    %c0_85 = arith.constant 0 : index
    %c0_86 = arith.constant 0 : index
    %139 = vector.load %arg4[%c3_84, %c0_85, %c0_86] : memref<4x8x64xf32, #tpu.memory_space<vmem>>, vector<1x8x64xf32>
    %140 = vector.shape_cast %139 : vector<1x8x64xf32> to vector<8x64xf32>
    %cst_87 = arith.constant dense<0.000000e+00> : vector<128x64xf32>
    %141 = tpu.matmul %138, %140, %cst_87 {dimension_numbers = #tpu.dot_dimension_numbers<[1], [0], [0], [1], [0, 0, 1, 1], [], []>} : vector<128x8xf32>, vector<8x64xf32>, vector<128x64xf32> -> vector<128x64xf32>
    %cst_88 = arith.constant dense<0xFF800000> : vector<128xf32>
    %142 = vector.multi_reduction <maximumf>, %141, %cst_88 [1] : vector<128x64xf32> to vector<128xf32>
    %143 = vector.shape_cast %142 : vector<128xf32> to vector<128x1xf32>
    %144 = vector.broadcast %143 : vector<128x1xf32> to vector<128x64xf32>
    %145 = arith.cmpf oeq, %141, %144 : vector<128x64xf32>
    %c64_i32_89 = arith.constant 64 : i32
    %146 = vector.shape_cast %2 : vector<1x64xi32> to vector<1x64xi32>
    %147 = vector.broadcast %146 : vector<1x64xi32> to vector<128x64xi32>
    %148 = vector.broadcast %c64_i32_89 : i32 to vector<128x64xi32>
    %149 = arith.select %145, %147, %148 : vector<128x64xi1>, vector<128x64xi32>
    %cst_90 = arith.constant dense<2147483647> : vector<128xi32>
    %150 = vector.multi_reduction <minsi>, %149, %cst_90 [1] : vector<128x64xi32> to vector<128xi32>
    %151 = vector.shape_cast %150 : vector<128xi32> to vector<128x1xi32>
    %c63_i32_91 = arith.constant 63 : i32
    %152 = vector.broadcast %c63_i32_91 : i32 to vector<128x1xi32>
    %153 = arith.minsi %151, %152 : vector<128x1xi32>
    %154 = vector.broadcast %2 : vector<1x64xi32> to vector<128x64xi32>
    %155 = vector.broadcast %153 : vector<128x1xi32> to vector<128x64xi32>
    %156 = arith.cmpi eq, %154, %155 : vector<128x64xi32>
    %157 = arith.extui %156 : vector<128x64xi1> to vector<128x64xi32>
    %158 = arith.sitofp %157 : vector<128x64xi32> to vector<128x64xf32>
    %c3_92 = arith.constant 3 : index
    %c0_93 = arith.constant 0 : index
    %c0_94 = arith.constant 0 : index
    %159 = vector.load %arg5[%c3_92, %c0_93, %c0_94] : memref<4x8x64xf32, #tpu.memory_space<vmem>>, vector<1x8x64xf32>
    %160 = vector.shape_cast %159 : vector<1x8x64xf32> to vector<8x64xf32>
    %cst_95 = arith.constant dense<0.000000e+00> : vector<128x8xf32>
    %161 = tpu.matmul %158, %160, %cst_95 {dimension_numbers = #tpu.dot_dimension_numbers<[1], [1], [0], [0], [0, 0, 1, 0], [], []>} : vector<128x64xf32>, vector<8x64xf32>, vector<128x8xf32> -> vector<128x8xf32>
    %162 = arith.subf %138, %161 : vector<128x8xf32>
    %163 = arith.mulf %162, %162 : vector<128x8xf32>
    %cst_96 = arith.constant dense<0.000000e+00> : vector<128xf32>
    %164 = vector.multi_reduction <add>, %163, %cst_96 [1] : vector<128x8xf32> to vector<128xf32>
    %165 = vector.shape_cast %164 : vector<128xf32> to vector<128x1xf32>
    %c3_97 = arith.constant 3 : index
    %c0_98 = arith.constant 0 : index
    %c0_99 = arith.constant 0 : index
    %166 = vector.load %arg6[%c3_97, %c0_98, %c0_99] : memref<4x8x32xf32, #tpu.memory_space<vmem>>, vector<1x8x32xf32>
    %167 = vector.shape_cast %166 : vector<1x8x32xf32> to vector<8x32xf32>
    %cst_100 = arith.constant dense<0.000000e+00> : vector<128x32xf32>
    %168 = tpu.matmul %161, %167, %cst_100 {dimension_numbers = #tpu.dot_dimension_numbers<[1], [0], [0], [1], [0, 0, 1, 1], [], []>} : vector<128x8xf32>, vector<8x32xf32>, vector<128x32xf32> -> vector<128x32xf32>
    %c3_101 = arith.constant 3 : index
    %c0_102 = arith.constant 0 : index
    %c0_103 = arith.constant 0 : index
    %169 = vector.load %arg7[%c3_101, %c0_102, %c0_103] : memref<4x1x32xf32, #tpu.memory_space<vmem>>, vector<1x1x32xf32>
    %170 = vector.shape_cast %169 : vector<1x1x32xf32> to vector<1x32xf32>
    %171 = vector.broadcast %170 : vector<1x32xf32> to vector<128x32xf32>
    %172 = arith.addf %168, %171 : vector<128x32xf32>
    %173 = arith.addf %130, %172 : vector<128x32xf32>
    %c0_104 = arith.constant 0 : index
    %c0_105 = arith.constant 0 : index
    %174 = vector.load %arg8[%c0_104, %c0_105] : memref<128x32xf32, #tpu.memory_space<vmem>>, vector<128x32xf32>
    tpu.vector_store %arg8[%c0_104, %c0_105], %173 {strides = array<i32>} : memref<128x32xf32, #tpu.memory_space<vmem>>, vector<128x32xf32>,
    %175 = tpu.concatenate %9, %52, %95, %138 in 1 : vector<128x8xf32>, vector<128x8xf32>, vector<128x8xf32>, vector<128x8xf32> -> vector<128x32xf32>
    %c0_106 = arith.constant 0 : index
    %c0_107 = arith.constant 0 : index
    %176 = vector.load %arg9[%c0_106, %c0_107] : memref<128x32xf32, #tpu.memory_space<vmem>>, vector<128x32xf32>
    tpu.vector_store %arg9[%c0_106, %c0_107], %175 {strides = array<i32>} : memref<128x32xf32, #tpu.memory_space<vmem>>, vector<128x32xf32>,
    %177 = tpu.concatenate %24, %67, %110, %153 in 1 : vector<128x1xi32>, vector<128x1xi32>, vector<128x1xi32>, vector<128x1xi32> -> vector<128x4xi32>
    %c0_108 = arith.constant 0 : index
    %c0_109 = arith.constant 0 : index
    %178 = vector.load %arg10[%c0_108, %c0_109] : memref<128x4xi32, #tpu.memory_space<vmem>>, vector<128x4xi32>
    tpu.vector_store %arg10[%c0_108, %c0_109], %177 {strides = array<i32>} : memref<128x4xi32, #tpu.memory_space<vmem>>, vector<128x4xi32>,
    %179 = tpu.concatenate %36, %79, %122, %165 in 1 : vector<128x1xf32>, vector<128x1xf32>, vector<128x1xf32>, vector<128x1xf32> -> vector<128x4xf32>
    %c0_110 = arith.constant 0 : index
    %c0_111 = arith.constant 0 : index
    %180 = vector.load %arg11[%c0_110, %c0_111] : memref<128x4xf32, #tpu.memory_space<vmem>>, vector<128x4xf32>
    tpu.vector_store %arg11[%c0_110, %c0_111], %179 {strides = array<i32>} : memref<128x4xf32, #tpu.memory_space<vmem>>, vector<128x4xf32>,
    return
  }
  func.func @transform_0(%arg0: i32) -> (i32, i32) {
    %c0_i32 = arith.constant 0 : i32
    %c0_i32_0 = arith.constant 0 : i32
    return %arg0, %c0_i32 : i32, i32
  }
  func.func @transform_1(%arg0: i32) -> (i32, i32, i32) {
    %c0_i32 = arith.constant 0 : i32
    %c0_i32_0 = arith.constant 0 : i32
    %c0_i32_1 = arith.constant 0 : i32
    %c0_i32_2 = arith.constant 0 : i32
    return %c0_i32, %c0_i32_0, %c0_i32_1 : i32, i32, i32
  }
  func.func @transform_2(%arg0: i32) -> (i32, i32, i32) {
    %c0_i32 = arith.constant 0 : i32
    %c0_i32_0 = arith.constant 0 : i32
    %c0_i32_1 = arith.constant 0 : i32
    %c0_i32_2 = arith.constant 0 : i32
    return %c0_i32, %c0_i32_0, %c0_i32_1 : i32, i32, i32
  }
  func.func @transform_3(%arg0: i32) -> (i32, i32, i32) {
    %c0_i32 = arith.constant 0 : i32
    %c0_i32_0 = arith.constant 0 : i32
    %c0_i32_1 = arith.constant 0 : i32
    %c0_i32_2 = arith.constant 0 : i32
    return %c0_i32, %c0_i32_0, %c0_i32_1 : i32, i32, i32
  }
  func.func @transform_4(%arg0: i32) -> (i32, i32, i32) {
    %c0_i32 = arith.constant 0 : i32
    %c0_i32_0 = arith.constant 0 : i32
    %c0_i32_1 = arith.constant 0 : i32
    %c0_i32_2 = arith.constant 0 : i32
    return %c0_i32, %c0_i32_0, %c0_i32_1 : i32, i32, i32
  }
  func.func @transform_5(%arg0: i32) -> (i32, i32, i32) {
    %c0_i32 = arith.constant 0 : i32
    %c0_i32_0 = arith.constant 0 : i32
    %c0_i32_1 = arith.constant 0 : i32
    %c0_i32_2 = arith.constant 0 : i32
    return %c0_i32, %c0_i32_0, %c0_i32_1 : i32, i32, i32
  }
  func.func @transform_6(%arg0: i32) -> (i32, i32, i32) {
    %c0_i32 = arith.constant 0 : i32
    %c0_i32_0 = arith.constant 0 : i32
    %c0_i32_1 = arith.constant 0 : i32
    %c0_i32_2 = arith.constant 0 : i32
    return %c0_i32, %c0_i32_0, %c0_i32_1 : i32, i32, i32
  }
  func.func @transform_7(%arg0: i32) -> (i32, i32) {
    %c0_i32 = arith.constant 0 : i32
    %c0_i32_0 = arith.constant 0 : i32
    return %arg0, %c0_i32 : i32, i32
  }
  func.func @transform_8(%arg0: i32) -> (i32, i32) {
    %c0_i32 = arith.constant 0 : i32
    %c0_i32_0 = arith.constant 0 : i32
    return %arg0, %c0_i32 : i32, i32
  }
  func.func @transform_9(%arg0: i32) -> (i32, i32) {
    %c0_i32 = arith.constant 0 : i32
    %c0_i32_0 = arith.constant 0 : i32
    return %arg0, %c0_i32 : i32, i32
  }
  func.func @transform_10(%arg0: i32) -> (i32, i32) {
    %c0_i32 = arith.constant 0 : i32
    %c0_i32_0 = arith.constant 0 : i32
    return %arg0, %c0_i32 : i32, i32
  }
}

</mosaic_0001>

<bundles_post_ra>
// kernel: tpu_custom_call.1
= control target key start
LH: loop header
LB: loop body
LE: loop exit
PB: predicated region body
PF: predicated region fallthrough
CT: control target
= control target key end

     0   :  { %vm56_vm0 = vcmask 261120   ;;  %vm254_vm1 = vcmask 64512   ;;  %vm448_vm2 = vcmask 523264   ;;  %s6723_s19 = smov 16   ;;  %s6724_s25 = smov 24   ;;  %s10248_s1 = inlined_call_operand.vmem [shape: f32[4,8,32], index: 1, kind: input, shape index: {}]   ;;  %s10249_s0 = inlined_call_operand.vmem [shape: f32[128,32], index: 0, kind: input, shape index: {}]   ;;  %s10250_s3 = inlined_call_operand.vmem [shape: f32[4,8,64], index: 3, kind: input, shape index: {}]   ;;  %s10251_s2 = inlined_call_operand.vmem [shape: f32[4,1,8], index: 2, kind: input, shape index: {}]   ;;  %s10252_s4 = inlined_call_operand.vmem [shape: f32[4,8,64], index: 4, kind: input, shape index: {}]   ;;  %s10253_s5 = inlined_call_operand.vmem [shape: f32[4,8,32], index: 5, kind: input, shape index: {}]   ;;  %s10254_s6 = inlined_call_operand.vmem [shape: f32[4,1,32], index: 6, kind: input, shape index: {}]   ;;  %s10255_s9 = inlined_call_operand.vmem [shape: s32[128,4], index: 9, kind: output, shape index: {2}]   ;;  %s10256_s8 = inlined_call_operand.vmem [shape: f32[128,32], index: 8, kind: output, shape index: {1}]   ;;  %s10257_s10 = inlined_call_operand.vmem [shape: f32[128,4], index: 10, kind: output, shape index: {3}]   ;;  %s10258_s7 = inlined_call_operand.vmem [shape: f32[128,32], index: 7, kind: output, shape index: {0}]  }
   0x1   :  { %v48_v0 = vld [vmem:[%s10248_s1] sm:$0xff]  ;;  %v31_v2 = vld [vmem:[%s10249_s0 + $0x8] sm:$0xff]  ;;  %v32_v3 = vld [vmem:[%s10249_s0 + $0x10] sm:$0xff] }
   0x2   :  { %v30_v1 = vld [vmem:[%s10249_s0] sm:$0xff]  ;;  %6285 = vmatprep.subr.msk.mxu0 %vm56_vm0, %v48_v0  ;;  %v33_v4 = vld [vmem:[%s10249_s0 + $0x18] sm:$0xff]  ;;  %v35_v6 = vld [vmem:[%s10249_s0 + $0x28] sm:$0xff] }
   0x3   :  { %6287 = vmatprep.mubr.msk.f32.mxu0 %vm56_vm0, %v30_v1  ;;  %6286 = vmatpush3.xpose.msk.msra.mxu0 %vm56_vm0, %v48_v0  ;;  %v34_v5 = vld [vmem:[%s10249_s0 + $0x20] sm:$0xff]  ;;  %v36_v7 = vld [vmem:[%s10249_s0 + $0x30] sm:$0xff]  ;;  %v37_v8 = vld [vmem:[%s10249_s0 + $0x38] sm:$0xff] }
   0x4   :  { %v38_v9 = vld [vmem:[%s10249_s0 + $0x40] sm:$0xff]  ;;  %v39_v10 = vld [vmem:[%s10249_s0 + $0x48] sm:$0xff]  ;;  %v40_v11 = vld [vmem:[%s10249_s0 + $0x50] sm:$0xff] }
   0x5   :  { %v41_v12 = vld [vmem:[%s10249_s0 + $0x58] sm:$0xff]  ;;  %v42_v13 = vld [vmem:[%s10249_s0 + $0x60] sm:$0xff]  ;;  %v43_v14 = vld [vmem:[%s10249_s0 + $0x68] sm:$0xff] }
   0x6   :  { %6288 = vmatmul.mubr.msk.f32.vlgmr.msra.gmra.mrb[0].mxu0 %vm56_vm0, %v31_v2  ;;  %v44_v15 = vld [vmem:[%s10249_s0 + $0x70] sm:$0xff]  ;;  %v45_v16 = vld [vmem:[%s10249_s0 + $0x78] sm:$0xff]  ;;  %v253_v17 = vld [vmem:[%s10250_s3] sm:$0xff] }
   0x7   :  { %6290 = vmatprep.mubr.msk.f32.mxu0 %vm56_vm0, %v32_v3  ;;  %6311 = vmatprep.subr.mxu1 %v253_v17  ;;  %v5659_v18 = vld [vmem:[%s10251_s2] ss:$0 sm:$0xff] }
   0x8   :  { %6312 = vmatpush3.msra.mxu1 %v253_v17 }
   0xa   :  { %6291 = vmatmul.mubr.msk.f32.gmra.mrb[2].mxu0 %vm56_vm0, %v33_v4 }
   0xb   :  { %6293 = vmatprep.mubr.msk.f32.mxu0 %vm56_vm0, %v34_v5 }
   0xe   :  { %6294 = vmatmul.mubr.msk.f32.gmra.mrb[4].mxu0 %vm56_vm0, %v35_v6 }
   0xf   :  { %6296 = vmatprep.mubr.msk.f32.mxu0 %vm56_vm0, %v36_v7 }
  0x12   :  { %6297 = vmatmul.mubr.msk.f32.gmra.mrb[6].mxu0 %vm56_vm0, %v37_v8 }
  0x13   :  { %6299 = vmatprep.mubr.msk.f32.mxu0 %vm56_vm0, %v38_v9 }
  0x16   :  { %6300 = vmatmul.mubr.msk.f32.gmra.mrb[8].mxu0 %vm56_vm0, %v39_v10 }
  0x17   :  { %6302 = vmatprep.mubr.msk.f32.mxu0 %vm56_vm0, %v40_v11 }
  0x1a   :  { %6303 = vmatmul.mubr.msk.f32.gmra.mrb[10].mxu0 %vm56_vm0, %v41_v12 }
  0x1b   :  { %6305 = vmatprep.mubr.msk.f32.mxu0 %vm56_vm0, %v42_v13 }
  0x1e   :  { %6306 = vmatmul.mubr.msk.f32.gmra.mrb[12].mxu0 %vm56_vm0, %v43_v14 }
  0x1f   :  { %6308 = vmatprep.mubr.msk.f32.mxu0 %vm56_vm0, %v44_v15 }
  0x22   :  { %6309 = vmatmul.mubr.msk.f32.gmra.mrb[14].mxu0 %vm56_vm0, %v45_v16 }
  0xd9   :  { %v6289_v19 = vpop.f32.mrb[0].mxu0 }
  0xda   :  { %v174_v20 = vpop.f32.mrb[1].mxu0  ;;  %v6857_v22 = vadd.f32 %v6289_v19, %v5659_v18  ;;  %v46_v19 = vlaneseq }
  0xdb   :  { %v6855_v21 = vadd.f32 %v5659_v18, %v174_v20 }
  0xdc   :  { %10485 = vst [vmem:[#allocation3_spill] sm:$0xff] %v6857_v22  ;;  %v6971_v20 = vand.u32 127, %v46_v19 }
  0xdd   :  { %10484 = vst [vmem:[#allocation2_spill] sm:$0xff] %v6855_v21  ;;  %v6292_v23 = vpop.f32.mrb[2].mxu0  ;;  %6313 = vmatprep.mubr.msk.f32.mxu1 %vm254_vm1, %v6855_v21 }
  0xde   :  { %v184_v24 = vpop.f32.mrb[3].mxu0  ;;  %6314 = vmatmul.mubr.msk.f32.vlgmr.msra.gmra.mrb[0].mxu1 %vm254_vm1, %v6857_v22  ;;  %v6865_v26 = vadd.f32 %v6292_v23, %v5659_v18 }
  0xdf   :  { %v6863_v25 = vadd.f32 %v5659_v18, %v184_v24 }
  0xe0   :  { %10487 = vst [vmem:[#allocation5_spill] sm:$0xff] %v6865_v26 }
  0xe1   :  { %10486 = vst [vmem:[#allocation4_spill] sm:$0xff] %v6863_v25  ;;  %v6295_v27 = vpop.f32.mrb[4].mxu0  ;;  %6316 = vmatprep.mubr.msk.f32.mxu1 %vm254_vm1, %v6863_v25 }
  0xe2   :  { %v6869_v28 = vadd.f32 %v6295_v27, %v5659_v18  ;;  %v194_v29 = vpop.f32.mrb[5].mxu0  ;;  %6317 = vmatmul.mubr.msk.f32.gmra.mrb[2].mxu1 %vm254_vm1, %v6865_v26 }
  0xe3   :  { %v6873_v30 = vadd.f32 %v5659_v18, %v194_v29 }
  0xe4   :  { %10488 = vst [vmem:[#allocation6_spill] sm:$0xff] %v6869_v28 }
  0xe5   :  { %10489 = vst [vmem:[#allocation7_spill] sm:$0xff] %v6873_v30  ;;  %v6298_v31 = vpop.f32.mrb[6].mxu0  ;;  %6319 = vmatprep.mubr.msk.f32.mxu1 %vm254_vm1, %v6873_v30 }
  0xe6   :  { %v6877_v32 = vadd.f32 %v6298_v31, %v5659_v18  ;;  %v204_v33 = vpop.f32.mrb[7].mxu0  ;;  %6320 = vmatmul.mubr.msk.f32.gmra.mrb[4].mxu1 %vm254_vm1, %v6869_v28 }
  0xe7   :  { %v6881_v34 = vadd.f32 %v5659_v18, %v204_v33 }
  0xe8   :  { %10490 = vst [vmem:[#allocation8_spill] sm:$0xff] %v6877_v32 }
  0xe9   :  { %10491 = vst [vmem:[#allocation9_spill] sm:$0xff] %v6881_v34  ;;  %v6301_v35 = vpop.f32.mrb[8].mxu0  ;;  %6322 = vmatprep.mubr.msk.f32.mxu1 %vm254_vm1, %v6881_v34 }
  0xea   :  { %v6885_v36 = vadd.f32 %v6301_v35, %v5659_v18  ;;  %v214_v37 = vpop.f32.mrb[9].mxu0  ;;  %6323 = vmatmul.mubr.msk.f32.gmra.mrb[6].mxu1 %vm254_vm1, %v6877_v32 }
  0xeb   :  { %v6889_v38 = vadd.f32 %v5659_v18, %v214_v37 }
  0xec   :  { %10492 = vst [vmem:[#allocation10_spill] sm:$0xff] %v6885_v36 }
  0xed   :  { %10493 = vst [vmem:[#allocation11_spill] sm:$0xff] %v6889_v38  ;;  %v6304_v39 = vpop.f32.mrb[10].mxu0  ;;  %6325 = vmatprep.mubr.msk.f32.mxu1 %vm254_vm1, %v6889_v38 }
  0xee   :  { %v6893_v40 = vadd.f32 %v6304_v39, %v5659_v18  ;;  %v224_v41 = vpop.f32.mrb[11].mxu0  ;;  %6326 = vmatmul.mubr.msk.f32.gmra.mrb[8].mxu1 %vm254_vm1, %v6885_v36 }
  0xef   :  { %v6897_v42 = vadd.f32 %v5659_v18, %v224_v41 }
  0xf0   :  { %10494 = vst [vmem:[#allocation12_spill] sm:$0xff] %v6893_v40 }
  0xf1   :  { %10495 = vst [vmem:[#allocation13_spill] sm:$0xff] %v6897_v42  ;;  %v6307_v43 = vpop.f32.mrb[12].mxu0  ;;  %6328 = vmatprep.mubr.msk.f32.mxu1 %vm254_vm1, %v6897_v42 }
  0xf2   :  { %v6901_v44 = vadd.f32 %v6307_v43, %v5659_v18  ;;  %v234_v45 = vpop.f32.mrb[13].mxu0  ;;  %6329 = vmatmul.mubr.msk.f32.gmra.mrb[10].mxu1 %vm254_vm1, %v6893_v40 }
  0xf3   :  { %v6905_v46 = vadd.f32 %v5659_v18, %v234_v45 }
  0xf4   :  { %10496 = vst [vmem:[#allocation14_spill] sm:$0xff] %v6901_v44 }
  0xf5   :  { %10497 = vst [vmem:[#allocation15_spill] sm:$0xff] %v6905_v46  ;;  %v6310_v47 = vpop.f32.mrb[14].mxu0  ;;  %6331 = vmatprep.mubr.msk.f32.mxu1 %vm254_vm1, %v6905_v46 }
  0xf6   :  { %v6909_v48 = vadd.f32 %v6310_v47, %v5659_v18  ;;  %v244_v49 = vpop.f32.mrb[15].mxu0  ;;  %6332 = vmatmul.mubr.msk.f32.gmra.mrb[12].mxu1 %vm254_vm1, %v6901_v44 }
  0xf7   :  { %v6913_v50 = vadd.f32 %v5659_v18, %v244_v49 }
  0xf8   :  { %10498 = vst [vmem:[#allocation16_spill] sm:$0xff] %v6909_v48 }
  0xf9   :  { %10499 = vst [vmem:[#allocation17_spill] sm:$0xff] %v6913_v50  ;;  %6334 = vmatprep.mubr.msk.f32.mxu1 %vm254_vm1, %v6913_v50 }
  0xfa   :  { %6335 = vmatmul.mubr.msk.f32.gmra.mrb[14].mxu1 %vm254_vm1, %v6909_v48 }
 0x1b1   :  { %v6315_v51 = vpop.f32.mrb[0].mxu1 }
 0x1b2   :  { %v369_v52 = vpop.f32.mrb[1].mxu1  ;;  %v452_v56 = vsel %vm448_vm2, %v6315_v51, -inf }
 0x1b3   :  { %v449_v53 = vsel %vm448_vm2, %v369_v52, -inf }
 0x1b4   :  { %450 = vmax.xlane.f32.xlu0 %v449_v53 }
 0x1b5   :  { %v6920_v54 = vpop.f32.mrb[2].mxu1 }
 0x1b6   :  { %v379_v55 = vpop.f32.mrb[3].mxu1  ;;  %v458_v60 = vsel %vm448_vm2, %v6920_v54, -inf }
 0x1b7   :  { %v455_v57 = vsel %vm448_vm2, %v379_v55, -inf }
 0x1b8   :  { %453 = vmax.xlane.f32.xlu0 %v452_v56  ;;  %456 = vmax.xlane.f32.xlu1 %v455_v57 }
 0x1b9   :  { %v6924_v58 = vpop.f32.mrb[4].mxu1 }
 0x1ba   :  { %v389_v59 = vpop.f32.mrb[5].mxu1  ;;  %v464_v0 = vsel %vm448_vm2, %v6924_v58, -inf }
 0x1bb   :  { %v461_v61 = vsel %vm448_vm2, %v389_v59, -inf }
 0x1bc   :  { %459 = vmax.xlane.f32.xlu1 %v458_v60  ;;  %462 = vmax.xlane.f32.xlu0 %v461_v61 }
 0x1bd   :  { %v6929_v62 = vpop.f32.mrb[6].mxu1 }
 0x1be   :  { %v6931_v63 = vpop.f32.mrb[7].mxu1  ;;  %v470_v4 = vsel %vm448_vm2, %v6929_v62, -inf }
 0x1bf   :  { %v467_v1 = vsel %vm448_vm2, %v6931_v63, -inf }
 0x1c0   :  { %465 = vmax.xlane.f32.xlu1 %v464_v0  ;;  %468 = vmax.xlane.f32.xlu0 %v467_v1 }
 0x1c1   :  { %v6937_v2 = vpop.f32.mrb[8].mxu1 }
 0x1c2   :  { %v6939_v3 = vpop.f32.mrb[9].mxu1  ;;  %v476_v8 = vsel %vm448_vm2, %v6937_v2, -inf }
 0x1c3   :  { %v473_v5 = vsel %vm448_vm2, %v6939_v3, -inf }
 0x1c4   :  { %471 = vmax.xlane.f32.xlu1 %v470_v4  ;;  %474 = vmax.xlane.f32.xlu0 %v473_v5 }
 0x1c5   :  { %v6945_v6 = vpop.f32.mrb[10].mxu1 }
 0x1c6   :  { %v6947_v7 = vpop.f32.mrb[11].mxu1  ;;  %v482_v12 = vsel %vm448_vm2, %v6945_v6, -inf }
 0x1c7   :  { %v479_v9 = vsel %vm448_vm2, %v6947_v7, -inf }
 0x1c8   :  { %477 = vmax.xlane.f32.xlu1 %v476_v8  ;;  %480 = vmax.xlane.f32.xlu0 %v479_v9 }
 0x1c9   :  { %v6953_v10 = vpop.f32.mrb[12].mxu1 }
 0x1ca   :  { %v6955_v11 = vpop.f32.mrb[13].mxu1  ;;  %v488_v16 = vsel %vm448_vm2, %v6953_v10, -inf }
 0x1cb   :  { %v485_v13 = vsel %vm448_vm2, %v6955_v11, -inf }
 0x1cc   :  { %483 = vmax.xlane.f32.xlu1 %v482_v12  ;;  %486 = vmax.xlane.f32.xlu0 %v485_v13 }
 0x1cd   :  { %v6961_v14 = vpop.f32.mrb[14].mxu1 }
 0x1ce   :  { %v6963_v15 = vpop.f32.mrb[15].mxu1  ;;  %v494_v18 = vsel %vm448_vm2, %v6961_v14, -inf }
 0x1cf   :  { %v491_v17 = vsel %vm448_vm2, %v6963_v15, -inf }
 0x1d0   :  { %489 = vmax.xlane.f32.xlu1 %v488_v16  ;;  %492 = vmax.xlane.f32.xlu0 %v491_v17 }
 0x1d4   :  { %495 = vmax.xlane.f32.xlu1 %v494_v18 }
 0x241   :  { %v451_v23 = vpop.xlane.xlu0 %450 }
 0x242   :  { %vm497_vm3 = vcmp.eq.f32.partialorder %v369_v52, %v451_v23 }
 0x243   :  { %v513_v24 = vsel %vm497_vm3, %v6971_v20, 64 }
 0x244   :  { %v6975_v27 = vsel %vm448_vm2, %v513_v24, 2147483647 }
 0x245   :  { %v454_v29 = vpop.xlane.xlu0 %453  ;;  %v457_v31 = vpop.xlane.xlu1 %456  ;;  %v531_v33 = vshra.s32 %v6975_v27, 16 }
 0x246   :  { %vm498_vm4 = vcmp.eq.f32.partialorder %v6315_v51, %v454_v29  ;;  %vm499_vm5 = vcmp.eq.f32.partialorder %v379_v55, %v457_v31 }
 0x247   :  { %v514_v35 = vsel %vm498_vm4, %v6971_v20, 64  ;;  %v515_v37 = vsel %vm499_vm5, %v6971_v20, 64  ;;  %v6980_v39 = vcvt.s32.f32 %v531_v33 }
 0x248   :  { %v6983_v41 = vsel %vm448_vm2, %v514_v35, 2147483647  ;;  %v6986_v43 = vsel %vm448_vm2, %v515_v37, 2147483647 }
 0x249   :  { %v460_v45 = vpop.xlane.xlu1 %459  ;;  %v463_v47 = vpop.xlane.xlu0 %462  ;;  %534 = vmin.xlane.f32.xlu0 %v6980_v39  ;;  %v546_v49 = vshra.s32 %v6983_v41, 16  ;;  %v561_v51 = vshra.s32 %v6986_v43, 16 }
 0x24a   :  { %vm500_vm6 = vcmp.eq.f32.partialorder %v6920_v54, %v460_v45  ;;  %vm501_vm7 = vcmp.eq.f32.partialorder %v389_v59, %v463_v47 }
 0x24b   :  { %v516_v52 = vsel %vm500_vm6, %v6971_v20, 64  ;;  %v517_v53 = vsel %vm501_vm7, %v6971_v20, 64  ;;  %v6994_v55 = vcvt.s32.f32 %v546_v49  ;;  %v6996_v56 = vcvt.s32.f32 %v561_v51 }
 0x24c   :  { %v6999_v57 = vsel %vm448_vm2, %v516_v52, 2147483647  ;;  %v7002_v60 = vsel %vm448_vm2, %v517_v53, 2147483647 }
 0x24d   :  { %v466_v61 = vpop.xlane.xlu1 %465  ;;  %v469_v0 = vpop.xlane.xlu0 %468  ;;  %549 = vmin.xlane.f32.xlu1 %v6994_v55  ;;  %564 = vmin.xlane.f32.xlu0 %v6996_v56  ;;  %v576_v54 = vshra.s32 %v6999_v57, 16  ;;  %v591_v59 = vshra.s32 %v7002_v60, 16 }
 0x24e   :  { %vm502_vm8 = vcmp.eq.f32.partialorder %v6924_v58, %v466_v61  ;;  %vm503_vm9 = vcmp.eq.f32.partialorder %v6931_v63, %v469_v0 }
 0x24f   :  { %v518_v1 = vsel %vm502_vm8, %v6971_v20, 64  ;;  %v519_v4 = vsel %vm503_vm9, %v6971_v20, 64  ;;  %v7012_v5 = vcvt.s32.f32 %v576_v54  ;;  %v7014_v8 = vcvt.s32.f32 %v591_v59 }
 0x250   :  { %v7017_v9 = vsel %vm448_vm2, %v518_v1, 2147483647  ;;  %v7020_v12 = vsel %vm448_vm2, %v519_v4, 2147483647 }
 0x251   :  { %v472_v13 = vpop.xlane.xlu1 %471  ;;  %v475_v16 = vpop.xlane.xlu0 %474  ;;  %579 = vmin.xlane.f32.xlu1 %v7012_v5  ;;  %594 = vmin.xlane.f32.xlu0 %v7014_v8  ;;  %v606_v58 = vshra.s32 %v7017_v9, 16  ;;  %v621_v63 = vshra.s32 %v7020_v12, 16 }
 0x252   :  { %vm504_vm10 = vcmp.eq.f32.partialorder %v6929_v62, %v472_v13  ;;  %vm505_vm11 = vcmp.eq.f32.partialorder %v6939_v3, %v475_v16 }
 0x253   :  { %v520_v17 = vsel %vm504_vm10, %v6971_v20, 64  ;;  %v521_v18 = vsel %vm505_vm11, %v6971_v20, 64  ;;  %v7030_v19 = vcvt.s32.f32 %v606_v58  ;;  %v7032_v23 = vcvt.s32.f32 %v621_v63 }
 0x254   :  { %v7035_v24 = vsel %vm448_vm2, %v520_v17, 2147483647  ;;  %v7038_v29 = vsel %vm448_vm2, %v521_v18, 2147483647 }
 0x255   :  { %v478_v31 = vpop.xlane.xlu1 %477  ;;  %v481_v33 = vpop.xlane.xlu0 %480  ;;  %609 = vmin.xlane.f32.xlu1 %v7030_v19  ;;  %624 = vmin.xlane.f32.xlu0 %v7032_v23  ;;  %v636_v62 = vshra.s32 %v7035_v24, 16  ;;  %v651_v3 = vshra.s32 %v7038_v29, 16 }
 0x256   :  { %vm506_vm12 = vcmp.eq.f32.partialorder %v6937_v2, %v478_v31  ;;  %vm507_vm13 = vcmp.eq.f32.partialorder %v6947_v7, %v481_v33 }
 0x257   :  { %v522_v35 = vsel %vm506_vm12, %v6971_v20, 64  ;;  %v523_v37 = vsel %vm507_vm13, %v6971_v20, 64  ;;  %v7048_v45 = vcvt.s32.f32 %v636_v62  ;;  %v7050_v47 = vcvt.s32.f32 %v651_v3 }
 0x258   :  { %v7053_v49 = vsel %vm448_vm2, %v522_v35, 2147483647  ;;  %v7056_v51 = vsel %vm448_vm2, %v523_v37, 2147483647 }
 0x259   :  { %v484_v52 = vpop.xlane.xlu1 %483  ;;  %v487_v53 = vpop.xlane.xlu0 %486  ;;  %639 = vmin.xlane.f32.xlu1 %v7048_v45  ;;  %654 = vmin.xlane.f32.xlu0 %v7050_v47  ;;  %v666_v2 = vshra.s32 %v7053_v49, 16  ;;  %v681_v7 = vshra.s32 %v7056_v51, 16 }
 0x25a   :  { %vm508_vm14 = vcmp.eq.f32.partialorder %v6945_v6, %v484_v52  ;;  %vm509_vm15 = vcmp.eq.f32.partialorder %v6955_v11, %v487_v53 }
 0x25b   :  { %v524_v61 = vsel %vm508_vm14, %v6971_v20, 64  ;;  %v525_v0 = vsel %vm509_vm15, %v6971_v20, 64  ;;  %v7066_v54 = vcvt.s32.f32 %v666_v2  ;;  %v7068_v59 = vcvt.s32.f32 %v681_v7 }
 0x25c   :  { %v7071_v1 = vsel %vm448_vm2, %v524_v61, 2147483647  ;;  %v7074_v4 = vsel %vm448_vm2, %v525_v0, 2147483647  ;;  %v530_v7 = vand.u32 65535, %v6975_v27  ;;  %v575_v27 = vand.u32 65535, %v6999_v57 }
 0x25d   :  { %v490_v13 = vpop.xlane.xlu1 %489  ;;  %669 = vmin.xlane.f32.xlu1 %v7066_v54  ;;  %684 = vmin.xlane.f32.xlu0 %v7068_v59  ;;  %v493_v6 = vpop.xlane.xlu0 %492  ;;  %v696_v11 = vshra.s32 %v7071_v1, 16  ;;  %v711_v16 = vshra.s32 %v7074_v4, 16  ;;  %v605_v57 = vand.u32 65535, %v7017_v9  ;;  %v635_v9 = vand.u32 65535, %v7035_v24 }
 0x25e   :  { %vm510_vm3 = vcmp.eq.f32.partialorder %v6953_v10, %v490_v13  ;;  %vm511_vm4 = vcmp.eq.f32.partialorder %v6963_v15, %v493_v6  ;;  %v532_v0 = vcvt.s32.f32 %v530_v7  ;;  %v545_v13 = vand.u32 65535, %v6983_v41 }
 0x25f   :  { %v526_v58 = vsel %vm510_vm3, %v6971_v20, 64  ;;  %v527_v63 = vsel %vm511_vm4, %v6971_v20, 64  ;;  %v7084_v17 = vcvt.s32.f32 %v696_v11  ;;  %v7086_v18 = vcvt.s32.f32 %v711_v16 }
 0x260   :  { %v7089_v31 = vsel %vm448_vm2, %v526_v58, 2147483647  ;;  %v7092_v33 = vsel %vm448_vm2, %v527_v63, 2147483647  ;;  %v560_v6 = vand.u32 65535, %v6986_v43  ;;  %v547_v63 = vcvt.s32.f32 %v545_v13 }
 0x261   :  { %699 = vmin.xlane.f32.xlu1 %v7084_v17  ;;  %v496_v62 = vpop.xlane.xlu1 %495  ;;  %714 = vmin.xlane.f32.xlu0 %v7086_v18  ;;  %v726_v10 = vshra.s32 %v7089_v31, 16  ;;  %v741_v15 = vshra.s32 %v7092_v33, 16  ;;  %v665_v24 = vand.u32 65535, %v7053_v49  ;;  %v695_v49 = vand.u32 65535, %v7071_v1 }
 0x262   :  { %vm512_vm5 = vcmp.eq.f32.partialorder %v6961_v14, %v496_v62  ;;  %v849_v14 = vld [vmem:[%s10252_s4] sm:$0xff]  ;;  %v562_v62 = vcvt.s32.f32 %v560_v6  ;;  %v725_v1 = vand.u32 65535, %v7089_v31 }
 0x263   :  { %v528_v3 = vsel %vm512_vm5, %v6971_v20, 64  ;;  %v7100_v35 = vcvt.s32.f32 %v726_v10  ;;  %v7102_v37 = vcvt.s32.f32 %v741_v15  ;;  %6337 = vmatprep.subr.msk.mxu1 %vm448_vm2, %v849_v14  ;;  %v590_v10 = vand.u32 65535, %v7002_v60 }
 0x264   :  { %v7105_v52 = vsel %vm448_vm2, %v528_v3, 2147483647  ;;  %6338 = vmatpush3.xpose.msk.msra.mxu1 %vm448_vm2, %v849_v14  ;;  %v577_v3 = vcvt.s32.f32 %v575_v27  ;;  %v620_v60 = vand.u32 65535, %v7020_v12  ;;  %v650_v12 = vand.u32 65535, %v7038_v29 }
 0x265   :  { %729 = vmin.xlane.f32.xlu1 %v7100_v35  ;;  %744 = vmin.xlane.f32.xlu0 %v7102_v37  ;;  %v756_v53 = vshra.s32 %v7105_v52, 16  ;;  %v680_v29 = vand.u32 65535, %v7056_v51  ;;  %v710_v51 = vand.u32 65535, %v7074_v4  ;;  %v740_v4 = vand.u32 65535, %v7092_v33 }
 0x266   :  { %v622_v13 = vcvt.s32.f32 %v620_v60  ;;  %v755_v31 = vand.u32 65535, %v7105_v52  ;;  %v1126_v52 = vld [vmem:[%s10253_s5] sm:$0xff] }
 0x267   :  { %v7110_v2 = vcvt.s32.f32 %v756_v53  ;;  %v592_v53 = vcvt.s32.f32 %v590_v10  ;;  %v712_v60 = vcvt.s32.f32 %v710_v51  ;;  %6363 = vmatprep.subr.mxu0 %v1126_v52 }
 0x268   :  { %6364 = vmatpush3.msra.mxu0 %v1126_v52 }
 0x269   :  { %759 = vmin.xlane.f32.xlu1 %v7110_v2 }
 0x2d6   :  { %v7119_v61 = vpop.xlane.xlu0 %534 }
 0x2d7   :  { %vm536_vm6 = vcmp.eq.f32.partialorder %v6980_v39, %v7119_v61 }
 0x2d8   :  { %v537_v11 = vsel %vm536_vm6, %v532_v0, inf  ;;  %v607_v0 = vcvt.s32.f32 %v605_v57  ;;  %v697_v57 = vcvt.s32.f32 %v695_v49 }
 0x2d9   :  { %538 = vmin.xlane.f32.xlu0 %v537_v11 }
 0x2da   :  { %v7125_v16 = vpop.xlane.xlu1 %549  ;;  %v7127_v58 = vpop.xlane.xlu0 %564 }
 0x2db   :  { %vm551_vm7 = vcmp.eq.f32.partialorder %v6994_v55, %v7125_v16  ;;  %vm566_vm8 = vcmp.eq.f32.partialorder %v6996_v56, %v7127_v58 }
 0x2dc   :  { %v552_v41 = vsel %vm551_vm7, %v547_v63, inf  ;;  %v567_v39 = vsel %vm566_vm8, %v562_v62, inf  ;;  %v637_v63 = vcvt.s32.f32 %v635_v9  ;;  %v652_v62 = vcvt.s32.f32 %v650_v12 }
 0x2dd   :  { %553 = vmin.xlane.f32.xlu1 %v552_v41  ;;  %568 = vmin.xlane.f32.xlu0 %v567_v39  ;;  %v667_v41 = vcvt.s32.f32 %v665_v24  ;;  %v682_v39 = vcvt.s32.f32 %v680_v29  ;;  %v757_v9 = vcvt.s32.f32 %v755_v31 }
 0x2de   :  { %v7135_v43 = vpop.xlane.xlu1 %579  ;;  %v7137_v15 = vpop.xlane.xlu0 %594 }
 0x2df   :  { %vm581_vm9 = vcmp.eq.f32.partialorder %v7012_v5, %v7135_v43  ;;  %vm596_vm10 = vcmp.eq.f32.partialorder %v7014_v8, %v7137_v15 }
 0x2e0   :  { %v582_v55 = vsel %vm581_vm9, %v577_v3, inf  ;;  %v597_v56 = vsel %vm596_vm10, %v592_v53, inf }
 0x2e1   :  { %583 = vmin.xlane.f32.xlu1 %v582_v55  ;;  %598 = vmin.xlane.f32.xlu0 %v597_v56 }
 0x2e2   :  { %v7145_v14 = vpop.xlane.xlu1 %609  ;;  %v7147_v7 = vpop.xlane.xlu0 %624 }
 0x2e3   :  { %vm611_vm11 = vcmp.eq.f32.partialorder %v7030_v19, %v7145_v14  ;;  %vm626_vm12 = vcmp.eq.f32.partialorder %v7032_v23, %v7147_v7 }
 0x2e4   :  { %v612_v5 = vsel %vm611_vm11, %v607_v0, inf  ;;  %v627_v8 = vsel %vm626_vm12, %v622_v13, inf  ;;  %v727_v0 = vcvt.s32.f32 %v725_v1  ;;  %v742_v13 = vcvt.s32.f32 %v740_v4 }
 0x2e5   :  { %613 = vmin.xlane.f32.xlu1 %v612_v5  ;;  %628 = vmin.xlane.f32.xlu0 %v627_v8  ;;  %v571_v5 = vcvt.f32.s32 %v7127_v58  ;;  %v10259_v1 = vmov 0.0  }
 0x2e6   :  { %v7155_v6 = vpop.xlane.xlu1 %639  ;;  %v7157_v11 = vpop.xlane.xlu0 %654 }
 0x2e7   :  { %vm641_vm13 = vcmp.eq.f32.partialorder %v7048_v45, %v7155_v6  ;;  %vm656_vm14 = vcmp.eq.f32.partialorder %v7050_v47, %v7157_v11 }
 0x2e8   :  { %v642_v19 = vsel %vm641_vm13, %v637_v63, inf  ;;  %v657_v23 = vsel %vm656_vm14, %v652_v62, inf }
 0x2e9   :  { %643 = vmin.xlane.f32.xlu1 %v642_v19  ;;  %658 = vmin.xlane.f32.xlu0 %v657_v23  ;;  %v586_v19 = vcvt.f32.s32 %v7135_v43  ;;  %v601_v23 = vcvt.f32.s32 %v7137_v15  ;;  %v631_v43 = vcvt.f32.s32 %v7147_v7 }
 0x2ea   :  { %v7165_v27 = vpop.xlane.xlu1 %669  ;;  %v7167_v10 = vpop.xlane.xlu0 %684 }
 0x2eb   :  { %vm671_vm15 = vcmp.eq.f32.partialorder %v7066_v54, %v7165_v27  ;;  %vm686_vm3 = vcmp.eq.f32.partialorder %v7068_v59, %v7167_v10 }
 0x2ec   :  { %v672_v45 = vsel %vm671_vm15, %v667_v41, inf  ;;  %v687_v47 = vsel %vm686_vm3, %v682_v39, inf }
 0x2ed   :  { %673 = vmin.xlane.f32.xlu1 %v672_v45  ;;  %688 = vmin.xlane.f32.xlu0 %v687_v47  ;;  %v587_v47 = vshll.u32 %v586_v19, 16  ;;  %v691_v19 = vcvt.f32.s32 %v7167_v10 }
 0x2ee   :  { %v7175_v3 = vpop.xlane.xlu1 %699  ;;  %v7177_v53 = vpop.xlane.xlu0 %714 }
 0x2ef   :  { %vm701_vm4 = vcmp.eq.f32.partialorder %v7084_v17, %v7175_v3  ;;  %vm716_vm5 = vcmp.eq.f32.partialorder %v7086_v18, %v7177_v53 }
 0x2f0   :  { %v702_v54 = vsel %vm701_vm4, %v697_v57, inf  ;;  %v717_v59 = vsel %vm716_vm5, %v712_v60, inf  ;;  %v602_v57 = vshll.u32 %v601_v23, 16 }
 0x2f1   :  { %703 = vmin.xlane.f32.xlu1 %v702_v54  ;;  %718 = vmin.xlane.f32.xlu0 %v717_v59 }
 0x2f2   :  { %v7185_v55 = vpop.xlane.xlu1 %729  ;;  %v7187_v56 = vpop.xlane.xlu0 %744 }
 0x2f3   :  { %vm731_vm6 = vcmp.eq.f32.partialorder %v7100_v35, %v7185_v55  ;;  %vm746_vm7 = vcmp.eq.f32.partialorder %v7102_v37, %v7187_v56  ;;  %v541_v35 = vcvt.f32.s32 %v7119_v61  ;;  %v556_v37 = vcvt.f32.s32 %v7125_v16 }
 0x2f4   :  { %v732_v17 = vsel %vm731_vm6, %v727_v0, inf  ;;  %v747_v18 = vsel %vm746_vm7, %v742_v13, inf  ;;  %v616_v61 = vcvt.f32.s32 %v7145_v14  ;;  %v646_v0 = vcvt.f32.s32 %v7155_v6 }
 0x2f5   :  { %733 = vmin.xlane.f32.xlu1 %v732_v17  ;;  %748 = vmin.xlane.f32.xlu0 %v747_v18  ;;  %v542_v63 = vshll.u32 %v541_v35, 16  ;;  %v557_v29 = vshll.u32 %v556_v37, 16  ;;  %v632_v18 = vshll.u32 %v631_v43, 16  ;;  %v692_v43 = vshll.u32 %v691_v19, 16 }
 0x2f6   :  { %v7194_v33 = vpop.xlane.xlu1 %759  ;;  %v617_v59 = vshll.u32 %v616_v61, 16 }
 0x2f7   :  { %vm761_vm8 = vcmp.eq.f32.partialorder %v7110_v2, %v7194_v33  ;;  %v572_v2 = vshll.u32 %v571_v5, 16 }
 0x2f8   :  { %v762_v12 = vsel %vm761_vm8, %v757_v9, inf  ;;  %v661_v9 = vcvt.f32.s32 %v7157_v11 }
 0x2f9   :  { %763 = vmin.xlane.f32.xlu1 %v762_v12 }
 0x366   :  { %v539_v8 = vpop.xlane.xlu0 %538 }
 0x367   :  { %v540_v62 = vcvt.f32.s32 %v539_v8  ;;  %v647_v8 = vshll.u32 %v646_v0, 16 }
 0x369   :  { %v543_v24 = vadd.s32 %v542_v63, %v540_v62  ;;  %v676_v63 = vcvt.f32.s32 %v7165_v27 }
 0x36a   :  { %v554_v41 = vpop.xlane.xlu1 %553  ;;  %v569_v39 = vpop.xlane.xlu0 %568 }
 0x36b   :  { %vm769_vm9 = vcmp.lt.s32.totalorder %v543_v24, 63  ;;  %v555_v49 = vcvt.f32.s32 %v554_v41  ;;  %v570_v51 = vcvt.f32.s32 %v569_v39  ;;  %v677_v61 = vshll.u32 %v676_v63, 16 }
 0x36c   :  { %v7207_v16 = vsel %vm769_vm9, %v543_v24, 63 }
 0x36d   :  { %v558_v58 = vadd.s32 %v557_v29, %v555_v49  ;;  %v573_v45 = vadd.s32 %v572_v2, %v570_v51  ;;  %vm801_vm10 = vcmp.eq.s32.totalorder %v6971_v20, %v7207_v16  ;;  %v662_v2 = vshll.u32 %v661_v9, 16 }
 0x36e   :  { %v584_v60 = vpop.xlane.xlu1 %583  ;;  %v599_v15 = vpop.xlane.xlu0 %598  ;;  %v5693_v4 = vsel %vm801_vm10, 1.0, %v10259_v1 }
 0x36f   :  { %vm771_vm11 = vcmp.lt.s32.totalorder %v558_v58, 63  ;;  %vm773_vm12 = vcmp.lt.s32.totalorder %v573_v45, 63  ;;  %v585_v54 = vcvt.f32.s32 %v584_v60  ;;  %v600_v14 = vcvt.f32.s32 %v599_v15  ;;  %6339 = vmatprep.mubr.msk.f32.mxu1 %vm448_vm2, %v5693_v4 }
 0x370   :  { %v7215_v13 = vsel %vm771_vm11, %v558_v58, 63  ;;  %v7217_v31 = vsel %vm773_vm12, %v573_v45, 63  ;;  %v706_v58 = vcvt.f32.s32 %v7175_v3  ;;  %v721_v60 = vcvt.f32.s32 %v7177_v53 }
 0x371   :  { %vm802_vm13 = vcmp.eq.s32.totalorder %v6971_v20, %v7215_v13  ;;  %v588_v7 = vadd.s32 %v587_v47, %v585_v54  ;;  %v603_v17 = vadd.s32 %v602_v57, %v600_v14  ;;  %vm803_vm14 = vcmp.eq.s32.totalorder %v6971_v20, %v7217_v31 }
 0x372   :  { %v5694_v12 = vsel %vm802_vm13, 1.0, %v10259_v1  ;;  %v614_v52 = vpop.xlane.xlu1 %613  ;;  %v629_v35 = vpop.xlane.xlu0 %628  ;;  %v5695_v6 = vsel %vm803_vm14, 1.0, %v10259_v1  ;;  %v707_v0 = vshll.u32 %v706_v58, 16 }
 0x373   :  { %vm775_vm15 = vcmp.lt.s32.totalorder %v588_v7, 63  ;;  %vm777_vm3 = vcmp.lt.s32.totalorder %v603_v17, 63  ;;  %v615_v37 = vcvt.f32.s32 %v614_v52  ;;  %v630_v5 = vcvt.f32.s32 %v629_v35  ;;  %6340 = vmatmul.mubr.msk.f32.vlgmr.msra.gmra.mrb[16].mxu1 %vm448_vm2, %v5694_v12 }
 0x374   :  { %6342 = vmatprep.mubr.msk.f32.mxu1 %vm448_vm2, %v5695_v6  ;;  %v7229_v62 = vsel %vm775_vm15, %v588_v7, 63  ;;  %v7231_v11 = vsel %vm777_vm3, %v603_v17, 63  ;;  %v736_v7 = vcvt.f32.s32 %v7185_v55  ;;  %v722_v12 = vshll.u32 %v721_v60, 16 }
 0x375   :  { %v618_v24 = vadd.s32 %v617_v59, %v615_v37  ;;  %v633_v29 = vadd.s32 %v632_v18, %v630_v5  ;;  %vm804_vm4 = vcmp.eq.s32.totalorder %v6971_v20, %v7229_v62  ;;  %vm805_vm5 = vcmp.eq.s32.totalorder %v6971_v20, %v7231_v11 }
 0x376   :  { %v644_v23 = vpop.xlane.xlu1 %643  ;;  %v659_v41 = vpop.xlane.xlu0 %658  ;;  %v5696_v27 = vsel %vm804_vm4, 1.0, %v10259_v1  ;;  %v5697_v39 = vsel %vm805_vm5, 1.0, %v10259_v1  ;;  %v751_v52 = vcvt.f32.s32 %v7187_v56  ;;  %v737_v63 = vshll.u32 %v736_v7, 16 }
 0x377   :  { %vm779_vm6 = vcmp.lt.s32.totalorder %v618_v24, 63  ;;  %vm781_vm7 = vcmp.lt.s32.totalorder %v633_v29, 63  ;;  %v645_v49 = vcvt.f32.s32 %v644_v23  ;;  %v660_v51 = vcvt.f32.s32 %v659_v41  ;;  %6343 = vmatmul.mubr.msk.f32.gmra.mrb[18].mxu1 %vm448_vm2, %v5696_v27 }
 0x378   :  { %6345 = vmatprep.mubr.msk.f32.mxu1 %vm448_vm2, %v5697_v39  ;;  %v7243_v45 = vsel %vm779_vm6, %v618_v24, 63  ;;  %v7245_v10 = vsel %vm781_vm7, %v633_v29, 63  ;;  %v752_v19 = vshll.u32 %v751_v52, 16  ;;  %v766_v23 = vcvt.f32.s32 %v7194_v33 }
 0x379   :  { %10500 = vst [vmem:[#allocation18_spill] sm:$0xff] %v7243_v45  ;;  %10501 = vst [vmem:[#allocation19_spill] sm:$0xff] %v7245_v10  ;;  %v648_v47 = vadd.s32 %v647_v8, %v645_v49  ;;  %v663_v57 = vadd.s32 %v662_v2, %v660_v51  ;;  %vm806_vm8 = vcmp.eq.s32.totalorder %v6971_v20, %v7243_v45 }
 0x37a   :  { %vm807_vm9 = vcmp.eq.s32.totalorder %v6971_v20, %v7245_v10  ;;  %v674_v15 = vpop.xlane.xlu1 %673  ;;  %v689_v4 = vpop.xlane.xlu0 %688  ;;  %v5698_v3 = vsel %vm806_vm8, 1.0, %v10259_v1 }
 0x37b   :  { %v5699_v54 = vsel %vm807_vm9, 1.0, %v10259_v1  ;;  %vm783_vm10 = vcmp.lt.s32.totalorder %v648_v47, 63  ;;  %vm785_vm11 = vcmp.lt.s32.totalorder %v663_v57, 63  ;;  %v675_v14 = vcvt.f32.s32 %v674_v15  ;;  %6346 = vmatmul.mubr.msk.f32.gmra.mrb[20].mxu1 %vm448_vm2, %v5698_v3 }
 0x37c   :  { %v690_v59 = vcvt.f32.s32 %v689_v4  ;;  %6348 = vmatprep.mubr.msk.f32.mxu1 %vm448_vm2, %v5699_v54  ;;  %v7257_v17 = vsel %vm783_vm10, %v648_v47, 63  ;;  %v7259_v53 = vsel %vm785_vm11, %v663_v57, 63  ;;  %v767_v4 = vshll.u32 %v766_v23, 16 }
 0x37d   :  { %10502 = vst [vmem:[#allocation20_spill] sm:$0xff] %v7257_v17  ;;  %10503 = vst [vmem:[#allocation21_spill] sm:$0xff] %v7259_v53  ;;  %v678_v18 = vadd.s32 %v677_v61, %v675_v14  ;;  %vm808_vm12 = vcmp.eq.s32.totalorder %v6971_v20, %v7257_v17  ;;  %vm809_vm13 = vcmp.eq.s32.totalorder %v6971_v20, %v7259_v53 }
 0x37e   :  { %v693_v9 = vadd.s32 %v692_v43, %v690_v59  ;;  %v704_v35 = vpop.xlane.xlu1 %703  ;;  %v719_v6 = vpop.xlane.xlu0 %718  ;;  %v5700_v55 = vsel %vm808_vm12, 1.0, %v10259_v1  ;;  %v5701_v37 = vsel %vm809_vm13, 1.0, %v10259_v1 }
 0x37f   :  { %vm787_vm14 = vcmp.lt.s32.totalorder %v678_v18, 63  ;;  %v705_v5 = vcvt.f32.s32 %v704_v35  ;;  %v720_v8 = vcvt.f32.s32 %v719_v6  ;;  %6349 = vmatmul.mubr.msk.f32.gmra.mrb[22].mxu1 %vm448_vm2, %v5700_v55 }
 0x380   :  { %vm789_vm15 = vcmp.lt.s32.totalorder %v693_v9, 63  ;;  %6351 = vmatprep.mubr.msk.f32.mxu1 %vm448_vm2, %v5701_v37  ;;  %v7270_v24 = vsel %vm787_vm14, %v678_v18, 63 }
 0x381   :  { %10504 = vst [vmem:[#allocation22_spill] sm:$0xff] %v7270_v24  ;;  %v7272_v29 = vsel %vm789_vm15, %v693_v9, 63  ;;  %v708_v56 = vadd.s32 %v707_v0, %v705_v5  ;;  %v723_v2 = vadd.s32 %v722_v12, %v720_v8  ;;  %vm810_vm3 = vcmp.eq.s32.totalorder %v6971_v20, %v7270_v24  ;;  %v5743_v12 = vld [vmem:[%s10248_s1 + $0x8] sm:$0xff] }
 0x382   :  { %10505 = vst [vmem:[#allocation23_spill] sm:$0xff] %v7272_v29  ;;  %vm811_vm4 = vcmp.eq.s32.totalorder %v6971_v20, %v7272_v29  ;;  %v734_v41 = vpop.xlane.xlu1 %733  ;;  %v749_v27 = vpop.xlane.xlu0 %748  ;;  %v5702_v39 = vsel %vm810_vm3, 1.0, %v10259_v1  ;;  %6389 = vmatprep.subr.msk.mxu1 %vm56_vm0, %v5743_v12 }
 0x383   :  { %v5703_v49 = vsel %vm811_vm4, 1.0, %v10259_v1  ;;  %vm791_vm5 = vcmp.lt.s32.totalorder %v708_v56, 63  ;;  %vm793_vm6 = vcmp.lt.s32.totalorder %v723_v2, 63  ;;  %v735_v51 = vcvt.f32.s32 %v734_v41  ;;  %6352 = vmatmul.mubr.msk.f32.gmra.mrb[24].mxu1 %vm448_vm2, %v5702_v39 }
 0x384   :  { %v750_v61 = vcvt.f32.s32 %v749_v27  ;;  %6354 = vmatprep.mubr.msk.f32.mxu1 %vm448_vm2, %v5703_v49  ;;  %v7283_v58 = vsel %vm791_vm5, %v708_v56, 63  ;;  %v7285_v47 = vsel %vm793_vm6, %v723_v2, 63  ;;  %6390 = vmatpush3.xpose.msk.msra.mxu1 %vm56_vm0, %v5743_v12 }
 0x385   :  { %10506 = vst [vmem:[#allocation24_spill] sm:$0xff] %v7283_v58  ;;  %10507 = vst [vmem:[#allocation25_spill] sm:$0xff] %v7285_v47  ;;  %v738_v57 = vadd.s32 %v737_v63, %v735_v51  ;;  %vm812_vm7 = vcmp.eq.s32.totalorder %v6971_v20, %v7283_v58  ;;  %vm813_vm8 = vcmp.eq.s32.totalorder %v6971_v20, %v7285_v47  ;;  %v5763_v51 = vld [vmem:[%s10250_s3 + $0x8] sm:$0xff] }
 0x386   :  { %v753_v33 = vadd.s32 %v752_v19, %v750_v61  ;;  %v764_v43 = vpop.xlane.xlu1 %763  ;;  %v5704_v60 = vsel %vm812_vm7, 1.0, %v10259_v1  ;;  %v5705_v15 = vsel %vm813_vm8, 1.0, %v10259_v1  ;;  %6415 = vmatprep.subr.mxu0 %v5763_v51  ;;  %v7388_v61 = vld [vmem:[%s10254_s6] ss:$0 sm:$0xff] }
 0x387   :  { %vm795_vm9 = vcmp.lt.s32.totalorder %v738_v57, 63  ;;  %v765_v3 = vcvt.f32.s32 %v764_v43  ;;  %6355 = vmatmul.mubr.msk.f32.gmra.mrb[26].mxu1 %vm448_vm2, %v5704_v60 }
 0x388   :  { %vm797_vm10 = vcmp.lt.s32.totalorder %v753_v33, 63  ;;  %6357 = vmatprep.mubr.msk.f32.mxu1 %vm448_vm2, %v5705_v15  ;;  %v7295_v54 = vsel %vm795_vm9, %v738_v57, 63  ;;  %v6705_v15 = vld [vmem:[%s10249_s0] sm:$0xff] }
 0x389   :  { %10508 = vst [vmem:[#allocation26_spill] sm:$0xff] %v7295_v54  ;;  %v7297_v14 = vsel %vm797_vm10, %v753_v33, 63  ;;  %v768_v59 = vadd.s32 %v767_v4, %v765_v3  ;;  %vm814_vm11 = vcmp.eq.s32.totalorder %v6971_v20, %v7295_v54 }
 0x38a   :  { %10509 = vst [vmem:[#allocation27_spill] sm:$0xff] %v7297_v14  ;;  %vm815_vm12 = vcmp.eq.s32.totalorder %v6971_v20, %v7297_v14  ;;  %v5706_v0 = vsel %vm814_vm11, 1.0, %v10259_v1 }
 0x38b   :  { %v5707_v7 = vsel %vm815_vm12, 1.0, %v10259_v1  ;;  %vm799_vm13 = vcmp.lt.s32.totalorder %v768_v59, 63  ;;  %6358 = vmatmul.mubr.msk.f32.gmra.mrb[28].mxu1 %vm448_vm2, %v5706_v0 }
 0x38c   :  { %6360 = vmatprep.mubr.msk.f32.mxu1 %vm448_vm2, %v5707_v7  ;;  %v7307_v18 = vsel %vm799_vm13, %v768_v59, 63  ;;  %v6706_v59 = vld [vmem:[%s10249_s0 + $0x8] sm:$0xff] }
 0x38d   :  { %10510 = vst [vmem:[#allocation28_spill] sm:$0xff] %v7307_v18  ;;  %vm816_vm14 = vcmp.eq.s32.totalorder %v6971_v20, %v7307_v18 }
 0x38e   :  { %v5708_v9 = vsel %vm816_vm14, 1.0, %v10259_v1 }
 0x38f   :  { %6361 = vmatmul.mubr.msk.f32.gmra.mrb[30].mxu1 %vm448_vm2, %v5708_v9 }
 0x446   :  { %v7318_v52 = vpop.f32.mrb[16].mxu1 }
 0x447   :  { %10511 = vst [vmem:[#allocation29_spill] sm:$0xff] %v7318_v52  ;;  %v7320_v35 = vpop.f32.mrb[17].mxu1 }
 0x448   :  { %10512 = vst [vmem:[#allocation30_spill] sm:$0xff] %v7320_v35  ;;  %6365 = vmatprep.mubr.msk.f32.mxu0 %vm254_vm1, %v7320_v35 }
 0x449   :  { %6366 = vmatmul.mubr.msk.f32.vlgmr.msra.gmra.mrb[16].mxu0 %vm254_vm1, %v7318_v52 }
 0x44a   :  { %v7326_v6 = vpop.f32.mrb[18].mxu1  ;;  %6416 = vmatpush3.msra.mxu0 %v5763_v51  ;;  %v6707_v51 = vld [vmem:[%s10249_s0 + $0x10] sm:$0xff] }
 0x44b   :  { %10513 = vst [vmem:[#allocation31_spill] sm:$0xff] %v7326_v6  ;;  %v7328_v55 = vpop.f32.mrb[19].mxu1 }
 0x44c   :  { %10514 = vst [vmem:[#allocation32_spill] sm:$0xff] %v7328_v55  ;;  %6368 = vmatprep.mubr.msk.f32.mxu0 %vm254_vm1, %v7328_v55 }
 0x44d   :  { %6369 = vmatmul.mubr.msk.f32.gmra.mrb[18].mxu0 %vm254_vm1, %v7326_v6 }
 0x44e   :  { %v7334_v37 = vpop.f32.mrb[20].mxu1 }
 0x44f   :  { %10515 = vst [vmem:[#allocation33_spill] sm:$0xff] %v7334_v37  ;;  %v7336_v5 = vpop.f32.mrb[21].mxu1 }
 0x450   :  { %10516 = vst [vmem:[#allocation34_spill] sm:$0xff] %v7336_v5  ;;  %6371 = vmatprep.mubr.msk.f32.mxu0 %vm254_vm1, %v7336_v5 }
 0x451   :  { %6372 = vmatmul.mubr.msk.f32.gmra.mrb[20].mxu0 %vm254_vm1, %v7334_v37 }
 0x452   :  { %v7342_v8 = vpop.f32.mrb[22].mxu1 }
 0x453   :  { %10517 = vst [vmem:[#allocation35_spill] sm:$0xff] %v7342_v8  ;;  %v7344_v63 = vpop.f32.mrb[23].mxu1 }
 0x454   :  { %10518 = vst [vmem:[#allocation36_spill] sm:$0xff] %v7344_v63  ;;  %6374 = vmatprep.mubr.msk.f32.mxu0 %vm254_vm1, %v7344_v63 }
 0x455   :  { %6375 = vmatmul.mubr.msk.f32.gmra.mrb[22].mxu0 %vm254_vm1, %v7342_v8 }
 0x456   :  { %v7350_v56 = vpop.f32.mrb[24].mxu1 }
 0x457   :  { %10519 = vst [vmem:[#allocation37_spill] sm:$0xff] %v7350_v56  ;;  %v7352_v2 = vpop.f32.mrb[25].mxu1 }
 0x458   :  { %10520 = vst [vmem:[#allocation38_spill] sm:$0xff] %v7352_v2  ;;  %6377 = vmatprep.mubr.msk.f32.mxu0 %vm254_vm1, %v7352_v2 }
 0x459   :  { %6378 = vmatmul.mubr.msk.f32.gmra.mrb[24].mxu0 %vm254_vm1, %v7350_v56 }
 0x45a   :  { %v7358_v19 = vpop.f32.mrb[26].mxu1 }
 0x45b   :  { %10521 = vst [vmem:[#allocation39_spill] sm:$0xff] %v7358_v19  ;;  %v7360_v23 = vpop.f32.mrb[27].mxu1 }
 0x45c   :  { %10522 = vst [vmem:[#allocation40_spill] sm:$0xff] %v7360_v23  ;;  %6380 = vmatprep.mubr.msk.f32.mxu0 %vm254_vm1, %v7360_v23 }
 0x45d   :  { %6381 = vmatmul.mubr.msk.f32.gmra.mrb[26].mxu0 %vm254_vm1, %v7358_v19 }
 0x45e   :  { %v7366_v41 = vpop.f32.mrb[28].mxu1 }
 0x45f   :  { %10523 = vst [vmem:[#allocation41_spill] sm:$0xff] %v7366_v41  ;;  %v7368_v27 = vpop.f32.mrb[29].mxu1 }
 0x460   :  { %10524 = vst [vmem:[#allocation42_spill] sm:$0xff] %v7368_v27  ;;  %6383 = vmatprep.mubr.msk.f32.mxu0 %vm254_vm1, %v7368_v27 }
 0x461   :  { %6384 = vmatmul.mubr.msk.f32.gmra.mrb[28].mxu0 %vm254_vm1, %v7366_v41 }
 0x462   :  { %v7374_v39 = vpop.f32.mrb[30].mxu1 }
 0x463   :  { %10525 = vst [vmem:[#allocation43_spill] sm:$0xff] %v7374_v39  ;;  %v7376_v49 = vpop.f32.mrb[31].mxu1 }
 0x464   :  { %10526 = vst [vmem:[#allocation44_spill] sm:$0xff] %v7376_v49  ;;  %6386 = vmatprep.mubr.msk.f32.mxu0 %vm254_vm1, %v7376_v49 }
 0x465   :  { %6387 = vmatmul.mubr.msk.f32.gmra.mrb[30].mxu0 %vm254_vm1, %v7374_v39 }
 0x51c   :  { %v6367_v57 = vpop.f32.mrb[16].mxu0 }
 0x51d   :  { %v7391_v33 = vadd.f32 %v6367_v57, %v7388_v61  ;;  %v1248_v43 = vpop.f32.mrb[17].mxu0 }
 0x51e   :  { %v7394_v60 = vadd.f32 %v7388_v61, %v1248_v43 }
 0x51f   :  { %10527 = vst [vmem:[#allocation45_spill] sm:$0xff] %v7391_v33  ;;  %v7406_v0 = vsub.f32 %v6706_v59, %v7391_v33 }
 0x520   :  { %10528 = vst [vmem:[#allocation46_spill] sm:$0xff] %v7394_v60  ;;  %v7400_v4 = vsub.f32 %v6705_v15, %v7394_v60  ;;  %v6370_v3 = vpop.f32.mrb[18].mxu0  ;;  %v6708_v15 = vld [vmem:[%s10249_s0 + $0x18] sm:$0xff] }
 0x521   :  { %v7409_v7 = vadd.f32 %v6370_v3, %v7388_v61  ;;  %v1258_v9 = vpop.f32.mrb[19].mxu0 }
 0x522   :  { %v7412_v12 = vadd.f32 %v7388_v61, %v1258_v9  ;;  %6391 = vmatprep.mubr.msk.f32.mxu1 %vm56_vm0, %v7400_v4 }
 0x523   :  { %10529 = vst [vmem:[#allocation47_spill] sm:$0xff] %v7409_v7  ;;  %6392 = vmatmul.mubr.msk.f32.vlgmr.msra.gmra.mrb[32].mxu1 %vm56_vm0, %v7406_v0  ;;  %v7428_v3 = vsub.f32 %v6708_v15, %v7409_v7 }
 0x524   :  { %10530 = vst [vmem:[#allocation48_spill] sm:$0xff] %v7412_v12  ;;  %v7422_v57 = vsub.f32 %v6707_v51, %v7412_v12  ;;  %v6373_v43 = vpop.f32.mrb[20].mxu0  ;;  %v6709_v51 = vld [vmem:[%s10249_s0 + $0x20] sm:$0xff] }
 0x525   :  { %v7431_v59 = vadd.f32 %v6373_v43, %v7388_v61  ;;  %v1268_v9 = vpop.f32.mrb[21].mxu0  ;;  %v6710_v43 = vld [vmem:[%s10249_s0 + $0x28] sm:$0xff] }
 0x526   :  { %v7434_v1 = vadd.f32 %v7388_v61, %v1268_v9  ;;  %6394 = vmatprep.mubr.msk.f32.mxu1 %vm56_vm0, %v7422_v57 }
 0x527   :  { %10531 = vst [vmem:[#allocation49_spill] sm:$0xff] %v7431_v59  ;;  %6395 = vmatmul.mubr.msk.f32.gmra.mrb[34].mxu1 %vm56_vm0, %v7428_v3  ;;  %v7450_v9 = vsub.f32 %v6710_v43, %v7431_v59 }
 0x528   :  { %10532 = vst [vmem:[#allocation50_spill] sm:$0xff] %v7434_v1  ;;  %v7444_v15 = vsub.f32 %v6709_v51, %v7434_v1  ;;  %v6376_v50 = vpop.f32.mrb[22].mxu0  ;;  %v6711_v51 = vld [vmem:[%s10249_s0 + $0x30] sm:$0xff] }
 0x529   :  { %v7453_v49 = vadd.f32 %v6376_v50, %v7388_v61  ;;  %v1278_v48 = vpop.f32.mrb[23].mxu0  ;;  %v6712_v50 = vld [vmem:[%s10249_s0 + $0x38] sm:$0xff] }
 0x52a   :  { %v7456_v39 = vadd.f32 %v7388_v61, %v1278_v48  ;;  %6397 = vmatprep.mubr.msk.f32.mxu1 %vm56_vm0, %v7444_v15 }
 0x52b   :  { %10533 = vst [vmem:[#allocation51_spill] sm:$0xff] %v7453_v49  ;;  %6398 = vmatmul.mubr.msk.f32.gmra.mrb[36].mxu1 %vm56_vm0, %v7450_v9  ;;  %v7472_v48 = vsub.f32 %v6712_v50, %v7453_v49 }
 0x52c   :  { %10534 = vst [vmem:[#allocation52_spill] sm:$0xff] %v7456_v39  ;;  %v7466_v43 = vsub.f32 %v6711_v51, %v7456_v39  ;;  %v6379_v46 = vpop.f32.mrb[24].mxu0  ;;  %v6713_v51 = vld [vmem:[%s10249_s0 + $0x40] sm:$0xff] }
 0x52d   :  { %v7475_v27 = vadd.f32 %v6379_v46, %v7388_v61  ;;  %v1288_v44 = vpop.f32.mrb[25].mxu0  ;;  %v6714_v46 = vld [vmem:[%s10249_s0 + $0x48] sm:$0xff] }
 0x52e   :  { %v7478_v41 = vadd.f32 %v7388_v61, %v1288_v44  ;;  %6400 = vmatprep.mubr.msk.f32.mxu1 %vm56_vm0, %v7466_v43 }
 0x52f   :  { %10535 = vst [vmem:[#allocation53_spill] sm:$0xff] %v7475_v27  ;;  %6401 = vmatmul.mubr.msk.f32.gmra.mrb[38].mxu1 %vm56_vm0, %v7472_v48  ;;  %v7494_v44 = vsub.f32 %v6714_v46, %v7475_v27 }
 0x530   :  { %10536 = vst [vmem:[#allocation54_spill] sm:$0xff] %v7478_v41  ;;  %v7488_v50 = vsub.f32 %v6713_v51, %v7478_v41  ;;  %v6382_v42 = vpop.f32.mrb[26].mxu0  ;;  %v6715_v51 = vld [vmem:[%s10249_s0 + $0x50] sm:$0xff] }
 0x531   :  { %v7497_v23 = vadd.f32 %v6382_v42, %v7388_v61  ;;  %v1298_v40 = vpop.f32.mrb[27].mxu0  ;;  %v6716_v42 = vld [vmem:[%s10249_s0 + $0x58] sm:$0xff] }
 0x532   :  { %v7500_v19 = vadd.f32 %v7388_v61, %v1298_v40  ;;  %6403 = vmatprep.mubr.msk.f32.mxu1 %vm56_vm0, %v7488_v50 }
 0x533   :  { %10537 = vst [vmem:[#allocation55_spill] sm:$0xff] %v7497_v23  ;;  %6404 = vmatmul.mubr.msk.f32.gmra.mrb[40].mxu1 %vm56_vm0, %v7494_v44  ;;  %v7516_v40 = vsub.f32 %v6716_v42, %v7497_v23 }
 0x534   :  { %10538 = vst [vmem:[#allocation56_spill] sm:$0xff] %v7500_v19  ;;  %v7510_v46 = vsub.f32 %v6715_v51, %v7500_v19  ;;  %v6385_v38 = vpop.f32.mrb[28].mxu0  ;;  %v6717_v51 = vld [vmem:[%s10249_s0 + $0x60] sm:$0xff] }
 0x535   :  { %v7519_v2 = vadd.f32 %v6385_v38, %v7388_v61  ;;  %v1308_v36 = vpop.f32.mrb[29].mxu0  ;;  %v6718_v38 = vld [vmem:[%s10249_s0 + $0x68] sm:$0xff] }
 0x536   :  { %v7522_v56 = vadd.f32 %v7388_v61, %v1308_v36  ;;  %6406 = vmatprep.mubr.msk.f32.mxu1 %vm56_vm0, %v7510_v46 }
 0x537   :  { %10539 = vst [vmem:[#allocation57_spill] sm:$0xff] %v7519_v2  ;;  %6407 = vmatmul.mubr.msk.f32.gmra.mrb[42].mxu1 %vm56_vm0, %v7516_v40  ;;  %v7538_v36 = vsub.f32 %v6718_v38, %v7519_v2 }
 0x538   :  { %10540 = vst [vmem:[#allocation58_spill] sm:$0xff] %v7522_v56  ;;  %v7532_v42 = vsub.f32 %v6717_v51, %v7522_v56  ;;  %v6388_v34 = vpop.f32.mrb[30].mxu0  ;;  %v6719_v51 = vld [vmem:[%s10249_s0 + $0x70] sm:$0xff] }
 0x539   :  { %v7541_v63 = vadd.f32 %v6388_v34, %v7388_v61  ;;  %v1318_v32 = vpop.f32.mrb[31].mxu0  ;;  %v6720_v34 = vld [vmem:[%s10249_s0 + $0x78] sm:$0xff] }
 0x53a   :  { %v7544_v8 = vadd.f32 %v7388_v61, %v1318_v32  ;;  %6409 = vmatprep.mubr.msk.f32.mxu1 %vm56_vm0, %v7532_v42  ;;  %v5745_v61 = vld [vmem:[%s10251_s2 + $0x1] ss:$0 sm:$0xff] }
 0x53b   :  { %10541 = vst [vmem:[#allocation59_spill] sm:$0xff] %v7541_v63  ;;  %6410 = vmatmul.mubr.msk.f32.gmra.mrb[44].mxu1 %vm56_vm0, %v7538_v36  ;;  %v7560_v32 = vsub.f32 %v6720_v34, %v7541_v63 }
 0x53c   :  { %10542 = vst [vmem:[#allocation60_spill] sm:$0xff] %v7544_v8  ;;  %v7554_v38 = vsub.f32 %v6719_v51, %v7544_v8 }
 0x53e   :  { %6412 = vmatprep.mubr.msk.f32.mxu1 %vm56_vm0, %v7554_v38 }
 0x53f   :  { %6413 = vmatmul.mubr.msk.f32.gmra.mrb[46].mxu1 %vm56_vm0, %v7560_v32 }
 0x5f6   :  { %v6393_v30 = vpop.f32.mrb[32].mxu1 }
 0x5f7   :  { %v1486_v51 = vpop.f32.mrb[33].mxu1  ;;  %v7571_v28 = vadd.f32 %v6393_v30, %v5745_v61 }
 0x5f8   :  { %v7569_v5 = vadd.f32 %v5745_v61, %v1486_v51 }
 0x5f9   :  { %10544 = vst [vmem:[#allocation62_spill] sm:$0xff] %v7571_v28 }
 0x5fa   :  { %10543 = vst [vmem:[#allocation61_spill] sm:$0xff] %v7569_v5  ;;  %v6396_v37 = vpop.f32.mrb[34].mxu1  ;;  %6417 = vmatprep.mubr.msk.f32.mxu0 %vm254_vm1, %v7569_v5 }
 0x5fb   :  { %v1496_v34 = vpop.f32.mrb[35].mxu1  ;;  %6418 = vmatmul.mubr.msk.f32.vlgmr.msra.gmra.mrb[32].mxu0 %vm254_vm1, %v7571_v28  ;;  %v7579_v55 = vadd.f32 %v6396_v37, %v5745_v61 }
 0x5fc   :  { %v7577_v25 = vadd.f32 %v5745_v61, %v1496_v34 }
 0x5fd   :  { %10546 = vst [vmem:[#allocation64_spill] sm:$0xff] %v7579_v55 }
 0x5fe   :  { %10545 = vst [vmem:[#allocation63_spill] sm:$0xff] %v7577_v25  ;;  %v6399_v26 = vpop.f32.mrb[36].mxu1  ;;  %6420 = vmatprep.mubr.msk.f32.mxu0 %vm254_vm1, %v7577_v25 }
 0x5ff   :  { %v1506_v51 = vpop.f32.mrb[37].mxu1  ;;  %6421 = vmatmul.mubr.msk.f32.gmra.mrb[34].mxu0 %vm254_vm1, %v7579_v55  ;;  %v7587_v6 = vadd.f32 %v6399_v26, %v5745_v61 }
 0x600   :  { %v7585_v30 = vadd.f32 %v5745_v61, %v1506_v51 }
 0x601   :  { %10548 = vst [vmem:[#allocation66_spill] sm:$0xff] %v7587_v6 }
 0x602   :  { %10547 = vst [vmem:[#allocation65_spill] sm:$0xff] %v7585_v30  ;;  %v6402_v5 = vpop.f32.mrb[38].mxu1  ;;  %6423 = vmatprep.mubr.msk.f32.mxu0 %vm254_vm1, %v7585_v30 }
 0x603   :  { %v1516_v34 = vpop.f32.mrb[39].mxu1  ;;  %6424 = vmatmul.mubr.msk.f32.gmra.mrb[36].mxu0 %vm254_vm1, %v7587_v6  ;;  %v7595_v28 = vadd.f32 %v6402_v5, %v5745_v61 }
 0x604   :  { %v7593_v37 = vadd.f32 %v5745_v61, %v1516_v34 }
 0x605   :  { %10550 = vst [vmem:[#allocation68_spill] sm:$0xff] %v7595_v28 }
 0x606   :  { %10549 = vst [vmem:[#allocation67_spill] sm:$0xff] %v7593_v37  ;;  %v6405_v25 = vpop.f32.mrb[40].mxu1  ;;  %6426 = vmatprep.mubr.msk.f32.mxu0 %vm254_vm1, %v7593_v37 }
 0x607   :  { %v1526_v51 = vpop.f32.mrb[41].mxu1  ;;  %6427 = vmatmul.mubr.msk.f32.gmra.mrb[38].mxu0 %vm254_vm1, %v7595_v28  ;;  %v7603_v55 = vadd.f32 %v6405_v25, %v5745_v61 }
 0x608   :  { %v7601_v26 = vadd.f32 %v5745_v61, %v1526_v51 }
 0x609   :  { %10552 = vst [vmem:[#allocation70_spill] sm:$0xff] %v7603_v55 }
 0x60a   :  { %10551 = vst [vmem:[#allocation69_spill] sm:$0xff] %v7601_v26  ;;  %v6408_v30 = vpop.f32.mrb[42].mxu1  ;;  %6429 = vmatprep.mubr.msk.f32.mxu0 %vm254_vm1, %v7601_v26 }
 0x60b   :  { %v1536_v34 = vpop.f32.mrb[43].mxu1  ;;  %6430 = vmatmul.mubr.msk.f32.gmra.mrb[40].mxu0 %vm254_vm1, %v7603_v55  ;;  %v7611_v6 = vadd.f32 %v6408_v30, %v5745_v61 }
 0x60c   :  { %v7609_v5 = vadd.f32 %v5745_v61, %v1536_v34 }
 0x60d   :  { %10554 = vst [vmem:[#allocation72_spill] sm:$0xff] %v7611_v6 }
 0x60e   :  { %10553 = vst [vmem:[#allocation71_spill] sm:$0xff] %v7609_v5  ;;  %v6411_v37 = vpop.f32.mrb[44].mxu1  ;;  %6432 = vmatprep.mubr.msk.f32.mxu0 %vm254_vm1, %v7609_v5 }
 0x60f   :  { %v1546_v51 = vpop.f32.mrb[45].mxu1  ;;  %6433 = vmatmul.mubr.msk.f32.gmra.mrb[42].mxu0 %vm254_vm1, %v7611_v6  ;;  %v7619_v28 = vadd.f32 %v6411_v37, %v5745_v61 }
 0x610   :  { %v7617_v25 = vadd.f32 %v5745_v61, %v1546_v51 }
 0x611   :  { %10556 = vst [vmem:[#allocation74_spill] sm:$0xff] %v7619_v28 }
 0x612   :  { %10555 = vst [vmem:[#allocation73_spill] sm:$0xff] %v7617_v25  ;;  %v6414_v26 = vpop.f32.mrb[46].mxu1  ;;  %6435 = vmatprep.mubr.msk.f32.mxu0 %vm254_vm1, %v7617_v25 }
 0x613   :  { %v1556_v34 = vpop.f32.mrb[47].mxu1  ;;  %6436 = vmatmul.mubr.msk.f32.gmra.mrb[44].mxu0 %vm254_vm1, %v7619_v28  ;;  %v7627_v55 = vadd.f32 %v6414_v26, %v5745_v61 }
 0x614   :  { %v7625_v30 = vadd.f32 %v5745_v61, %v1556_v34 }
 0x615   :  { %10558 = vst [vmem:[#allocation76_spill] sm:$0xff] %v7627_v55 }
 0x616   :  { %10557 = vst [vmem:[#allocation75_spill] sm:$0xff] %v7625_v30  ;;  %6438 = vmatprep.mubr.msk.f32.mxu0 %vm254_vm1, %v7625_v30 }
 0x617   :  { %6439 = vmatmul.mubr.msk.f32.gmra.mrb[46].mxu0 %vm254_vm1, %v7627_v55 }
 0x6ce   :  { %v6419_v37 = vpop.f32.mrb[32].mxu0 }
 0x6cf   :  { %v1681_v51 = vpop.f32.mrb[33].mxu0  ;;  %v1763_v5 = vsel %vm448_vm2, %v6419_v37, -inf }
 0x6d0   :  { %1764 = vmax.xlane.f32.xlu1 %v1763_v5  ;;  %v1760_v25 = vsel %vm448_vm2, %v1681_v51, -inf }
 0x6d1   :  { %1761 = vmax.xlane.f32.xlu0 %v1760_v25 }
 0x6d2   :  { %v6422_v6 = vpop.f32.mrb[34].mxu0 }
 0x6d3   :  { %v1691_v28 = vpop.f32.mrb[35].mxu0  ;;  %v1769_v34 = vsel %vm448_vm2, %v6422_v6, -inf }
 0x6d4   :  { %1770 = vmax.xlane.f32.xlu1 %v1769_v34  ;;  %v1766_v61 = vsel %vm448_vm2, %v1691_v28, -inf }
 0x6d5   :  { %1767 = vmax.xlane.f32.xlu0 %v1766_v61 }
 0x6d6   :  { %v7637_v26 = vpop.f32.mrb[36].mxu0 }
 0x6d7   :  { %v7639_v30 = vpop.f32.mrb[37].mxu0  ;;  %v1775_v55 = vsel %vm448_vm2, %v7637_v26, -inf }
 0x6d8   :  { %1776 = vmax.xlane.f32.xlu1 %v1775_v55  ;;  %v1772_v5 = vsel %vm448_vm2, %v7639_v30, -inf }
 0x6d9   :  { %1773 = vmax.xlane.f32.xlu0 %v1772_v5 }
 0x6da   :  { %v7645_v25 = vpop.f32.mrb[38].mxu0 }
 0x6db   :  { %v7647_v21 = vpop.f32.mrb[39].mxu0  ;;  %v1781_v34 = vsel %vm448_vm2, %v7645_v25, -inf }
 0x6dc   :  { %1782 = vmax.xlane.f32.xlu1 %v1781_v34  ;;  %v1778_v61 = vsel %vm448_vm2, %v7647_v21, -inf }
 0x6dd   :  { %1779 = vmax.xlane.f32.xlu0 %v1778_v61 }
 0x6de   :  { %v7653_v35 = vpop.f32.mrb[40].mxu0 }
 0x6df   :  { %v7655_v22 = vpop.f32.mrb[41].mxu0  ;;  %v1787_v55 = vsel %vm448_vm2, %v7653_v35, -inf }
 0x6e0   :  { %1788 = vmax.xlane.f32.xlu1 %v1787_v55  ;;  %v1784_v5 = vsel %vm448_vm2, %v7655_v22, -inf }
 0x6e1   :  { %1785 = vmax.xlane.f32.xlu0 %v1784_v5 }
 0x6e2   :  { %v7661_v52 = vpop.f32.mrb[42].mxu0 }
 0x6e3   :  { %v7663_v8 = vpop.f32.mrb[43].mxu0  ;;  %v1793_v34 = vsel %vm448_vm2, %v7661_v52, -inf }
 0x6e4   :  { %1794 = vmax.xlane.f32.xlu1 %v1793_v34  ;;  %v1790_v61 = vsel %vm448_vm2, %v7663_v8, -inf }
 0x6e5   :  { %1791 = vmax.xlane.f32.xlu0 %v1790_v61 }
 0x6e6   :  { %v7669_v63 = vpop.f32.mrb[44].mxu0 }
 0x6e7   :  { %v7671_v56 = vpop.f32.mrb[45].mxu0  ;;  %v1799_v55 = vsel %vm448_vm2, %v7669_v63, -inf }
 0x6e8   :  { %1800 = vmax.xlane.f32.xlu1 %v1799_v55  ;;  %v1796_v5 = vsel %vm448_vm2, %v7671_v56, -inf }
 0x6e9   :  { %1797 = vmax.xlane.f32.xlu0 %v1796_v5 }
 0x6ea   :  { %v7677_v2 = vpop.f32.mrb[46].mxu0 }
 0x6eb   :  { %v7679_v19 = vpop.f32.mrb[47].mxu0  ;;  %v1805_v34 = vsel %vm448_vm2, %v7677_v2, -inf }
 0x6ec   :  { %1806 = vmax.xlane.f32.xlu1 %v1805_v34  ;;  %v1802_v61 = vsel %vm448_vm2, %v7679_v19, -inf }
 0x6ed   :  { %1803 = vmax.xlane.f32.xlu0 %v1802_v61 }
 0x75d   :  { %v1765_v23 = vpop.xlane.xlu1 %1764 }
 0x75e   :  { %vm1809_vm15 = vcmp.eq.f32.partialorder %v6419_v37, %v1765_v23  ;;  %v1762_v41 = vpop.xlane.xlu0 %1761 }
 0x75f   :  { %v1825_v55 = vsel %vm1809_vm15, %v6971_v20, 64  ;;  %vm1808_vm3 = vcmp.eq.f32.partialorder %v1681_v51, %v1762_v41 }
 0x760   :  { %v1824_v5 = vsel %vm1808_vm3, %v6971_v20, 64  ;;  %v7688_v27 = vsel %vm448_vm2, %v1825_v55, 2147483647 }
 0x761   :  { %v1771_v39 = vpop.xlane.xlu1 %1770  ;;  %v1857_v49 = vshra.s32 %v7688_v27, 16  ;;  %v7692_v34 = vsel %vm448_vm2, %v1824_v5, 2147483647 }
 0x762   :  { %vm1811_vm4 = vcmp.eq.f32.partialorder %v6422_v6, %v1771_v39  ;;  %v1768_v1 = vpop.xlane.xlu0 %1767  ;;  %v1842_v61 = vshra.s32 %v7692_v34, 16 }
 0x763   :  { %v1827_v23 = vsel %vm1811_vm4, %v6971_v20, 64  ;;  %vm1810_vm5 = vcmp.eq.f32.partialorder %v1691_v28, %v1768_v1  ;;  %v7696_v37 = vcvt.s32.f32 %v1857_v49 }
 0x764   :  { %v1826_v41 = vsel %vm1810_vm5, %v6971_v20, 64  ;;  %v7699_v51 = vcvt.s32.f32 %v1842_v61  ;;  %v7702_v55 = vsel %vm448_vm2, %v1827_v23, 2147483647 }
 0x765   :  { %v1777_v59 = vpop.xlane.xlu1 %1776  ;;  %1860 = vmin.xlane.f32.xlu1 %v7696_v37  ;;  %v1887_v6 = vshra.s32 %v7702_v55, 16  ;;  %v7707_v39 = vsel %vm448_vm2, %v1826_v41, 2147483647  ;;  %v1886_v24 = vand.u32 65535, %v7702_v55 }
 0x766   :  { %vm1813_vm6 = vcmp.eq.f32.partialorder %v7637_v26, %v1777_v59  ;;  %v1774_v28 = vpop.xlane.xlu0 %1773  ;;  %1845 = vmin.xlane.f32.xlu0 %v7699_v51  ;;  %v1872_v1 = vshra.s32 %v7707_v39, 16  ;;  %v1871_v17 = vand.u32 65535, %v7707_v39 }
 0x767   :  { %v1829_v49 = vsel %vm1813_vm6, %v6971_v20, 64  ;;  %vm1812_vm7 = vcmp.eq.f32.partialorder %v7639_v30, %v1774_v28  ;;  %v7714_v5 = vcvt.s32.f32 %v1887_v6 }
 0x768   :  { %v1828_v61 = vsel %vm1812_vm7, %v6971_v20, 64  ;;  %v7717_v23 = vcvt.s32.f32 %v1872_v1  ;;  %v7720_v41 = vsel %vm448_vm2, %v1829_v49, 2147483647 }
 0x769   :  { %v1783_v12 = vpop.xlane.xlu1 %1782  ;;  %1890 = vmin.xlane.f32.xlu1 %v7714_v5  ;;  %v1917_v59 = vshra.s32 %v7720_v41, 16  ;;  %v7725_v26 = vsel %vm448_vm2, %v1828_v61, 2147483647  ;;  %v1916_v55 = vand.u32 65535, %v7720_v41 }
 0x76a   :  { %vm1815_vm8 = vcmp.eq.f32.partialorder %v7645_v25, %v1783_v12  ;;  %v1780_v30 = vpop.xlane.xlu0 %1779  ;;  %1875 = vmin.xlane.f32.xlu0 %v7717_v23  ;;  %v1902_v6 = vshra.s32 %v7725_v26, 16  ;;  %v1901_v39 = vand.u32 65535, %v7725_v26 }
 0x76b   :  { %v1831_v28 = vsel %vm1815_vm8, %v6971_v20, 64  ;;  %vm1814_vm9 = vcmp.eq.f32.partialorder %v7647_v21, %v1780_v30  ;;  %v7732_v1 = vcvt.s32.f32 %v1917_v59 }
 0x76c   :  { %v1830_v49 = vsel %vm1814_vm9, %v6971_v20, 64  ;;  %v7735_v7 = vcvt.s32.f32 %v1902_v6  ;;  %v7738_v61 = vsel %vm448_vm2, %v1831_v28, 2147483647 }
 0x76d   :  { %v1789_v60 = vpop.xlane.xlu1 %1788  ;;  %1920 = vmin.xlane.f32.xlu1 %v7732_v1  ;;  %v1947_v12 = vshra.s32 %v7738_v61, 16  ;;  %v7743_v25 = vsel %vm448_vm2, %v1830_v49, 2147483647 }
 0x76e   :  { %vm1817_vm10 = vcmp.eq.f32.partialorder %v7653_v35, %v1789_v60  ;;  %v1786_v21 = vpop.xlane.xlu0 %1785  ;;  %1905 = vmin.xlane.f32.xlu0 %v7735_v7  ;;  %v1932_v59 = vshra.s32 %v7743_v25, 16 }
 0x76f   :  { %v1833_v30 = vsel %vm1817_vm10, %v6971_v20, 64  ;;  %vm1816_vm11 = vcmp.eq.f32.partialorder %v7655_v22, %v1786_v21  ;;  %v7750_v6 = vcvt.s32.f32 %v1947_v12 }
 0x770   :  { %v1832_v28 = vsel %vm1816_vm11, %v6971_v20, 64  ;;  %v7753_v33 = vcvt.s32.f32 %v1932_v59  ;;  %v7756_v49 = vsel %vm448_vm2, %v1833_v30, 2147483647 }
 0x771   :  { %v1795_v14 = vpop.xlane.xlu1 %1794  ;;  %1950 = vmin.xlane.f32.xlu1 %v7750_v6  ;;  %v1977_v35 = vshra.s32 %v7756_v49, 16  ;;  %v7761_v60 = vsel %vm448_vm2, %v1832_v28, 2147483647 }
 0x772   :  { %vm1819_vm12 = vcmp.eq.f32.partialorder %v7661_v52, %v1795_v14  ;;  %v1792_v22 = vpop.xlane.xlu0 %1791  ;;  %1935 = vmin.xlane.f32.xlu0 %v7753_v33  ;;  %v1962_v12 = vshra.s32 %v7761_v60, 16 }
 0x773   :  { %v1835_v21 = vsel %vm1819_vm12, %v6971_v20, 64  ;;  %vm1818_vm13 = vcmp.eq.f32.partialorder %v7663_v8, %v1792_v22  ;;  %v7768_v59 = vcvt.s32.f32 %v1977_v35 }
 0x774   :  { %v1834_v30 = vsel %vm1818_vm13, %v6971_v20, 64  ;;  %v7771_v18 = vcvt.s32.f32 %v1962_v12  ;;  %v7774_v28 = vsel %vm448_vm2, %v1835_v21, 2147483647 }
 0x775   :  { %v1801_v47 = vpop.xlane.xlu1 %1800  ;;  %1980 = vmin.xlane.f32.xlu1 %v7768_v59  ;;  %v2007_v14 = vshra.s32 %v7774_v28, 16  ;;  %v7779_v52 = vsel %vm448_vm2, %v1834_v30, 2147483647 }
 0x776   :  { %vm1821_vm14 = vcmp.eq.f32.partialorder %v7669_v63, %v1801_v47  ;;  %v1798_v8 = vpop.xlane.xlu0 %1797  ;;  %1965 = vmin.xlane.f32.xlu0 %v7771_v18  ;;  %v1992_v35 = vshra.s32 %v7779_v52, 16 }
 0x777   :  { %v1837_v22 = vsel %vm1821_vm14, %v6971_v20, 64  ;;  %vm1820_vm15 = vcmp.eq.f32.partialorder %v7671_v56, %v1798_v8  ;;  %v7786_v12 = vcvt.s32.f32 %v2007_v14 }
 0x778   :  { %v1836_v21 = vsel %vm1820_vm15, %v6971_v20, 64  ;;  %v7789_v54 = vcvt.s32.f32 %v1992_v35  ;;  %v7792_v30 = vsel %vm448_vm2, %v1837_v22, 2147483647 }
 0x779   :  { %2010 = vmin.xlane.f32.xlu1 %v7786_v12  ;;  %v1807_v47 = vpop.xlane.xlu1 %1806  ;;  %v2037_v63 = vshra.s32 %v7792_v30, 16  ;;  %v7797_v58 = vsel %vm448_vm2, %v1836_v21, 2147483647 }
 0x77a   :  { %vm1823_vm3 = vcmp.eq.f32.partialorder %v7677_v2, %v1807_v47  ;;  %1995 = vmin.xlane.f32.xlu0 %v7789_v54  ;;  %v1804_v56 = vpop.xlane.xlu0 %1803  ;;  %v2022_v14 = vshra.s32 %v7797_v58, 16 }
 0x77b   :  { %v1839_v8 = vsel %vm1823_vm3, %v6971_v20, 64  ;;  %vm1822_vm4 = vcmp.eq.f32.partialorder %v7679_v19, %v1804_v56  ;;  %v7804_v35 = vcvt.s32.f32 %v2037_v63 }
 0x77c   :  { %v1838_v22 = vsel %vm1822_vm4, %v6971_v20, 64  ;;  %v7807_v29 = vcvt.s32.f32 %v2022_v14  ;;  %v7810_v21 = vsel %vm448_vm2, %v1839_v8, 2147483647  ;;  %v5796_v14 = vld [vmem:[%s10252_s4 + $0x8] sm:$0xff]  ;;  %v1856_v8 = vand.u32 65535, %v7688_v27 }
 0x77d   :  { %2040 = vmin.xlane.f32.xlu1 %v7804_v35  ;;  %v2067_v2 = vshra.s32 %v7810_v21, 16  ;;  %v7815_v47 = vsel %vm448_vm2, %v1838_v22, 2147483647  ;;  %6441 = vmatprep.subr.msk.mxu1 %vm448_vm2, %v5796_v14  ;;  %v1841_v22 = vand.u32 65535, %v7692_v34 }
 0x77e   :  { %2025 = vmin.xlane.f32.xlu0 %v7807_v29  ;;  %v2052_v19 = vshra.s32 %v7815_v47, 16  ;;  %6442 = vmatpush3.xpose.msk.msra.mxu1 %vm448_vm2, %v5796_v14  ;;  %v1888_v14 = vcvt.s32.f32 %v1886_v24  ;;  %v1918_v24 = vcvt.s32.f32 %v1916_v55 }
 0x77f   :  { %v7819_v63 = vcvt.s32.f32 %v2067_v2  ;;  %v1843_v10 = vcvt.s32.f32 %v1841_v22 }
 0x780   :  { %v7821_v56 = vcvt.s32.f32 %v2052_v19  ;;  %v1858_v19 = vcvt.s32.f32 %v1856_v8 }
 0x781   :  { %2070 = vmin.xlane.f32.xlu1 %v7819_v63 }
 0x782   :  { %2055 = vmin.xlane.f32.xlu0 %v7821_v56 }
 0x7f2   :  { %v7832_v2 = vpop.xlane.xlu1 %1860 }
 0x7f3   :  { %v7835_v53 = vpop.xlane.xlu0 %1845  ;;  %vm1862_vm5 = vcmp.eq.f32.partialorder %v7696_v37, %v7832_v2  ;;  %v1873_v37 = vcvt.s32.f32 %v1871_v17  ;;  %v1903_v17 = vcvt.s32.f32 %v1901_v39 }
 0x7f4   :  { %v1863_v45 = vsel %vm1862_vm5, %v1858_v19, inf  ;;  %vm1847_vm6 = vcmp.eq.f32.partialorder %v7699_v51, %v7835_v53  ;;  %v1946_v51 = vand.u32 65535, %v7738_v61  ;;  %v1976_v61 = vand.u32 65535, %v7756_v49 }
 0x7f5   :  { %1864 = vmin.xlane.f32.xlu1 %v1863_v45  ;;  %v1848_v27 = vsel %vm1847_vm6, %v1843_v10, inf  ;;  %v2006_v49 = vand.u32 65535, %v7774_v28  ;;  %v2036_v28 = vand.u32 65535, %v7792_v30  ;;  %v2066_v30 = vand.u32 65535, %v7810_v21 }
 0x7f6   :  { %v7842_v34 = vpop.xlane.xlu1 %1890  ;;  %1849 = vmin.xlane.f32.xlu0 %v1848_v27  ;;  %v1948_v27 = vcvt.s32.f32 %v1946_v51  ;;  %v1978_v39 = vcvt.s32.f32 %v1976_v61 }
 0x7f7   :  { %v7845_v8 = vpop.xlane.xlu0 %1875  ;;  %vm1892_vm7 = vcmp.eq.f32.partialorder %v7714_v5, %v7842_v34  ;;  %v1931_v5 = vand.u32 65535, %v7743_v25  ;;  %v1961_v25 = vand.u32 65535, %v7761_v60  ;;  %v1991_v60 = vand.u32 65535, %v7779_v52 }
 0x7f8   :  { %v1893_v22 = vsel %vm1892_vm7, %v1888_v14, inf  ;;  %vm1877_vm8 = vcmp.eq.f32.partialorder %v7717_v23, %v7845_v8  ;;  %v2008_v51 = vcvt.s32.f32 %v2006_v49  ;;  %v2021_v52 = vand.u32 65535, %v7797_v58 }
 0x7f9   :  { %1894 = vmin.xlane.f32.xlu1 %v1893_v22  ;;  %v1878_v45 = vsel %vm1877_vm8, %v1873_v37, inf  ;;  %v2051_v58 = vand.u32 65535, %v7815_v47 }
 0x7fa   :  { %v7852_v10 = vpop.xlane.xlu1 %1920  ;;  %1879 = vmin.xlane.f32.xlu0 %v1878_v45 }
 0x7fb   :  { %v7855_v41 = vpop.xlane.xlu0 %1905  ;;  %vm1922_vm9 = vcmp.eq.f32.partialorder %v7732_v1, %v7852_v10  ;;  %v1933_v1 = vcvt.s32.f32 %v1931_v5  ;;  %v2053_v21 = vcvt.s32.f32 %v2051_v58 }
 0x7fc   :  { %v1923_v26 = vsel %vm1922_vm9, %v1918_v24, inf  ;;  %vm1907_vm10 = vcmp.eq.f32.partialorder %v7735_v7, %v7855_v41 }
 0x7fd   :  { %1924 = vmin.xlane.f32.xlu1 %v1923_v26  ;;  %v1908_v23 = vsel %vm1907_vm10, %v1903_v17, inf }
 0x7fe   :  { %v7862_v19 = vpop.xlane.xlu1 %1950  ;;  %1909 = vmin.xlane.f32.xlu0 %v1908_v23  ;;  %v2038_v23 = vcvt.s32.f32 %v2036_v28  ;;  %v1927_v28 = vcvt.f32.s32 %v7852_v10 }
 0x7ff   :  { %v7865_v14 = vpop.xlane.xlu0 %1935  ;;  %vm1952_vm11 = vcmp.eq.f32.partialorder %v7750_v6, %v7862_v19  ;;  %v1963_v6 = vcvt.s32.f32 %v1961_v25  ;;  %v2068_v25 = vcvt.s32.f32 %v2066_v30 }
 0x800   :  { %v1953_v55 = vsel %vm1952_vm11, %v1948_v27, inf  ;;  %vm1937_vm12 = vcmp.eq.f32.partialorder %v7753_v33, %v7865_v14  ;;  %v1928_v58 = vshll.u32 %v1927_v28, 16 }
 0x801   :  { %1954 = vmin.xlane.f32.xlu1 %v1953_v55  ;;  %v1938_v7 = vsel %vm1937_vm12, %v1933_v1, inf }
 0x802   :  { %v7872_v37 = vpop.xlane.xlu1 %1980  ;;  %1939 = vmin.xlane.f32.xlu0 %v1938_v7  ;;  %v1867_v7 = vcvt.f32.s32 %v7832_v2 }
 0x803   :  { %v7875_v22 = vpop.xlane.xlu0 %1965  ;;  %vm1982_vm13 = vcmp.eq.f32.partialorder %v7768_v59, %v7872_v37  ;;  %v1993_v59 = vcvt.s32.f32 %v1991_v60 }
 0x804   :  { %v1983_v45 = vsel %vm1982_vm13, %v1978_v39, inf  ;;  %vm1967_vm14 = vcmp.eq.f32.partialorder %v7771_v18, %v7875_v22  ;;  %v1852_v39 = vcvt.f32.s32 %v7835_v53 }
 0x805   :  { %1984 = vmin.xlane.f32.xlu1 %v1983_v45  ;;  %v1968_v33 = vsel %vm1967_vm14, %v1963_v6, inf  ;;  %v1897_v6 = vcvt.f32.s32 %v7842_v34 }
 0x806   :  { %v7882_v24 = vpop.xlane.xlu1 %2010  ;;  %1969 = vmin.xlane.f32.xlu0 %v1968_v33  ;;  %v1882_v33 = vcvt.f32.s32 %v7845_v8 }
 0x807   :  { %v7885_v17 = vpop.xlane.xlu0 %1995  ;;  %vm2012_vm15 = vcmp.eq.f32.partialorder %v7786_v12, %v7882_v24  ;;  %v2023_v12 = vcvt.s32.f32 %v2021_v52  ;;  %v1912_v52 = vcvt.f32.s32 %v7855_v41  ;;  %v1898_v2 = vshll.u32 %v1897_v6, 16 }
 0x808   :  { %v2013_v5 = vsel %vm2012_vm15, %v2008_v51, inf  ;;  %vm1997_vm3 = vcmp.eq.f32.partialorder %v7789_v54, %v7885_v17  ;;  %v1883_v30 = vshll.u32 %v1882_v33, 16  ;;  %v1957_v41 = vcvt.f32.s32 %v7862_v19 }
 0x809   :  { %2014 = vmin.xlane.f32.xlu1 %v2013_v5  ;;  %v1998_v18 = vsel %vm1997_vm3, %v1993_v59, inf  ;;  %v1987_v19 = vcvt.f32.s32 %v7872_v37 }
 0x80a   :  { %v7892_v26 = vpop.xlane.xlu1 %2040  ;;  %1999 = vmin.xlane.f32.xlu0 %v1998_v18 }
 0x80b   :  { %v7895_v27 = vpop.xlane.xlu0 %2025  ;;  %vm2042_vm4 = vcmp.eq.f32.partialorder %v7804_v35, %v7892_v26 }
 0x80c   :  { %v2043_v61 = vsel %vm2042_vm4, %v2038_v23, inf  ;;  %vm2027_vm5 = vcmp.eq.f32.partialorder %v7807_v29, %v7895_v27  ;;  %v5814_v29 = vld [vmem:[%s10253_s5 + $0x8] sm:$0xff] }
 0x80d   :  { %2044 = vmin.xlane.f32.xlu1 %v2043_v61  ;;  %v2028_v54 = vsel %vm2027_vm5, %v2023_v12, inf  ;;  %6467 = vmatprep.subr.mxu0 %v5814_v29  ;;  %v1913_v61 = vshll.u32 %v1912_v52, 16 }
 0x80e   :  { %v7902_v1 = vpop.xlane.xlu1 %2070  ;;  %2029 = vmin.xlane.f32.xlu0 %v2028_v54  ;;  %6468 = vmatpush3.msra.mxu0 %v5814_v29  ;;  %v10559_v29 = vmov 0.0  }
 0x80f   :  { %v7904_v55 = vpop.xlane.xlu0 %2055  ;;  %vm2072_vm6 = vcmp.eq.f32.partialorder %v7819_v63, %v7902_v1  ;;  %v1868_v63 = vshll.u32 %v1867_v7, 16 }
 0x810   :  { %v2073_v35 = vsel %vm2072_vm6, %v2068_v25, inf  ;;  %vm2057_vm7 = vcmp.eq.f32.partialorder %v7821_v56, %v7904_v55  ;;  %v1853_v56 = vshll.u32 %v1852_v39, 16 }
 0x811   :  { %2074 = vmin.xlane.f32.xlu1 %v2073_v35  ;;  %v2058_v47 = vsel %vm2057_vm7, %v2053_v21, inf  ;;  %v1942_v21 = vcvt.f32.s32 %v7865_v14  ;;  %v1958_v14 = vshll.u32 %v1957_v41, 16 }
 0x812   :  { %2059 = vmin.xlane.f32.xlu0 %v2058_v47 }
 0x882   :  { %v1865_v49 = vpop.xlane.xlu1 %1864 }
 0x883   :  { %v1866_v60 = vcvt.f32.s32 %v1865_v49  ;;  %v1850_v45 = vpop.xlane.xlu0 %1849 }
 0x884   :  { %v1851_v51 = vcvt.f32.s32 %v1850_v45  ;;  %v1972_v45 = vcvt.f32.s32 %v7875_v22  ;;  %v1988_v22 = vshll.u32 %v1987_v19, 16 }
 0x885   :  { %v1869_v59 = vadd.s32 %v1868_v63, %v1866_v60 }
 0x886   :  { %v1854_v5 = vadd.s32 %v1853_v56, %v1851_v51  ;;  %v1895_v18 = vpop.xlane.xlu1 %1894  ;;  %v1943_v51 = vshll.u32 %v1942_v21, 16 }
 0x887   :  { %vm2082_vm8 = vcmp.lt.s32.totalorder %v1869_v59, 63  ;;  %v1896_v53 = vcvt.f32.s32 %v1895_v18  ;;  %v1880_v23 = vpop.xlane.xlu0 %1879 }
 0x888   :  { %v7919_v12 = vsel %vm2082_vm8, %v1869_v59, 63  ;;  %vm2080_vm9 = vcmp.lt.s32.totalorder %v1854_v5, 63  ;;  %v1881_v34 = vcvt.f32.s32 %v1880_v23  ;;  %v1973_v23 = vshll.u32 %v1972_v45, 16 }
 0x889   :  { %vm2113_vm10 = vcmp.eq.s32.totalorder %v6971_v20, %v7919_v12  ;;  %v1899_v8 = vadd.s32 %v1898_v2, %v1896_v53  ;;  %v7923_v10 = vsel %vm2080_vm9, %v1854_v5, 63 }
 0x88a   :  { %v1884_v54 = vadd.s32 %v1883_v30, %v1881_v34  ;;  %v1925_v25 = vpop.xlane.xlu1 %1924  ;;  %vm2112_vm11 = vcmp.eq.s32.totalorder %v6971_v20, %v7923_v10  ;;  %v5781_v39 = vsel %vm2113_vm10, 1.0, %v10559_v29  ;;  %v2017_v30 = vcvt.f32.s32 %v7882_v24 }
 0x88b   :  { %vm2086_vm12 = vcmp.lt.s32.totalorder %v1899_v8, 63  ;;  %v1926_v35 = vcvt.f32.s32 %v1925_v25  ;;  %v1910_v47 = vpop.xlane.xlu0 %1909  ;;  %v5780_v7 = vsel %vm2112_vm11, 1.0, %v10559_v29  ;;  %v2047_v24 = vcvt.f32.s32 %v7892_v26 }
 0x88c   :  { %vm2084_vm13 = vcmp.lt.s32.totalorder %v1884_v54, 63  ;;  %v1911_v49 = vcvt.f32.s32 %v1910_v47  ;;  %6443 = vmatprep.mubr.msk.f32.mxu1 %vm448_vm2, %v5780_v7  ;;  %v7932_v63 = vsel %vm2086_vm12, %v1899_v8, 63  ;;  %v2002_v8 = vcvt.f32.s32 %v7885_v17 }
 0x88d   :  { %v1929_v6 = vadd.s32 %v1928_v58, %v1926_v35  ;;  %6444 = vmatmul.mubr.msk.f32.vlgmr.msra.gmra.mrb[48].mxu1 %vm448_vm2, %v5781_v39  ;;  %v7936_v60 = vsel %vm2084_vm13, %v1884_v54, 63  ;;  %vm2115_vm14 = vcmp.eq.s32.totalorder %v6971_v20, %v7932_v63  ;;  %v2018_v17 = vshll.u32 %v2017_v30, 16 }
 0x88e   :  { %v1914_v56 = vadd.s32 %v1913_v61, %v1911_v49  ;;  %v1955_v33 = vpop.xlane.xlu1 %1954  ;;  %vm2114_vm15 = vcmp.eq.s32.totalorder %v6971_v20, %v7936_v60  ;;  %v5783_v5 = vsel %vm2115_vm14, 1.0, %v10559_v29  ;;  %v2032_v39 = vcvt.f32.s32 %v7895_v27 }
 0x88f   :  { %vm2090_vm3 = vcmp.lt.s32.totalorder %v1929_v6, 63  ;;  %v1956_v28 = vcvt.f32.s32 %v1955_v33  ;;  %v1940_v37 = vpop.xlane.xlu0 %1939  ;;  %v5782_v59 = vsel %vm2114_vm15, 1.0, %v10559_v29  ;;  %v2048_v27 = vshll.u32 %v2047_v24, 16 }
 0x890   :  { %vm2088_vm4 = vcmp.lt.s32.totalorder %v1914_v56, 63  ;;  %v1941_v52 = vcvt.f32.s32 %v1940_v37  ;;  %6446 = vmatprep.mubr.msk.f32.mxu1 %vm448_vm2, %v5782_v59  ;;  %v7946_v18 = vsel %vm2090_vm3, %v1929_v6, 63  ;;  %v2003_v6 = vshll.u32 %v2002_v8, 16 }
 0x891   :  { %v1959_v2 = vadd.s32 %v1958_v14, %v1956_v28  ;;  %6447 = vmatmul.mubr.msk.f32.gmra.mrb[50].mxu1 %vm448_vm2, %v5783_v5  ;;  %v7949_v53 = vsel %vm2088_vm4, %v1914_v56, 63  ;;  %vm2117_vm5 = vcmp.eq.s32.totalorder %v6971_v20, %v7946_v18  ;;  %v2033_v59 = vshll.u32 %v2032_v39, 16 }
 0x892   :  { %v1944_v34 = vadd.s32 %v1943_v51, %v1941_v52  ;;  %v1985_v58 = vpop.xlane.xlu1 %1984  ;;  %vm2116_vm6 = vcmp.eq.s32.totalorder %v6971_v20, %v7949_v53  ;;  %v5785_v21 = vsel %vm2117_vm5, 1.0, %v10559_v29  ;;  %v2077_v52 = vcvt.f32.s32 %v7902_v1 }
 0x893   :  { %vm2094_vm7 = vcmp.lt.s32.totalorder %v1959_v2, 63  ;;  %v1986_v61 = vcvt.f32.s32 %v1985_v58  ;;  %v1970_v41 = vpop.xlane.xlu0 %1969  ;;  %v5784_v54 = vsel %vm2116_vm6, 1.0, %v10559_v29 }
 0x894   :  { %vm2092_vm8 = vcmp.lt.s32.totalorder %v1944_v34, 63  ;;  %v1971_v25 = vcvt.f32.s32 %v1970_v41  ;;  %6449 = vmatprep.mubr.msk.f32.mxu1 %vm448_vm2, %v5784_v54  ;;  %v7960_v35 = vsel %vm2094_vm7, %v1959_v2, 63  ;;  %v2062_v2 = vcvt.f32.s32 %v7904_v55 }
 0x895   :  { %v1989_v47 = vadd.s32 %v1988_v22, %v1986_v61  ;;  %6450 = vmatmul.mubr.msk.f32.gmra.mrb[52].mxu1 %vm448_vm2, %v5785_v21  ;;  %v7964_v7 = vsel %vm2092_vm8, %v1944_v34, 63  ;;  %vm2119_vm9 = vcmp.eq.s32.totalorder %v6971_v20, %v7960_v35  ;;  %v2078_v55 = vshll.u32 %v2077_v52, 16  ;;  %v5833_v52 = vld [vmem:[%s10248_s1 + $0x10] sm:$0xff] }
 0x896   :  { %v1974_v49 = vadd.s32 %v1973_v23, %v1971_v25  ;;  %v2015_v19 = vpop.xlane.xlu1 %2014  ;;  %vm2118_vm10 = vcmp.eq.s32.totalorder %v6971_v20, %v7964_v7  ;;  %v5787_v33 = vsel %vm2119_vm9, 1.0, %v10559_v29  ;;  %v2063_v21 = vshll.u32 %v2062_v2, 16  ;;  %6493 = vmatprep.subr.msk.mxu1 %vm56_vm0, %v5833_v52 }
 0x897   :  { %vm2098_vm11 = vcmp.lt.s32.totalorder %v1989_v47, 63  ;;  %v2016_v14 = vcvt.f32.s32 %v2015_v19  ;;  %v2000_v26 = vpop.xlane.xlu0 %1999  ;;  %v5786_v45 = vsel %vm2118_vm10, 1.0, %v10559_v29  ;;  %6494 = vmatpush3.xpose.msk.msra.mxu1 %vm56_vm0, %v5833_v52 }
 0x898   :  { %vm2096_vm12 = vcmp.lt.s32.totalorder %v1974_v49, 63  ;;  %v2001_v56 = vcvt.f32.s32 %v2000_v26  ;;  %6452 = vmatprep.mubr.msk.f32.mxu1 %vm448_vm2, %v5786_v45  ;;  %v7974_v51 = vsel %vm2098_vm11, %v1989_v47, 63 }
 0x899   :  { %v2019_v28 = vadd.s32 %v2018_v17, %v2016_v14  ;;  %6453 = vmatmul.mubr.msk.f32.gmra.mrb[54].mxu1 %vm448_vm2, %v5787_v33  ;;  %v7977_v37 = vsel %vm2096_vm12, %v1974_v49, 63  ;;  %vm2121_vm13 = vcmp.eq.s32.totalorder %v6971_v20, %v7974_v51 }
 0x89a   :  { %v2004_v5 = vadd.s32 %v2003_v6, %v2001_v56  ;;  %v2045_v22 = vpop.xlane.xlu1 %2044  ;;  %vm2120_vm14 = vcmp.eq.s32.totalorder %v6971_v20, %v7977_v37  ;;  %v5789_v8 = vsel %vm2121_vm13, 1.0, %v10559_v29 }
 0x89b   :  { %vm2102_vm15 = vcmp.lt.s32.totalorder %v2019_v28, 63  ;;  %v2046_v23 = vcvt.f32.s32 %v2045_v22  ;;  %v2030_v30 = vpop.xlane.xlu0 %2029  ;;  %v5788_v34 = vsel %vm2120_vm14, 1.0, %v10559_v29 }
 0x89c   :  { %vm2100_vm3 = vcmp.lt.s32.totalorder %v2004_v5, 63  ;;  %v2031_v58 = vcvt.f32.s32 %v2030_v30  ;;  %6455 = vmatprep.mubr.msk.f32.mxu1 %vm448_vm2, %v5788_v34  ;;  %v7988_v61 = vsel %vm2102_vm15, %v2019_v28, 63 }
 0x89d   :  { %v2049_v1 = vadd.s32 %v2048_v27, %v2046_v23  ;;  %6456 = vmatmul.mubr.msk.f32.gmra.mrb[56].mxu1 %vm448_vm2, %v5789_v8  ;;  %v7991_v41 = vsel %vm2100_vm3, %v2004_v5, 63  ;;  %vm2123_vm4 = vcmp.eq.s32.totalorder %v6971_v20, %v7988_v61 }
 0x89e   :  { %v2034_v54 = vadd.s32 %v2033_v59, %v2031_v58  ;;  %v2075_v25 = vpop.xlane.xlu1 %2074  ;;  %vm2122_vm5 = vcmp.eq.s32.totalorder %v6971_v20, %v7991_v41  ;;  %v5791_v49 = vsel %vm2123_vm4, 1.0, %v10559_v29 }
 0x89f   :  { %vm2106_vm6 = vcmp.lt.s32.totalorder %v2049_v1, 63  ;;  %v2076_v24 = vcvt.f32.s32 %v2075_v25  ;;  %v2060_v47 = vpop.xlane.xlu0 %2059  ;;  %v5790_v17 = vsel %vm2122_vm5, 1.0, %v10559_v29 }
 0x8a0   :  { %vm2104_vm7 = vcmp.lt.s32.totalorder %v2034_v54, 63  ;;  %v2061_v39 = vcvt.f32.s32 %v2060_v47  ;;  %6458 = vmatprep.mubr.msk.f32.mxu1 %vm448_vm2, %v5790_v17  ;;  %v8000_v19 = vsel %vm2106_vm6, %v2049_v1, 63 }
 0x8a1   :  { %v2079_v6 = vadd.s32 %v2078_v55, %v2076_v24  ;;  %6459 = vmatmul.mubr.msk.f32.gmra.mrb[58].mxu1 %vm448_vm2, %v5791_v49  ;;  %v8003_v14 = vsel %vm2104_vm7, %v2034_v54, 63  ;;  %vm2125_vm8 = vcmp.eq.s32.totalorder %v6971_v20, %v8000_v19  ;;  %v5816_v49 = vld [vmem:[%s10254_s6 + $0x1] ss:$0 sm:$0xff] }
 0x8a2   :  { %v2064_v26 = vadd.s32 %v2063_v21, %v2061_v39  ;;  %vm2124_vm9 = vcmp.eq.s32.totalorder %v6971_v20, %v8003_v14  ;;  %v5793_v56 = vsel %vm2125_vm8, 1.0, %v10559_v29  ;;  %v5853_v39 = vld [vmem:[%s10250_s3 + $0x10] sm:$0xff] }
 0x8a3   :  { %vm2110_vm10 = vcmp.lt.s32.totalorder %v2079_v6, 63  ;;  %v5792_v45 = vsel %vm2124_vm9, 1.0, %v10559_v29  ;;  %6519 = vmatprep.subr.mxu0 %v5853_v39 }
 0x8a4   :  { %vm2108_vm11 = vcmp.lt.s32.totalorder %v2064_v26, 63  ;;  %6461 = vmatprep.mubr.msk.f32.mxu1 %vm448_vm2, %v5792_v45  ;;  %v8012_v33 = vsel %vm2110_vm10, %v2079_v6, 63 }
 0x8a5   :  { %6462 = vmatmul.mubr.msk.f32.gmra.mrb[60].mxu1 %vm448_vm2, %v5793_v56  ;;  %v8015_v27 = vsel %vm2108_vm11, %v2064_v26, 63  ;;  %vm2127_vm12 = vcmp.eq.s32.totalorder %v6971_v20, %v8012_v33 }
 0x8a6   :  { %10560 = vst [vmem:[#allocation77_spill] sm:$0xff] %v8015_v27  ;;  %vm2126_vm13 = vcmp.eq.s32.totalorder %v6971_v20, %v8015_v27  ;;  %v5795_v59 = vsel %vm2127_vm12, 1.0, %v10559_v29 }
 0x8a7   :  { %v5794_v28 = vsel %vm2126_vm13, 1.0, %v10559_v29 }
 0x8a8   :  { %6464 = vmatprep.mubr.msk.f32.mxu1 %vm448_vm2, %v5794_v28 }
 0x8a9   :  { %6465 = vmatmul.mubr.msk.f32.gmra.mrb[62].mxu1 %vm448_vm2, %v5795_v59 }
 0x960   :  { %v8030_v5 = vpop.f32.mrb[48].mxu1 }
 0x961   :  { %10561 = vst [vmem:[#allocation78_spill] sm:$0xff] %v8030_v5  ;;  %v8032_v22 = vpop.f32.mrb[49].mxu1 }
 0x962   :  { %10562 = vst [vmem:[#allocation79_spill] sm:$0xff] %v8032_v22  ;;  %6469 = vmatprep.mubr.msk.f32.mxu0 %vm254_vm1, %v8032_v22 }
 0x963   :  { %6470 = vmatmul.mubr.msk.f32.vlgmr.msra.gmra.mrb[48].mxu0 %vm254_vm1, %v8030_v5 }
 0x964   :  { %v8038_v2 = vpop.f32.mrb[50].mxu1  ;;  %6520 = vmatpush3.msra.mxu0 %v5853_v39 }
 0x965   :  { %10563 = vst [vmem:[#allocation80_spill] sm:$0xff] %v8038_v2  ;;  %v8040_v23 = vpop.f32.mrb[51].mxu1 }
 0x966   :  { %10564 = vst [vmem:[#allocation81_spill] sm:$0xff] %v8040_v23  ;;  %6472 = vmatprep.mubr.msk.f32.mxu0 %vm254_vm1, %v8040_v23 }
 0x967   :  { %6473 = vmatmul.mubr.msk.f32.gmra.mrb[50].mxu0 %vm254_vm1, %v8038_v2 }
 0x968   :  { %v8046_v30 = vpop.f32.mrb[52].mxu1 }
 0x969   :  { %10565 = vst [vmem:[#allocation82_spill] sm:$0xff] %v8046_v30  ;;  %v8048_v34 = vpop.f32.mrb[53].mxu1 }
 0x96a   :  { %10566 = vst [vmem:[#allocation83_spill] sm:$0xff] %v8048_v34  ;;  %6475 = vmatprep.mubr.msk.f32.mxu0 %vm254_vm1, %v8048_v34 }
 0x96b   :  { %6476 = vmatmul.mubr.msk.f32.gmra.mrb[52].mxu0 %vm254_vm1, %v8046_v30 }
 0x96c   :  { %v8054_v58 = vpop.f32.mrb[54].mxu1 }
 0x96d   :  { %10567 = vst [vmem:[#allocation84_spill] sm:$0xff] %v8054_v58  ;;  %v8056_v8 = vpop.f32.mrb[55].mxu1 }
 0x96e   :  { %10568 = vst [vmem:[#allocation85_spill] sm:$0xff] %v8056_v8  ;;  %6478 = vmatprep.mubr.msk.f32.mxu0 %vm254_vm1, %v8056_v8 }
 0x96f   :  { %6479 = vmatmul.mubr.msk.f32.gmra.mrb[54].mxu0 %vm254_vm1, %v8054_v58 }
 0x970   :  { %v8062_v1 = vpop.f32.mrb[56].mxu1 }
 0x971   :  { %10569 = vst [vmem:[#allocation86_spill] sm:$0xff] %v8062_v1  ;;  %v8064_v55 = vpop.f32.mrb[57].mxu1 }
 0x972   :  { %10570 = vst [vmem:[#allocation87_spill] sm:$0xff] %v8064_v55  ;;  %6481 = vmatprep.mubr.msk.f32.mxu0 %vm254_vm1, %v8064_v55 }
 0x973   :  { %6482 = vmatmul.mubr.msk.f32.gmra.mrb[56].mxu0 %vm254_vm1, %v8062_v1 }
 0x974   :  { %v8070_v54 = vpop.f32.mrb[58].mxu1 }
 0x975   :  { %10571 = vst [vmem:[#allocation88_spill] sm:$0xff] %v8070_v54  ;;  %v8072_v25 = vpop.f32.mrb[59].mxu1 }
 0x976   :  { %10572 = vst [vmem:[#allocation89_spill] sm:$0xff] %v8072_v25  ;;  %6484 = vmatprep.mubr.msk.f32.mxu0 %vm254_vm1, %v8072_v25 }
 0x977   :  { %6485 = vmatmul.mubr.msk.f32.gmra.mrb[58].mxu0 %vm254_vm1, %v8070_v54 }
 0x978   :  { %v8078_v21 = vpop.f32.mrb[60].mxu1 }
 0x979   :  { %10573 = vst [vmem:[#allocation90_spill] sm:$0xff] %v8078_v21  ;;  %v8080_v24 = vpop.f32.mrb[61].mxu1 }
 0x97a   :  { %10574 = vst [vmem:[#allocation91_spill] sm:$0xff] %v8080_v24  ;;  %6487 = vmatprep.mubr.msk.f32.mxu0 %vm254_vm1, %v8080_v24 }
 0x97b   :  { %6488 = vmatmul.mubr.msk.f32.gmra.mrb[60].mxu0 %vm254_vm1, %v8078_v21 }
 0x97c   :  { %v8086_v47 = vpop.f32.mrb[62].mxu1 }
 0x97d   :  { %10575 = vst [vmem:[#allocation92_spill] sm:$0xff] %v8086_v47  ;;  %v8088_v17 = vpop.f32.mrb[63].mxu1 }
 0x97e   :  { %10576 = vst [vmem:[#allocation93_spill] sm:$0xff] %v8088_v17  ;;  %6490 = vmatprep.mubr.msk.f32.mxu0 %vm254_vm1, %v8088_v17 }
 0x97f   :  { %6491 = vmatmul.mubr.msk.f32.gmra.mrb[62].mxu0 %vm254_vm1, %v8086_v47 }
 0xa36   :  { %v6471_v6 = vpop.f32.mrb[48].mxu0 }
 0xa37   :  { %v8100_v26 = vadd.f32 %v6471_v6, %v5816_v49  ;;  %v2562_v45 = vpop.f32.mrb[49].mxu0 }
 0xa38   :  { %v8102_v56 = vadd.f32 %v5816_v49, %v2562_v45 }
 0xa39   :  { %10577 = vst [vmem:[#allocation94_spill] sm:$0xff] %v8100_v26  ;;  %v8110_v52 = vsub.f32 %v7406_v0, %v8100_v26 }
 0xa3a   :  { %10578 = vst [vmem:[#allocation95_spill] sm:$0xff] %v8102_v56  ;;  %v8106_v28 = vsub.f32 %v7400_v4, %v8102_v56  ;;  %v6474_v59 = vpop.f32.mrb[50].mxu0 }
 0xa3b   :  { %10580 = vst [vmem:[#allocation97_spill] sm:$0xff] %v8110_v52  ;;  %v8112_v39 = vadd.f32 %v6474_v59, %v5816_v49  ;;  %v2572_v17 = vpop.f32.mrb[51].mxu0 }
 0xa3c   :  { %10579 = vst [vmem:[#allocation96_spill] sm:$0xff] %v8106_v28  ;;  %v8114_v47 = vadd.f32 %v5816_v49, %v2572_v17  ;;  %6495 = vmatprep.mubr.msk.f32.mxu1 %vm56_vm0, %v8106_v28 }
 0xa3d   :  { %10581 = vst [vmem:[#allocation98_spill] sm:$0xff] %v8112_v39  ;;  %6496 = vmatmul.mubr.msk.f32.vlgmr.msra.gmra.mrb[64].mxu1 %vm56_vm0, %v8110_v52  ;;  %v8126_v0 = vsub.f32 %v7428_v3, %v8112_v39 }
 0xa3e   :  { %10582 = vst [vmem:[#allocation99_spill] sm:$0xff] %v8114_v47  ;;  %v8122_v4 = vsub.f32 %v7422_v57, %v8114_v47  ;;  %v6477_v6 = vpop.f32.mrb[52].mxu0 }
 0xa3f   :  { %10584 = vst [vmem:[#allocation101_spill] sm:$0xff] %v8126_v0  ;;  %v8128_v45 = vadd.f32 %v6477_v6, %v5816_v49  ;;  %v2582_v59 = vpop.f32.mrb[53].mxu0 }
 0xa40   :  { %10583 = vst [vmem:[#allocation100_spill] sm:$0xff] %v8122_v4  ;;  %v8130_v17 = vadd.f32 %v5816_v49, %v2582_v59  ;;  %6498 = vmatprep.mubr.msk.f32.mxu1 %vm56_vm0, %v8122_v4 }
 0xa41   :  { %10585 = vst [vmem:[#allocation102_spill] sm:$0xff] %v8128_v45  ;;  %6499 = vmatmul.mubr.msk.f32.gmra.mrb[66].mxu1 %vm56_vm0, %v8126_v0  ;;  %v8142_v3 = vsub.f32 %v7450_v9, %v8128_v45 }
 0xa42   :  { %10586 = vst [vmem:[#allocation103_spill] sm:$0xff] %v8130_v17  ;;  %v8138_v57 = vsub.f32 %v7444_v15, %v8130_v17  ;;  %v6480_v24 = vpop.f32.mrb[54].mxu0 }
 0xa43   :  { %10588 = vst [vmem:[#allocation105_spill] sm:$0xff] %v8142_v3  ;;  %v8144_v6 = vadd.f32 %v6480_v24, %v5816_v49  ;;  %v2592_v21 = vpop.f32.mrb[55].mxu0 }
 0xa44   :  { %10587 = vst [vmem:[#allocation104_spill] sm:$0xff] %v8138_v57  ;;  %v8146_v59 = vadd.f32 %v5816_v49, %v2592_v21  ;;  %6501 = vmatprep.mubr.msk.f32.mxu1 %vm56_vm0, %v8138_v57 }
 0xa45   :  { %10589 = vst [vmem:[#allocation106_spill] sm:$0xff] %v8144_v6  ;;  %6502 = vmatmul.mubr.msk.f32.gmra.mrb[68].mxu1 %vm56_vm0, %v8142_v3  ;;  %v8158_v9 = vsub.f32 %v7472_v48, %v8144_v6 }
 0xa46   :  { %10590 = vst [vmem:[#allocation107_spill] sm:$0xff] %v8146_v59  ;;  %v8154_v15 = vsub.f32 %v7466_v43, %v8146_v59  ;;  %v6483_v25 = vpop.f32.mrb[56].mxu0 }
 0xa47   :  { %10592 = vst [vmem:[#allocation109_spill] sm:$0xff] %v8158_v9  ;;  %v8160_v24 = vadd.f32 %v6483_v25, %v5816_v49  ;;  %v2602_v54 = vpop.f32.mrb[57].mxu0 }
 0xa48   :  { %10591 = vst [vmem:[#allocation108_spill] sm:$0xff] %v8154_v15  ;;  %v8162_v21 = vadd.f32 %v5816_v49, %v2602_v54  ;;  %6504 = vmatprep.mubr.msk.f32.mxu1 %vm56_vm0, %v8154_v15 }
 0xa49   :  { %10593 = vst [vmem:[#allocation110_spill] sm:$0xff] %v8160_v24  ;;  %6505 = vmatmul.mubr.msk.f32.gmra.mrb[70].mxu1 %vm56_vm0, %v8158_v9  ;;  %v8174_v48 = vsub.f32 %v7494_v44, %v8160_v24 }
 0xa4a   :  { %10594 = vst [vmem:[#allocation111_spill] sm:$0xff] %v8162_v21  ;;  %v8170_v43 = vsub.f32 %v7488_v50, %v8162_v21  ;;  %v6486_v55 = vpop.f32.mrb[58].mxu0 }
 0xa4b   :  { %10596 = vst [vmem:[#allocation113_spill] sm:$0xff] %v8174_v48  ;;  %v8176_v25 = vadd.f32 %v6486_v55, %v5816_v49  ;;  %v2612_v1 = vpop.f32.mrb[59].mxu0 }
 0xa4c   :  { %10595 = vst [vmem:[#allocation112_spill] sm:$0xff] %v8170_v43  ;;  %v8178_v54 = vadd.f32 %v5816_v49, %v2612_v1  ;;  %6507 = vmatprep.mubr.msk.f32.mxu1 %vm56_vm0, %v8170_v43 }
 0xa4d   :  { %10597 = vst [vmem:[#allocation114_spill] sm:$0xff] %v8176_v25  ;;  %6508 = vmatmul.mubr.msk.f32.gmra.mrb[72].mxu1 %vm56_vm0, %v8174_v48  ;;  %v8190_v44 = vsub.f32 %v7516_v40, %v8176_v25 }
 0xa4e   :  { %10598 = vst [vmem:[#allocation115_spill] sm:$0xff] %v8178_v54  ;;  %v8186_v50 = vsub.f32 %v7510_v46, %v8178_v54  ;;  %v6489_v8 = vpop.f32.mrb[60].mxu0 }
 0xa4f   :  { %10600 = vst [vmem:[#allocation117_spill] sm:$0xff] %v8190_v44  ;;  %v8192_v55 = vadd.f32 %v6489_v8, %v5816_v49  ;;  %v2622_v58 = vpop.f32.mrb[61].mxu0 }
 0xa50   :  { %10599 = vst [vmem:[#allocation116_spill] sm:$0xff] %v8186_v50  ;;  %v8194_v1 = vadd.f32 %v5816_v49, %v2622_v58  ;;  %6510 = vmatprep.mubr.msk.f32.mxu1 %vm56_vm0, %v8186_v50 }
 0xa51   :  { %10601 = vst [vmem:[#allocation118_spill] sm:$0xff] %v8192_v55  ;;  %6511 = vmatmul.mubr.msk.f32.gmra.mrb[74].mxu1 %vm56_vm0, %v8190_v44  ;;  %v8206_v40 = vsub.f32 %v7538_v36, %v8192_v55  ;;  %v5835_v36 = vld [vmem:[%s10251_s2 + $0x2] ss:$0 sm:$0xff] }
 0xa52   :  { %10602 = vst [vmem:[#allocation119_spill] sm:$0xff] %v8194_v1  ;;  %v8202_v46 = vsub.f32 %v7532_v42, %v8194_v1  ;;  %v6492_v34 = vpop.f32.mrb[62].mxu0 }
 0xa53   :  { %10604 = vst [vmem:[#allocation121_spill] sm:$0xff] %v8206_v40  ;;  %v8208_v8 = vadd.f32 %v6492_v34, %v5816_v49  ;;  %v2632_v30 = vpop.f32.mrb[63].mxu0 }
 0xa54   :  { %10603 = vst [vmem:[#allocation120_spill] sm:$0xff] %v8202_v46  ;;  %v8210_v58 = vadd.f32 %v5816_v49, %v2632_v30  ;;  %6513 = vmatprep.mubr.msk.f32.mxu1 %vm56_vm0, %v8202_v46 }
 0xa55   :  { %10605 = vst [vmem:[#allocation122_spill] sm:$0xff] %v8208_v8  ;;  %6514 = vmatmul.mubr.msk.f32.gmra.mrb[76].mxu1 %vm56_vm0, %v8206_v40  ;;  %v8222_v23 = vsub.f32 %v7560_v32, %v8208_v8 }
 0xa56   :  { %10606 = vst [vmem:[#allocation123_spill] sm:$0xff] %v8210_v58  ;;  %v8218_v42 = vsub.f32 %v7554_v38, %v8210_v58 }
 0xa57   :  { %10608 = vst [vmem:[#allocation125_spill] sm:$0xff] %v8222_v23 }
 0xa58   :  { %10607 = vst [vmem:[#allocation124_spill] sm:$0xff] %v8218_v42  ;;  %6516 = vmatprep.mubr.msk.f32.mxu1 %vm56_vm0, %v8218_v42 }
 0xa59   :  { %6517 = vmatmul.mubr.msk.f32.gmra.mrb[78].mxu1 %vm56_vm0, %v8222_v23 }
 0xb10   :  { %v6497_v30 = vpop.f32.mrb[64].mxu1 }
 0xb11   :  { %v2800_v34 = vpop.f32.mrb[65].mxu1  ;;  %v8233_v38 = vadd.f32 %v6497_v30, %v5835_v36 }
 0xb12   :  { %v8231_v49 = vadd.f32 %v5835_v36, %v2800_v34 }
 0xb13   :  { %10610 = vst [vmem:[#allocation127_spill] sm:$0xff] %v8233_v38 }
 0xb14   :  { %10609 = vst [vmem:[#allocation126_spill] sm:$0xff] %v8231_v49  ;;  %v6500_v2 = vpop.f32.mrb[66].mxu1  ;;  %6521 = vmatprep.mubr.msk.f32.mxu0 %vm254_vm1, %v8231_v49 }
 0xb15   :  { %v2810_v32 = vpop.f32.mrb[67].mxu1  ;;  %6522 = vmatmul.mubr.msk.f32.vlgmr.msra.gmra.mrb[64].mxu0 %vm254_vm1, %v8233_v38  ;;  %v8241_v5 = vadd.f32 %v6500_v2, %v5835_v36 }
 0xb16   :  { %v8239_v22 = vadd.f32 %v5835_v36, %v2810_v32 }
 0xb17   :  { %10612 = vst [vmem:[#allocation129_spill] sm:$0xff] %v8241_v5 }
 0xb18   :  { %10611 = vst [vmem:[#allocation128_spill] sm:$0xff] %v8239_v22  ;;  %v6503_v23 = vpop.f32.mrb[68].mxu1  ;;  %6524 = vmatprep.mubr.msk.f32.mxu0 %vm254_vm1, %v8239_v22 }
 0xb19   :  { %v2820_v34 = vpop.f32.mrb[69].mxu1  ;;  %6525 = vmatmul.mubr.msk.f32.gmra.mrb[66].mxu0 %vm254_vm1, %v8241_v5  ;;  %v8249_v42 = vadd.f32 %v6503_v23, %v5835_v36 }
 0xb1a   :  { %v8247_v30 = vadd.f32 %v5835_v36, %v2820_v34 }
 0xb1b   :  { %10614 = vst [vmem:[#allocation131_spill] sm:$0xff] %v8249_v42 }
 0xb1c   :  { %10613 = vst [vmem:[#allocation130_spill] sm:$0xff] %v8247_v30  ;;  %v6506_v49 = vpop.f32.mrb[70].mxu1  ;;  %6527 = vmatprep.mubr.msk.f32.mxu0 %vm254_vm1, %v8247_v30 }
 0xb1d   :  { %v2830_v32 = vpop.f32.mrb[71].mxu1  ;;  %6528 = vmatmul.mubr.msk.f32.gmra.mrb[68].mxu0 %vm254_vm1, %v8249_v42  ;;  %v8257_v38 = vadd.f32 %v6506_v49, %v5835_v36 }
 0xb1e   :  { %v8255_v2 = vadd.f32 %v5835_v36, %v2830_v32 }
 0xb1f   :  { %10616 = vst [vmem:[#allocation133_spill] sm:$0xff] %v8257_v38 }
 0xb20   :  { %10615 = vst [vmem:[#allocation132_spill] sm:$0xff] %v8255_v2  ;;  %v6509_v22 = vpop.f32.mrb[72].mxu1  ;;  %6530 = vmatprep.mubr.msk.f32.mxu0 %vm254_vm1, %v8255_v2 }
 0xb21   :  { %v2840_v34 = vpop.f32.mrb[73].mxu1  ;;  %6531 = vmatmul.mubr.msk.f32.gmra.mrb[70].mxu0 %vm254_vm1, %v8257_v38  ;;  %v8265_v5 = vadd.f32 %v6509_v22, %v5835_v36 }
 0xb22   :  { %v8263_v23 = vadd.f32 %v5835_v36, %v2840_v34 }
 0xb23   :  { %10618 = vst [vmem:[#allocation135_spill] sm:$0xff] %v8265_v5 }
 0xb24   :  { %10617 = vst [vmem:[#allocation134_spill] sm:$0xff] %v8263_v23  ;;  %v6512_v30 = vpop.f32.mrb[74].mxu1  ;;  %6533 = vmatprep.mubr.msk.f32.mxu0 %vm254_vm1, %v8263_v23 }
 0xb25   :  { %v2850_v32 = vpop.f32.mrb[75].mxu1  ;;  %6534 = vmatmul.mubr.msk.f32.gmra.mrb[72].mxu0 %vm254_vm1, %v8265_v5  ;;  %v8273_v42 = vadd.f32 %v6512_v30, %v5835_v36 }
 0xb26   :  { %v8271_v49 = vadd.f32 %v5835_v36, %v2850_v32 }
 0xb27   :  { %10620 = vst [vmem:[#allocation137_spill] sm:$0xff] %v8273_v42 }
 0xb28   :  { %10619 = vst [vmem:[#allocation136_spill] sm:$0xff] %v8271_v49  ;;  %v6515_v2 = vpop.f32.mrb[76].mxu1  ;;  %6536 = vmatprep.mubr.msk.f32.mxu0 %vm254_vm1, %v8271_v49 }
 0xb29   :  { %v2860_v34 = vpop.f32.mrb[77].mxu1  ;;  %6537 = vmatmul.mubr.msk.f32.gmra.mrb[74].mxu0 %vm254_vm1, %v8273_v42  ;;  %v8281_v38 = vadd.f32 %v6515_v2, %v5835_v36 }
 0xb2a   :  { %v8279_v22 = vadd.f32 %v5835_v36, %v2860_v34 }
 0xb2b   :  { %10622 = vst [vmem:[#allocation139_spill] sm:$0xff] %v8281_v38 }
 0xb2c   :  { %10621 = vst [vmem:[#allocation138_spill] sm:$0xff] %v8279_v22  ;;  %v6518_v23 = vpop.f32.mrb[78].mxu1  ;;  %6539 = vmatprep.mubr.msk.f32.mxu0 %vm254_vm1, %v8279_v22 }
 0xb2d   :  { %v2870_v32 = vpop.f32.mrb[79].mxu1  ;;  %6540 = vmatmul.mubr.msk.f32.gmra.mrb[76].mxu0 %vm254_vm1, %v8281_v38  ;;  %v8289_v5 = vadd.f32 %v6518_v23, %v5835_v36 }
 0xb2e   :  { %v8287_v30 = vadd.f32 %v5835_v36, %v2870_v32 }
 0xb2f   :  { %10624 = vst [vmem:[#allocation141_spill] sm:$0xff] %v8289_v5 }
 0xb30   :  { %10623 = vst [vmem:[#allocation140_spill] sm:$0xff] %v8287_v30  ;;  %6542 = vmatprep.mubr.msk.f32.mxu0 %vm254_vm1, %v8287_v30 }
 0xb31   :  { %6543 = vmatmul.mubr.msk.f32.gmra.mrb[78].mxu0 %vm254_vm1, %v8289_v5 }
 0xbe8   :  { %v6523_v2 = vpop.f32.mrb[64].mxu0 }
 0xbe9   :  { %v2995_v34 = vpop.f32.mrb[65].mxu0  ;;  %v3077_v49 = vsel %vm448_vm2, %v6523_v2, -inf }
 0xbea   :  { %3078 = vmax.xlane.f32.xlu1 %v3077_v49  ;;  %v3074_v22 = vsel %vm448_vm2, %v2995_v34, -inf }
 0xbeb   :  { %3075 = vmax.xlane.f32.xlu0 %v3074_v22 }
 0xbec   :  { %v6526_v42 = vpop.f32.mrb[66].mxu0 }
 0xbed   :  { %v3005_v38 = vpop.f32.mrb[67].mxu0  ;;  %v3083_v32 = vsel %vm448_vm2, %v6526_v42, -inf }
 0xbee   :  { %3084 = vmax.xlane.f32.xlu1 %v3083_v32  ;;  %v3080_v36 = vsel %vm448_vm2, %v3005_v38, -inf }
 0xbef   :  { %3081 = vmax.xlane.f32.xlu0 %v3080_v36 }
 0xbf0   :  { %v8299_v23 = vpop.f32.mrb[68].mxu0 }
 0xbf1   :  { %v8301_v30 = vpop.f32.mrb[69].mxu0  ;;  %v3089_v5 = vsel %vm448_vm2, %v8299_v23, -inf }
 0xbf2   :  { %3090 = vmax.xlane.f32.xlu1 %v3089_v5  ;;  %v3086_v49 = vsel %vm448_vm2, %v8301_v30, -inf }
 0xbf3   :  { %3087 = vmax.xlane.f32.xlu0 %v3086_v49 }
 0xbf4   :  { %v8307_v22 = vpop.f32.mrb[70].mxu0 }
 0xbf5   :  { %v8309_v58 = vpop.f32.mrb[71].mxu0  ;;  %v3095_v32 = vsel %vm448_vm2, %v8307_v22, -inf }
 0xbf6   :  { %3096 = vmax.xlane.f32.xlu1 %v3095_v32  ;;  %v3092_v36 = vsel %vm448_vm2, %v8309_v58, -inf }
 0xbf7   :  { %3093 = vmax.xlane.f32.xlu0 %v3092_v36 }
 0xbf8   :  { %v8315_v40 = vpop.f32.mrb[72].mxu0 }
 0xbf9   :  { %v8317_v8 = vpop.f32.mrb[73].mxu0  ;;  %v3101_v5 = vsel %vm448_vm2, %v8315_v40, -inf }
 0xbfa   :  { %3102 = vmax.xlane.f32.xlu1 %v3101_v5  ;;  %v3098_v49 = vsel %vm448_vm2, %v8317_v8, -inf }
 0xbfb   :  { %3099 = vmax.xlane.f32.xlu0 %v3098_v49 }
 0xbfc   :  { %v8323_v46 = vpop.f32.mrb[74].mxu0 }
 0xbfd   :  { %v8325_v1 = vpop.f32.mrb[75].mxu0  ;;  %v3107_v32 = vsel %vm448_vm2, %v8323_v46, -inf }
 0xbfe   :  { %3108 = vmax.xlane.f32.xlu1 %v3107_v32  ;;  %v3104_v36 = vsel %vm448_vm2, %v8325_v1, -inf }
 0xbff   :  { %3105 = vmax.xlane.f32.xlu0 %v3104_v36 }
 0xc00   :  { %v8331_v44 = vpop.f32.mrb[76].mxu0 }
 0xc01   :  { %v8333_v55 = vpop.f32.mrb[77].mxu0  ;;  %v3113_v5 = vsel %vm448_vm2, %v8331_v44, -inf }
 0xc02   :  { %3114 = vmax.xlane.f32.xlu1 %v3113_v5  ;;  %v3110_v49 = vsel %vm448_vm2, %v8333_v55, -inf }
 0xc03   :  { %3111 = vmax.xlane.f32.xlu0 %v3110_v49 }
 0xc04   :  { %v8339_v50 = vpop.f32.mrb[78].mxu0 }
 0xc05   :  { %v8341_v54 = vpop.f32.mrb[79].mxu0  ;;  %v3119_v32 = vsel %vm448_vm2, %v8339_v50, -inf }
 0xc06   :  { %3120 = vmax.xlane.f32.xlu1 %v3119_v32  ;;  %v3116_v36 = vsel %vm448_vm2, %v8341_v54, -inf }
 0xc07   :  { %3117 = vmax.xlane.f32.xlu0 %v3116_v36 }
 0xc77   :  { %v3079_v48 = vpop.xlane.xlu1 %3078 }
 0xc78   :  { %vm3123_vm14 = vcmp.eq.f32.partialorder %v6523_v2, %v3079_v48  ;;  %v3076_v25 = vpop.xlane.xlu0 %3075 }
 0xc79   :  { %v3139_v5 = vsel %vm3123_vm14, %v6971_v20, 64  ;;  %vm3122_vm15 = vcmp.eq.f32.partialorder %v2995_v34, %v3076_v25 }
 0xc7a   :  { %v8349_v49 = vsel %vm448_vm2, %v3139_v5, 2147483647  ;;  %v3138_v43 = vsel %vm3122_vm15, %v6971_v20, 64 }
 0xc7b   :  { %v8353_v21 = vsel %vm448_vm2, %v3138_v43, 2147483647  ;;  %v3085_v9 = vpop.xlane.xlu1 %3084  ;;  %v3171_v32 = vshra.s32 %v8349_v49, 16 }
 0xc7c   :  { %vm3125_vm3 = vcmp.eq.f32.partialorder %v6526_v42, %v3085_v9  ;;  %v3082_v24 = vpop.xlane.xlu0 %3081  ;;  %v3156_v36 = vshra.s32 %v8353_v21, 16 }
 0xc7d   :  { %v3141_v48 = vsel %vm3125_vm3, %v6971_v20, 64  ;;  %vm3124_vm4 = vcmp.eq.f32.partialorder %v3005_v38, %v3082_v24  ;;  %v8358_v2 = vcvt.s32.f32 %v3171_v32 }
 0xc7e   :  { %v8361_v25 = vsel %vm448_vm2, %v3141_v48, 2147483647  ;;  %v3140_v34 = vsel %vm3124_vm4, %v6971_v20, 64  ;;  %v8364_v5 = vcvt.s32.f32 %v3156_v36 }
 0xc7f   :  { %v8367_v43 = vsel %vm448_vm2, %v3140_v34, 2147483647  ;;  %v3091_v15 = vpop.xlane.xlu1 %3090  ;;  %3174 = vmin.xlane.f32.xlu1 %v8358_v2  ;;  %v3201_v9 = vshra.s32 %v8361_v25, 16  ;;  %v3200_v39 = vand.u32 65535, %v8361_v25 }
 0xc80   :  { %vm3127_vm5 = vcmp.eq.f32.partialorder %v8299_v23, %v3091_v15  ;;  %v3088_v24 = vpop.xlane.xlu0 %3087  ;;  %3159 = vmin.xlane.f32.xlu0 %v8364_v5  ;;  %v3186_v42 = vshra.s32 %v8367_v43, 16  ;;  %v3185_v26 = vand.u32 65535, %v8367_v43 }
 0xc81   :  { %v3143_v38 = vsel %vm3127_vm5, %v6971_v20, 64  ;;  %vm3126_vm6 = vcmp.eq.f32.partialorder %v8301_v30, %v3088_v24  ;;  %v8376_v32 = vcvt.s32.f32 %v3201_v9 }
 0xc82   :  { %v8379_v36 = vsel %vm448_vm2, %v3143_v38, 2147483647  ;;  %v3142_v48 = vsel %vm3126_vm6, %v6971_v20, 64  ;;  %v8382_v34 = vcvt.s32.f32 %v3186_v42 }
 0xc83   :  { %v8385_v15 = vsel %vm448_vm2, %v3142_v48, 2147483647  ;;  %v3097_v23 = vpop.xlane.xlu1 %3096  ;;  %3204 = vmin.xlane.f32.xlu1 %v8376_v32  ;;  %v3231_v59 = vshra.s32 %v8379_v36, 16  ;;  %v3230_v25 = vand.u32 65535, %v8379_v36 }
 0xc84   :  { %vm3129_vm7 = vcmp.eq.f32.partialorder %v8307_v22, %v3097_v23  ;;  %v3094_v30 = vpop.xlane.xlu0 %3093  ;;  %3189 = vmin.xlane.f32.xlu0 %v8382_v34  ;;  %v3216_v9 = vshra.s32 %v8385_v15, 16  ;;  %v3215_v43 = vand.u32 65535, %v8385_v15 }
 0xc85   :  { %v3145_v24 = vsel %vm3129_vm7, %v6971_v20, 64  ;;  %vm3128_vm8 = vcmp.eq.f32.partialorder %v8309_v58, %v3094_v30  ;;  %v8394_v42 = vcvt.s32.f32 %v3231_v59 }
 0xc86   :  { %v8397_v38 = vsel %vm448_vm2, %v3145_v24, 2147483647  ;;  %v3144_v48 = vsel %vm3128_vm8, %v6971_v20, 64  ;;  %v8400_v3 = vcvt.s32.f32 %v3216_v9 }
 0xc87   :  { %v8403_v22 = vsel %vm448_vm2, %v3144_v48, 2147483647  ;;  %v3103_v23 = vpop.xlane.xlu1 %3102  ;;  %3234 = vmin.xlane.f32.xlu1 %v8394_v42  ;;  %v3261_v6 = vshra.s32 %v8397_v38, 16 }
 0xc88   :  { %vm3131_vm9 = vcmp.eq.f32.partialorder %v8315_v40, %v3103_v23  ;;  %v3100_v58 = vpop.xlane.xlu0 %3099  ;;  %3219 = vmin.xlane.f32.xlu0 %v8400_v3  ;;  %v3246_v59 = vshra.s32 %v8403_v22, 16 }
 0xc89   :  { %v3147_v30 = vsel %vm3131_vm9, %v6971_v20, 64  ;;  %vm3130_vm10 = vcmp.eq.f32.partialorder %v8317_v8, %v3100_v58  ;;  %v8412_v9 = vcvt.s32.f32 %v3261_v6 }
 0xc8a   :  { %v8415_v24 = vsel %vm448_vm2, %v3147_v30, 2147483647  ;;  %v3146_v48 = vsel %vm3130_vm10, %v6971_v20, 64  ;;  %v8418_v57 = vcvt.s32.f32 %v3246_v59 }
 0xc8b   :  { %v8421_v40 = vsel %vm448_vm2, %v3146_v48, 2147483647  ;;  %v3109_v23 = vpop.xlane.xlu1 %3108  ;;  %3264 = vmin.xlane.f32.xlu1 %v8412_v9  ;;  %v3291_v17 = vshra.s32 %v8415_v24, 16 }
 0xc8c   :  { %vm3133_vm11 = vcmp.eq.f32.partialorder %v8323_v46, %v3109_v23  ;;  %v3106_v8 = vpop.xlane.xlu0 %3105  ;;  %3249 = vmin.xlane.f32.xlu0 %v8418_v57  ;;  %v3276_v6 = vshra.s32 %v8421_v40, 16 }
 0xc8d   :  { %v3149_v58 = vsel %vm3133_vm11, %v6971_v20, 64  ;;  %vm3132_vm12 = vcmp.eq.f32.partialorder %v8325_v1, %v3106_v8  ;;  %v8430_v59 = vcvt.s32.f32 %v3291_v17 }
 0xc8e   :  { %v8433_v30 = vsel %vm448_vm2, %v3149_v58, 2147483647  ;;  %v3148_v48 = vsel %vm3132_vm12, %v6971_v20, 64  ;;  %v8436_v0 = vcvt.s32.f32 %v3276_v6 }
 0xc8f   :  { %v8439_v46 = vsel %vm448_vm2, %v3148_v48, 2147483647  ;;  %v3115_v23 = vpop.xlane.xlu1 %3114  ;;  %3294 = vmin.xlane.f32.xlu1 %v8430_v59  ;;  %v3321_v45 = vshra.s32 %v8433_v30, 16 }
 0xc90   :  { %vm3135_vm13 = vcmp.eq.f32.partialorder %v8331_v44, %v3115_v23  ;;  %v3112_v1 = vpop.xlane.xlu0 %3111  ;;  %3279 = vmin.xlane.f32.xlu0 %v8436_v0  ;;  %v3306_v17 = vshra.s32 %v8439_v46, 16 }
 0xc91   :  { %v3151_v8 = vsel %vm3135_vm13, %v6971_v20, 64  ;;  %vm3134_vm14 = vcmp.eq.f32.partialorder %v8333_v55, %v3112_v1  ;;  %v8448_v6 = vcvt.s32.f32 %v3321_v45 }
 0xc92   :  { %v8451_v58 = vsel %vm448_vm2, %v3151_v8, 2147483647  ;;  %v3150_v48 = vsel %vm3134_vm14, %v6971_v20, 64  ;;  %v8454_v4 = vcvt.s32.f32 %v3306_v17 }
 0xc93   :  { %v8457_v44 = vsel %vm448_vm2, %v3150_v48, 2147483647  ;;  %3324 = vmin.xlane.f32.xlu1 %v8448_v6  ;;  %v3121_v23 = vpop.xlane.xlu1 %3120  ;;  %v3351_v47 = vshra.s32 %v8451_v58, 16 }
 0xc94   :  { %vm3137_vm15 = vcmp.eq.f32.partialorder %v8339_v50, %v3121_v23  ;;  %3309 = vmin.xlane.f32.xlu0 %v8454_v4  ;;  %v3118_v45 = vpop.xlane.xlu0 %3117  ;;  %v3336_v55 = vshra.s32 %v8457_v44, 16 }
 0xc95   :  { %v3153_v1 = vsel %vm3137_vm15, %v6971_v20, 64  ;;  %vm3136_vm3 = vcmp.eq.f32.partialorder %v8341_v54, %v3118_v45  ;;  %v8466_v17 = vcvt.s32.f32 %v3351_v47 }
 0xc96   :  { %v8469_v8 = vsel %vm448_vm2, %v3153_v1, 2147483647  ;;  %v3152_v48 = vsel %vm3136_vm3, %v6971_v20, 64  ;;  %v8472_v52 = vcvt.s32.f32 %v3336_v55  ;;  %v5886_v55 = vld [vmem:[%s10252_s4 + $0x10] sm:$0xff]  ;;  %v3170_v1 = vand.u32 65535, %v8349_v49 }
 0xc97   :  { %v8475_v50 = vsel %vm448_vm2, %v3152_v48, 2147483647  ;;  %3354 = vmin.xlane.f32.xlu1 %v8466_v17  ;;  %v3381_v23 = vshra.s32 %v8469_v8, 16  ;;  %6545 = vmatprep.subr.msk.mxu1 %vm448_vm2, %v5886_v55  ;;  %v3155_v48 = vand.u32 65535, %v8353_v21 }
 0xc98   :  { %3339 = vmin.xlane.f32.xlu0 %v8472_v52  ;;  %v3366_v54 = vshra.s32 %v8475_v50, 16  ;;  %6546 = vmatpush3.xpose.msk.msra.mxu1 %vm448_vm2, %v5886_v55  ;;  %v3202_v55 = vcvt.s32.f32 %v3200_v39  ;;  %v3232_v39 = vcvt.s32.f32 %v3230_v25 }
 0xc99   :  { %v8481_v47 = vcvt.s32.f32 %v3381_v23  ;;  %v3157_v56 = vcvt.s32.f32 %v3155_v48 }
 0xc9a   :  { %v8483_v45 = vcvt.s32.f32 %v3366_v54  ;;  %v3172_v54 = vcvt.s32.f32 %v3170_v1 }
 0xc9b   :  { %3384 = vmin.xlane.f32.xlu1 %v8481_v47 }
 0xc9c   :  { %3369 = vmin.xlane.f32.xlu0 %v8483_v45 }
 0xd0c   :  { %v8494_v23 = vpop.xlane.xlu1 %3174 }
 0xd0d   :  { %v8497_v28 = vpop.xlane.xlu0 %3159  ;;  %vm3176_vm4 = vcmp.eq.f32.partialorder %v8358_v2, %v8494_v23  ;;  %v3187_v2 = vcvt.s32.f32 %v3185_v26  ;;  %v3217_v26 = vcvt.s32.f32 %v3215_v43 }
 0xd0e   :  { %v3177_v27 = vsel %vm3176_vm4, %v3172_v54, inf  ;;  %vm3161_vm5 = vcmp.eq.f32.partialorder %v8364_v5, %v8497_v28  ;;  %v3260_v5 = vand.u32 65535, %v8397_v38  ;;  %v3290_v38 = vand.u32 65535, %v8415_v24 }
 0xd0f   :  { %3178 = vmin.xlane.f32.xlu1 %v3177_v27  ;;  %v3162_v49 = vsel %vm3161_vm5, %v3157_v56, inf  ;;  %v3320_v24 = vand.u32 65535, %v8433_v30  ;;  %v3350_v30 = vand.u32 65535, %v8451_v58  ;;  %v3380_v58 = vand.u32 65535, %v8469_v8 }
 0xd10   :  { %v8504_v21 = vpop.xlane.xlu1 %3204  ;;  %3163 = vmin.xlane.f32.xlu0 %v3162_v49  ;;  %v3262_v49 = vcvt.s32.f32 %v3260_v5  ;;  %v3292_v43 = vcvt.s32.f32 %v3290_v38 }
 0xd11   :  { %v8507_v1 = vpop.xlane.xlu0 %3189  ;;  %vm3206_vm6 = vcmp.eq.f32.partialorder %v8376_v32, %v8504_v21  ;;  %v3245_v32 = vand.u32 65535, %v8403_v22  ;;  %v3275_v22 = vand.u32 65535, %v8421_v40  ;;  %v3305_v40 = vand.u32 65535, %v8439_v46 }
 0xd12   :  { %v3207_v48 = vsel %vm3206_vm6, %v3202_v55, inf  ;;  %vm3191_vm7 = vcmp.eq.f32.partialorder %v8382_v34, %v8507_v1  ;;  %v3322_v5 = vcvt.s32.f32 %v3320_v24  ;;  %v3335_v46 = vand.u32 65535, %v8457_v44 }
 0xd13   :  { %3208 = vmin.xlane.f32.xlu1 %v3207_v48  ;;  %v3192_v27 = vsel %vm3191_vm7, %v3187_v2, inf  ;;  %v3365_v44 = vand.u32 65535, %v8475_v50  ;;  %vm5511_vm7 = vcmask 7168  }
 0xd14   :  { %v8514_v56 = vpop.xlane.xlu1 %3234  ;;  %3193 = vmin.xlane.f32.xlu0 %v3192_v27  ;;  %v8594_v24 = vsel %vm5511_vm7, %v7231_v11, %v7949_v53  ;;  %v10628_v11 = vld [vmem:[#allocation21_spill] sm:$0xff] }
 0xd15   :  { %v8517_v36 = vpop.xlane.xlu0 %3219  ;;  %vm3236_vm8 = vcmp.eq.f32.partialorder %v8394_v42, %v8514_v56  ;;  %v3247_v42 = vcvt.s32.f32 %v3245_v32  ;;  %v3367_v8 = vcvt.s32.f32 %v3365_v44 }
 0xd16   :  { %v3237_v15 = vsel %vm3236_vm8, %v3232_v39, inf  ;;  %vm3221_vm9 = vcmp.eq.f32.partialorder %v8400_v3, %v8517_v36  ;;  %vm5528_vm8 = vcmask 15360  }
 0xd17   :  { %3238 = vmin.xlane.f32.xlu1 %v3237_v15  ;;  %v3222_v34 = vsel %vm3221_vm9, %v3217_v26, inf }
 0xd18   :  { %v8524_v54 = vpop.xlane.xlu1 %3264  ;;  %3223 = vmin.xlane.f32.xlu0 %v3222_v34  ;;  %v3352_v34 = vcvt.s32.f32 %v3350_v30 }
 0xd19   :  { %v8527_v55 = vpop.xlane.xlu0 %3249  ;;  %vm3266_vm10 = vcmp.eq.f32.partialorder %v8412_v9, %v8524_v54  ;;  %v3277_v9 = vcvt.s32.f32 %v3275_v22  ;;  %v3382_v22 = vcvt.s32.f32 %v3380_v58 }
 0xd1a   :  { %v3267_v25 = vsel %vm3266_vm10, %v3262_v49, inf  ;;  %vm3251_vm11 = vcmp.eq.f32.partialorder %v8418_v57, %v8527_v55 }
 0xd1b   :  { %3268 = vmin.xlane.f32.xlu1 %v3267_v25  ;;  %v3252_v3 = vsel %vm3251_vm11, %v3247_v42, inf }
 0xd1c   :  { %v8534_v2 = vpop.xlane.xlu1 %3294  ;;  %3253 = vmin.xlane.f32.xlu0 %v3252_v3  ;;  %v5513_v3 = vsel %vm5511_vm7, %v7215_v13, %v7919_v12  ;;  %v10625_v13 = vld [vmem:[#allocation18_spill] sm:$0xff] }
 0xd1d   :  { %v8537_v48 = vpop.xlane.xlu0 %3279  ;;  %vm3296_vm12 = vcmp.eq.f32.partialorder %v8430_v59, %v8534_v2  ;;  %v3307_v59 = vcvt.s32.f32 %v3305_v40  ;;  %v8599_v12 = vsel %vm5511_vm7, %v10625_v13, %v7946_v18  ;;  %v10629_v18 = vld [vmem:[#allocation22_spill] sm:$0xff] }
 0xd1e   :  { %v3297_v27 = vsel %vm3296_vm12, %v3292_v43, inf  ;;  %vm3281_vm13 = vcmp.eq.f32.partialorder %v8436_v0, %v8537_v48  ;;  %v8589_v43 = vsel %vm5511_vm7, %v7229_v62, %v7932_v63  ;;  %v10627_v62 = vld [vmem:[#allocation19_spill] sm:$0xff]  ;;  %v8620_v53 = vsel %vm5511_vm7, %v10629_v18, %v7974_v51 }
 0xd1f   :  { %3298 = vmin.xlane.f32.xlu1 %v3297_v27  ;;  %v3282_v57 = vsel %vm3281_vm13, %v3277_v9, inf  ;;  %v8610_v63 = vsel %vm5511_vm7, %v10627_v62, %v7964_v7  ;;  %v10630_v9 = vld [vmem:[#allocation23_spill] sm:$0xff]  ;;  %v10631_v7 = vld [vmem:[#allocation24_spill] sm:$0xff]  ;;  %v3196_v27 = vcvt.f32.s32 %v8507_v1  ;;  %v10633_v1 = vld [vmem:[#allocation25_spill] sm:$0xff] }
 0xd20   :  { %v8544_v39 = vpop.xlane.xlu1 %3324  ;;  %3283 = vmin.xlane.f32.xlu0 %v3282_v57  ;;  %v8631_v40 = vsel %vm5511_vm7, %v10631_v7, %v7988_v61  ;;  %v10632_v57 = vld [vmem:[#allocation26_spill] sm:$0xff]  ;;  %v3256_v61 = vcvt.f32.s32 %v8527_v55 }
 0xd21   :  { %v8547_v26 = vpop.xlane.xlu0 %3309  ;;  %vm3326_vm14 = vcmp.eq.f32.partialorder %v8448_v6, %v8544_v39  ;;  %v3337_v6 = vcvt.s32.f32 %v3335_v46  ;;  %v8638_v51 = vsel %vm5511_vm7, %v10632_v57, %v8000_v19  ;;  %v3301_v46 = vcvt.f32.s32 %v8534_v2 }
 0xd22   :  { %v3327_v32 = vsel %vm3326_vm14, %v3322_v5, inf  ;;  %vm3311_vm15 = vcmp.eq.f32.partialorder %v8454_v4, %v8547_v26  ;;  %v3226_v5 = vcvt.f32.s32 %v8517_v36  ;;  %v3197_v58 = vshll.u32 %v3196_v27, 16 }
 0xd23   :  { %3328 = vmin.xlane.f32.xlu1 %v3327_v32  ;;  %v3312_v0 = vsel %vm3311_vm15, %v3307_v59, inf }
 0xd24   :  { %v8554_v15 = vpop.xlane.xlu1 %3354  ;;  %3313 = vmin.xlane.f32.xlu0 %v3312_v0  ;;  %v8648_v0 = vsel %vm5511_vm7, %v10633_v1, %v8003_v14  ;;  %v3227_v44 = vshll.u32 %v3226_v5, 16 }
 0xd25   :  { %v8557_v49 = vpop.xlane.xlu0 %3339  ;;  %vm3356_vm3 = vcmp.eq.f32.partialorder %v8466_v17, %v8554_v15 }
 0xd26   :  { %v3357_v38 = vsel %vm3356_vm3, %v3352_v34, inf  ;;  %vm3341_vm4 = vcmp.eq.f32.partialorder %v8472_v52, %v8557_v49  ;;  %v5904_v52 = vld [vmem:[%s10253_s5 + $0x10] sm:$0xff] }
 0xd27   :  { %3358 = vmin.xlane.f32.xlu1 %v3357_v38  ;;  %v3342_v4 = vsel %vm3341_vm4, %v3337_v6, inf  ;;  %6571 = vmatprep.subr.mxu0 %v5904_v52 }
 0xd28   :  { %v8564_v42 = vpop.xlane.xlu1 %3384  ;;  %3343 = vmin.xlane.f32.xlu0 %v3342_v4  ;;  %6572 = vmatpush3.msra.mxu0 %v5904_v52  ;;  %v3257_v4 = vshll.u32 %v3256_v61, 16 }
 0xd29   :  { %v8566_v25 = vpop.xlane.xlu0 %3369  ;;  %vm3386_vm5 = vcmp.eq.f32.partialorder %v8481_v47, %v8564_v42  ;;  %v5512_v47 = vsel %vm5511_vm7, %v7207_v16, %v7923_v10  ;;  %v10626_v16 = vld [vmem:[#allocation20_spill] sm:$0xff]  ;;  %v3181_v10 = vcvt.f32.s32 %v8494_v23  ;;  %v8626_v23 = vsel %vm5511_vm7, %v10630_v9, %v7991_v41 }
 0xd2a   :  { %v3387_v17 = vsel %vm3386_vm5, %v3382_v22, inf  ;;  %vm3371_vm6 = vcmp.eq.f32.partialorder %v8483_v45, %v8566_v25  ;;  %v8584_v45 = vsel %vm5511_vm7, %v7217_v31, %v7936_v60  ;;  %v8604_v31 = vsel %vm5511_vm7, %v10626_v16, %v7960_v35 }
 0xd2b   :  { %3388 = vmin.xlane.f32.xlu1 %v3387_v17  ;;  %v3372_v50 = vsel %vm3371_vm6, %v3367_v8, inf  ;;  %v8615_v60 = vsel %vm5511_vm7, %v10628_v11, %v7977_v37  ;;  %v3166_v35 = vcvt.f32.s32 %v8497_v28  ;;  %v3211_v37 = vcvt.f32.s32 %v8504_v21 }
 0xd2c   :  { %3373 = vmin.xlane.f32.xlu0 %v3372_v50  ;;  %v3241_v28 = vcvt.f32.s32 %v8514_v56  ;;  %v3271_v41 = vcvt.f32.s32 %v8524_v54  ;;  %v3182_v59 = vshll.u32 %v3181_v10, 16  ;;  %v3286_v56 = vcvt.f32.s32 %v8537_v48 }
 0xd2d   :  { %v3167_v19 = vshll.u32 %v3166_v35, 16  ;;  %v3212_v36 = vshll.u32 %v3211_v37, 16  ;;  %v8651_v22 = vshll.u32 %v3301_v46, 16  ;;  %v3331_v10 = vcvt.f32.s32 %v8544_v39 }
 0xd2e   :  { %v3242_v6 = vshll.u32 %v3241_v28, 16  ;;  %v3272_v55 = vshll.u32 %v3271_v41, 16  ;;  %v8653_v17 = vshll.u32 %v3286_v56, 16  ;;  %v3316_v35 = vcvt.f32.s32 %v8547_v26 }
 0xd9c   :  { %v3179_v30 = vpop.xlane.xlu1 %3178 }
 0xd9d   :  { %v3180_v21 = vcvt.f32.s32 %v3179_v30  ;;  %v3164_v32 = vpop.xlane.xlu0 %3163 }
 0xd9e   :  { %v3165_v34 = vcvt.f32.s32 %v3164_v32 }
 0xd9f   :  { %v3183_v54 = vadd.s32 %v3182_v59, %v3180_v21  ;;  %v3317_v59 = vshll.u32 %v3316_v35, 16 }
 0xda0   :  { %v3168_v38 = vadd.s32 %v3167_v19, %v3165_v34  ;;  %v3209_v2 = vpop.xlane.xlu1 %3208  ;;  %v3361_v34 = vcvt.f32.s32 %v8554_v15 }
 0xda1   :  { %vm3396_vm9 = vcmp.lt.s32.totalorder %v3183_v54, 63  ;;  %v3210_v8 = vcvt.f32.s32 %v3209_v2  ;;  %v3194_v14 = vpop.xlane.xlu0 %3193 }
 0xda2   :  { %v3397_v50 = vsel %vm3396_vm9, %v3183_v54, 63  ;;  %vm3394_vm10 = vcmp.lt.s32.totalorder %v3168_v38, 63  ;;  %v3195_v48 = vcvt.f32.s32 %v3194_v14 }
 0xda3   :  { %vm3427_vm11 = vcmp.eq.s32.totalorder %v6971_v20, %v3397_v50  ;;  %v8657_v52 = vsel %vm5528_vm8, %v5513_v3, %v3397_v50  ;;  %v3213_v13 = vadd.s32 %v3212_v36, %v3210_v8  ;;  %v3395_v16 = vsel %vm3394_vm10, %v3168_v38, 63 }
 0xda4   :  { %v3198_v62 = vadd.s32 %v3197_v58, %v3195_v48  ;;  %v3239_v11 = vpop.xlane.xlu1 %3238  ;;  %vm3426_vm12 = vcmp.eq.s32.totalorder %v6971_v20, %v3395_v16  ;;  %v8662_v18 = vsel %vm5528_vm8, %v5512_v47, %v3395_v16  ;;  %v5871_v3 = vsel %vm3427_vm11, 1.0, %v10559_v29 }
 0xda5   :  { %vm3400_vm13 = vcmp.lt.s32.totalorder %v3213_v13, 63  ;;  %v3240_v9 = vcvt.f32.s32 %v3239_v11  ;;  %v3224_v7 = vpop.xlane.xlu0 %3223  ;;  %v5870_v37 = vsel %vm3426_vm12, 1.0, %v10559_v29  ;;  %v3332_v47 = vshll.u32 %v3331_v10, 16 }
 0xda6   :  { %vm3398_vm14 = vcmp.lt.s32.totalorder %v3198_v62, 63  ;;  %v3225_v27 = vcvt.f32.s32 %v3224_v7  ;;  %6547 = vmatprep.mubr.msk.f32.mxu1 %vm448_vm2, %v5870_v37  ;;  %v3401_v39 = vsel %vm3400_vm13, %v3213_v13, 63  ;;  %v3362_v8 = vshll.u32 %v3361_v34, 16 }
 0xda7   :  { %v3243_v57 = vadd.s32 %v3242_v6, %v3240_v9  ;;  %6548 = vmatmul.mubr.msk.f32.vlgmr.msra.gmra.mrb[80].mxu1 %vm448_vm2, %v5871_v3  ;;  %v3399_v28 = vsel %vm3398_vm14, %v3198_v62, 63  ;;  %vm3429_vm15 = vcmp.eq.s32.totalorder %v6971_v20, %v3401_v39  ;;  %v8672_v26 = vsel %vm5528_vm8, %v8589_v43, %v3401_v39 }
 0xda8   :  { %v3228_v5 = vadd.s32 %v3227_v44, %v3225_v27  ;;  %v3269_v41 = vpop.xlane.xlu1 %3268  ;;  %vm3428_vm3 = vcmp.eq.s32.totalorder %v6971_v20, %v3399_v28  ;;  %v8677_v30 = vsel %vm5528_vm8, %v8584_v45, %v3399_v28  ;;  %v5873_v43 = vsel %vm3429_vm15, 1.0, %v10559_v29 }
 0xda9   :  { %vm3404_vm4 = vcmp.lt.s32.totalorder %v3243_v57, 63  ;;  %v3270_v61 = vcvt.f32.s32 %v3269_v41  ;;  %v3254_v46 = vpop.xlane.xlu0 %3253  ;;  %v5872_v21 = vsel %vm3428_vm3, 1.0, %v10559_v29  ;;  %v3346_v6 = vcvt.f32.s32 %v8557_v49 }
 0xdaa   :  { %vm3402_vm5 = vcmp.lt.s32.totalorder %v3228_v5, 63  ;;  %v3255_v32 = vcvt.f32.s32 %v3254_v46  ;;  %6550 = vmatprep.mubr.msk.f32.mxu1 %vm448_vm2, %v5872_v21  ;;  %v3405_v1 = vsel %vm3404_vm4, %v3243_v57, 63  ;;  %v3391_v9 = vcvt.f32.s32 %v8564_v42 }
 0xdab   :  { %v3273_v19 = vadd.s32 %v3272_v55, %v3270_v61  ;;  %6551 = vmatmul.mubr.msk.f32.gmra.mrb[82].mxu1 %vm448_vm2, %v5873_v43  ;;  %v3403_v56 = vsel %vm3402_vm5, %v3228_v5, 63  ;;  %vm3431_vm6 = vcmp.eq.s32.totalorder %v6971_v20, %v3405_v1  ;;  %v8686_v45 = vsel %vm5528_vm8, %v8599_v12, %v3405_v1 }
 0xdac   :  { %10634 = vst [vmem:[#allocation18_spill] sm:$0xff] %v8686_v45  ;;  %v3258_v36 = vadd.s32 %v3257_v4, %v3255_v32  ;;  %v3299_v58 = vpop.xlane.xlu1 %3298  ;;  %vm3430_vm9 = vcmp.eq.s32.totalorder %v6971_v20, %v3403_v56  ;;  %v8692_v54 = vsel %vm5528_vm8, %v8594_v24, %v3403_v56  ;;  %v5875_v15 = vsel %vm3431_vm6, 1.0, %v10559_v29 }
 0xdad   :  { %10635 = vst [vmem:[#allocation20_spill] sm:$0xff] %v8692_v54  ;;  %vm3408_vm10 = vcmp.lt.s32.totalorder %v3273_v19, 63  ;;  %v3300_v44 = vcvt.f32.s32 %v3299_v58  ;;  %v3284_v55 = vpop.xlane.xlu0 %3283  ;;  %v5874_v38 = vsel %vm3430_vm9, 1.0, %v10559_v29  ;;  %v3376_v27 = vcvt.f32.s32 %v8566_v25 }
 0xdae   :  { %vm3406_vm11 = vcmp.lt.s32.totalorder %v3258_v36, 63  ;;  %v3285_v12 = vcvt.f32.s32 %v3284_v55  ;;  %6553 = vmatprep.mubr.msk.f32.mxu1 %vm448_vm2, %v5874_v38  ;;  %v3409_v2 = vsel %vm3408_vm10, %v3273_v19, 63  ;;  %v10644_v55 = vld [vmem:[#allocation28_spill] sm:$0xff] }
 0xdaf   :  { %v3303_v4 = vadd.s32 %v8651_v22, %v3300_v44  ;;  %6554 = vmatmul.mubr.msk.f32.gmra.mrb[84].mxu1 %vm448_vm2, %v5875_v15  ;;  %v3407_v24 = vsel %vm3406_vm11, %v3258_v36, 63  ;;  %vm3433_vm12 = vcmp.eq.s32.totalorder %v6971_v20, %v3409_v2  ;;  %v8703_v49 = vsel %vm5528_vm8, %v8604_v31, %v3409_v2  ;;  %v10645_v15 = vld [vmem:[#allocation77_spill] sm:$0xff]  ;;  %v10646_v2 = vld [vmem:[#allocation27_spill] sm:$0xff] }
 0xdb0   :  { %10636 = vst [vmem:[#allocation19_spill] sm:$0xff] %v8703_v49  ;;  %v3288_v14 = vadd.s32 %v8653_v17, %v3285_v12  ;;  %v3329_v50 = vpop.xlane.xlu1 %3328  ;;  %vm3432_vm13 = vcmp.eq.s32.totalorder %v6971_v20, %v3407_v24  ;;  %v8709_v48 = vsel %vm5528_vm8, %v8610_v63, %v3407_v24  ;;  %v3347_v22 = vshll.u32 %v3346_v6, 16 }
 0xdb1   :  { %10637 = vst [vmem:[#allocation21_spill] sm:$0xff] %v8709_v48  ;;  %vm3412_vm14 = vcmp.lt.s32.totalorder %v3303_v4, 63  ;;  %v3330_v13 = vcvt.f32.s32 %v3329_v50  ;;  %v3314_v16 = vpop.xlane.xlu0 %3313  ;;  %v5876_v10 = vsel %vm3432_vm13, 1.0, %v10559_v29  ;;  %v5877_v31 = vsel %vm3433_vm12, 1.0, %v10559_v29  ;;  %v5923_v50 = vld [vmem:[%s10248_s1 + $0x18] sm:$0xff] }
 0xdb2   :  { %vm3410_vm15 = vcmp.lt.s32.totalorder %v3288_v14, 63  ;;  %v3315_v62 = vcvt.f32.s32 %v3314_v16  ;;  %6556 = vmatprep.mubr.msk.f32.mxu1 %vm448_vm2, %v5876_v10  ;;  %v3413_v17 = vsel %vm3412_vm14, %v3303_v4, 63  ;;  %v3377_v21 = vshll.u32 %v3376_v27, 16  ;;  %6597 = vmatprep.subr.msk.mxu1 %vm56_vm0, %v5923_v50 }
 0xdb3   :  { %v3333_v11 = vadd.s32 %v3332_v47, %v3330_v13  ;;  %6557 = vmatmul.mubr.msk.f32.gmra.mrb[86].mxu1 %vm448_vm2, %v5877_v31  ;;  %v3411_v35 = vsel %vm3410_vm15, %v3288_v14, 63  ;;  %vm3435_vm3 = vcmp.eq.s32.totalorder %v6971_v20, %v3413_v17  ;;  %v8718_v63 = vsel %vm5528_vm8, %v8620_v53, %v3413_v17 }
 0xdb4   :  { %10638 = vst [vmem:[#allocation22_spill] sm:$0xff] %v8718_v63  ;;  %v3318_v7 = vadd.s32 %v3317_v59, %v3315_v62  ;;  %v3359_v37 = vpop.xlane.xlu1 %3358  ;;  %vm3434_vm4 = vcmp.eq.s32.totalorder %v6971_v20, %v3411_v35  ;;  %v8724_v3 = vsel %vm5528_vm8, %v8615_v60, %v3411_v35  ;;  %v5879_v42 = vsel %vm3435_vm3, 1.0, %v10559_v29  ;;  %6598 = vmatpush3.xpose.msk.msra.mxu1 %vm56_vm0, %v5923_v50 }
 0xdb5   :  { %10639 = vst [vmem:[#allocation23_spill] sm:$0xff] %v8724_v3  ;;  %vm3416_vm5 = vcmp.lt.s32.totalorder %v3333_v11, 63  ;;  %v3360_v39 = vcvt.f32.s32 %v3359_v37  ;;  %v3344_v57 = vpop.xlane.xlu0 %3343  ;;  %v5878_v28 = vsel %vm3434_vm4, 1.0, %v10559_v29  ;;  %v3392_v60 = vshll.u32 %v3391_v9, 16 }
 0xdb6   :  { %vm3414_vm6 = vcmp.lt.s32.totalorder %v3318_v7, 63  ;;  %v3345_v53 = vcvt.f32.s32 %v3344_v57  ;;  %6559 = vmatprep.mubr.msk.f32.mxu1 %vm448_vm2, %v5878_v28  ;;  %v3417_v47 = vsel %vm3416_vm5, %v3333_v11, 63  ;;  %v5527_v38 = vsel %vm5511_vm7, %v10644_v55, %v8012_v33 }
 0xdb7   :  { %v3363_v5 = vadd.s32 %v3362_v8, %v3360_v39  ;;  %6560 = vmatmul.mubr.msk.f32.gmra.mrb[88].mxu1 %vm448_vm2, %v5879_v42  ;;  %v3415_v41 = vsel %vm3414_vm6, %v3318_v7, 63  ;;  %vm3437_vm9 = vcmp.eq.s32.totalorder %v6971_v20, %v3417_v47  ;;  %v8734_v25 = vsel %vm5528_vm8, %v8631_v40, %v3417_v47  ;;  %v8852_v42 = vld [vmem:[%s10254_s6 + $0x2] ss:$0 sm:$0xff] }
 0xdb8   :  { %10640 = vst [vmem:[#allocation24_spill] sm:$0xff] %v8734_v25  ;;  %v3348_v59 = vadd.s32 %v3347_v22, %v3345_v53  ;;  %v3389_v61 = vpop.xlane.xlu1 %3388  ;;  %vm3436_vm10 = vcmp.eq.s32.totalorder %v6971_v20, %v3415_v41  ;;  %v8739_v46 = vsel %vm5528_vm8, %v8626_v23, %v3415_v41  ;;  %v5881_v40 = vsel %vm3437_vm9, 1.0, %v10559_v29  ;;  %v5943_v53 = vld [vmem:[%s10250_s3 + $0x18] sm:$0xff]  ;;  %v10650_v41 = vld [vmem:[#allocation94_spill] sm:$0xff] }
 0xdb9   :  { %10641 = vst [vmem:[#allocation26_spill] sm:$0xff] %v8739_v46  ;;  %vm3420_vm11 = vcmp.lt.s32.totalorder %v3363_v5, 63  ;;  %v3390_v32 = vcvt.f32.s32 %v3389_v61  ;;  %v3374_v43 = vpop.xlane.xlu0 %3373  ;;  %v5880_v1 = vsel %vm3436_vm10, 1.0, %v10559_v29  ;;  %v5526_v4 = vsel %vm5511_vm7, %v10646_v2, %v10645_v15  ;;  %6623 = vmatprep.subr.mxu0 %v5943_v53  ;;  %v10659_v2 = vld [vmem:[#allocation48_spill] sm:$0xff] }
 0xdba   :  { %vm3418_vm12 = vcmp.lt.s32.totalorder %v3348_v59, 63  ;;  %v3375_v19 = vcvt.f32.s32 %v3374_v43  ;;  %6562 = vmatprep.mubr.msk.f32.mxu1 %vm448_vm2, %v5880_v1  ;;  %v3421_v56 = vsel %vm3420_vm11, %v3363_v5, 63  ;;  %v10649_v5 = vld [vmem:[#allocation45_spill] sm:$0xff] }
 0xdbb   :  { %v3393_v34 = vadd.s32 %v3392_v60, %v3390_v32  ;;  %6563 = vmatmul.mubr.msk.f32.gmra.mrb[90].mxu1 %vm448_vm2, %v5881_v40  ;;  %v3419_v36 = vsel %vm3418_vm12, %v3348_v59, 63  ;;  %vm3439_vm13 = vcmp.eq.s32.totalorder %v6971_v20, %v3421_v56  ;;  %v8748_v23 = vsel %vm5528_vm8, %v8638_v51, %v3421_v56  ;;  %v10652_v32 = vld [vmem:[#allocation95_spill] sm:$0xff]  ;;  %v10655_v56 = vld [vmem:[#allocation96_spill] sm:$0xff] }
 0xdbc   :  { %10642 = vst [vmem:[#allocation25_spill] sm:$0xff] %v8748_v23  ;;  %v3378_v58 = vadd.s32 %v3377_v21, %v3375_v19  ;;  %vm3438_vm14 = vcmp.eq.s32.totalorder %v6971_v20, %v3419_v36  ;;  %v8753_v6 = vsel %vm5528_vm8, %v8648_v0, %v3419_v36  ;;  %v5883_v51 = vsel %vm3439_vm13, 1.0, %v10559_v29  ;;  %v10651_v21 = vld [vmem:[#allocation46_spill] sm:$0xff] }
 0xdbd   :  { %10643 = vst [vmem:[#allocation142_spill] sm:$0xff] %v8753_v6  ;;  %vm3424_vm15 = vcmp.lt.s32.totalorder %v3393_v34, 63  ;;  %v5882_v44 = vsel %vm3438_vm14, 1.0, %v10559_v29  ;;  %v2642_v60 = vadd.f32 %v10650_v41, %v10649_v5  ;;  %v2641_v43 = vadd.f32 %v10652_v32, %v10651_v21  ;;  %v10664_v41 = vld [vmem:[#allocation49_spill] sm:$0xff] }
 0xdbe   :  { %vm3422_vm3 = vcmp.lt.s32.totalorder %v3378_v58, 63  ;;  %6565 = vmatprep.mubr.msk.f32.mxu1 %vm448_vm2, %v5882_v44  ;;  %v3425_v12 = vsel %vm3424_vm15, %v3393_v34, 63  ;;  %v10657_v44 = vld [vmem:[#allocation98_spill] sm:$0xff] }
 0xdbf   :  { %6566 = vmatmul.mubr.msk.f32.gmra.mrb[92].mxu1 %vm448_vm2, %v5883_v51  ;;  %v3423_v0 = vsel %vm3422_vm3, %v3378_v58, 63  ;;  %vm3441_vm4 = vcmp.eq.s32.totalorder %v6971_v20, %v3425_v12  ;;  %v8767_v24 = vsel %vm5528_vm8, %v5527_v38, %v3425_v12  ;;  %v10656_v58 = vld [vmem:[#allocation47_spill] sm:$0xff]  ;;  %v10658_v38 = vld [vmem:[#allocation97_spill] sm:$0xff] }
 0xdc0   :  { %10647 = vst [vmem:[#allocation28_spill] sm:$0xff] %v8767_v24  ;;  %vm3440_vm5 = vcmp.eq.s32.totalorder %v6971_v20, %v3423_v0  ;;  %v8771_v33 = vsel %vm5528_vm8, %v5526_v4, %v3423_v0  ;;  %v5885_v14 = vsel %vm3441_vm4, 1.0, %v10559_v29  ;;  %v2644_v55 = vadd.f32 %v10657_v44, %v10656_v58  ;;  %v10660_v4 = vld [vmem:[#allocation99_spill] sm:$0xff] }
 0xdc1   :  { %10648 = vst [vmem:[#allocation77_spill] sm:$0xff] %v8771_v33  ;;  %v5884_v8 = vsel %vm3440_vm5, 1.0, %v10559_v29  ;;  %v2643_v0 = vadd.f32 %v10660_v4, %v10659_v2  ;;  %v10674_v4 = vld [vmem:[#allocation105_spill] sm:$0xff] }
 0xdc2   :  { %6568 = vmatprep.mubr.msk.f32.mxu1 %vm448_vm2, %v5884_v8 }
 0xdc3   :  { %6569 = vmatmul.mubr.msk.f32.gmra.mrb[94].mxu1 %vm448_vm2, %v5885_v14 }
 0xe7a   :  { %v8782_v22 = vpop.f32.mrb[80].mxu1 }
 0xe7b   :  { %v8784_v13 = vpop.f32.mrb[81].mxu1 }
 0xe7c   :  { %6573 = vmatprep.mubr.msk.f32.mxu0 %vm254_vm1, %v8784_v13 }
 0xe7d   :  { %6574 = vmatmul.mubr.msk.f32.vlgmr.msra.gmra.mrb[80].mxu0 %vm254_vm1, %v8782_v22 }
 0xe7e   :  { %v8790_v16 = vpop.f32.mrb[82].mxu1  ;;  %6624 = vmatpush3.msra.mxu0 %v5943_v53  ;;  %v10663_v53 = vld [vmem:[#allocation100_spill] sm:$0xff] }
 0xe7f   :  { %v8792_v10 = vpop.f32.mrb[83].mxu1 }
 0xe80   :  { %6576 = vmatprep.mubr.msk.f32.mxu0 %vm254_vm1, %v8792_v10 }
 0xe81   :  { %6577 = vmatmul.mubr.msk.f32.gmra.mrb[82].mxu0 %vm254_vm1, %v8790_v16 }
 0xe82   :  { %v8798_v62 = vpop.f32.mrb[84].mxu1 }
 0xe83   :  { %v8800_v31 = vpop.f32.mrb[85].mxu1 }
 0xe84   :  { %6579 = vmatprep.mubr.msk.f32.mxu0 %vm254_vm1, %v8800_v31 }
 0xe85   :  { %6580 = vmatmul.mubr.msk.f32.gmra.mrb[84].mxu0 %vm254_vm1, %v8798_v62 }
 0xe86   :  { %v8806_v17 = vpop.f32.mrb[86].mxu1 }
 0xe87   :  { %v8808_v11 = vpop.f32.mrb[87].mxu1 }
 0xe88   :  { %6582 = vmatprep.mubr.msk.f32.mxu0 %vm254_vm1, %v8808_v11 }
 0xe89   :  { %6583 = vmatmul.mubr.msk.f32.gmra.mrb[86].mxu0 %vm254_vm1, %v8806_v17 }
 0xe8a   :  { %v8814_v35 = vpop.f32.mrb[88].mxu1 }
 0xe8b   :  { %v8816_v9 = vpop.f32.mrb[89].mxu1 }
 0xe8c   :  { %6585 = vmatprep.mubr.msk.f32.mxu0 %vm254_vm1, %v8816_v9 }
 0xe8d   :  { %6586 = vmatmul.mubr.msk.f32.gmra.mrb[88].mxu0 %vm254_vm1, %v8814_v35 }
 0xe8e   :  { %v8822_v7 = vpop.f32.mrb[90].mxu1 }
 0xe8f   :  { %v8824_v37 = vpop.f32.mrb[91].mxu1 }
 0xe90   :  { %6588 = vmatprep.mubr.msk.f32.mxu0 %vm254_vm1, %v8824_v37 }
 0xe91   :  { %6589 = vmatmul.mubr.msk.f32.gmra.mrb[90].mxu0 %vm254_vm1, %v8822_v7 }
 0xe92   :  { %v8830_v27 = vpop.f32.mrb[92].mxu1 }
 0xe93   :  { %v8832_v39 = vpop.f32.mrb[93].mxu1 }
 0xe94   :  { %6591 = vmatprep.mubr.msk.f32.mxu0 %vm254_vm1, %v8832_v39 }
 0xe95   :  { %6592 = vmatmul.mubr.msk.f32.gmra.mrb[92].mxu0 %vm254_vm1, %v8830_v27 }
 0xe96   :  { %v8838_v57 = vpop.f32.mrb[94].mxu1 }
 0xe97   :  { %v8840_v28 = vpop.f32.mrb[95].mxu1 }
 0xe98   :  { %6594 = vmatprep.mubr.msk.f32.mxu0 %vm254_vm1, %v8840_v28 }
 0xe99   :  { %6595 = vmatmul.mubr.msk.f32.gmra.mrb[94].mxu0 %vm254_vm1, %v8838_v57 }
 0xf50   :  { %v6575_v47 = vpop.f32.mrb[80].mxu0 }
 0xf51   :  { %v3882_v59 = vadd.f32 %v6575_v47, %v8852_v42  ;;  %v3876_v61 = vpop.f32.mrb[81].mxu0 }
 0xf52   :  { %v3877_v1 = vadd.f32 %v8852_v42, %v3876_v61  ;;  %v10666_v61 = vld [vmem:[#allocation101_spill] sm:$0xff] }
 0xf53   :  { %v8860_v19 = vadd.f32 %v3882_v59, %v2642_v60  ;;  %v3972_v51 = vsub.f32 %v10658_v38, %v3882_v59  ;;  %v10665_v60 = vld [vmem:[#allocation102_spill] sm:$0xff] }
 0xf54   :  { %v8862_v40 = vadd.f32 %v3877_v1, %v2641_v43  ;;  %v3971_v34 = vsub.f32 %v10655_v56, %v3877_v1  ;;  %v6578_v36 = vpop.f32.mrb[82].mxu0  ;;  %v2646_v59 = vadd.f32 %v10665_v60, %v10664_v41  ;;  %v10667_v1 = vld [vmem:[#allocation50_spill] sm:$0xff]  ;;  %v10668_v56 = vld [vmem:[#allocation103_spill] sm:$0xff] }
 0xf55   :  { %10653 = vst [vmem:[#allocation27_spill] sm:$0xff] %v8860_v19  ;;  %v3892_v12 = vadd.f32 %v6578_v36, %v8852_v42  ;;  %v3886_v15 = vpop.f32.mrb[83].mxu0  ;;  %v10676_v41 = vld [vmem:[#allocation107_spill] sm:$0xff] }
 0xf56   :  { %10654 = vst [vmem:[#allocation45_spill] sm:$0xff] %v8862_v40  ;;  %v3887_v8 = vadd.f32 %v8852_v42, %v3886_v15  ;;  %6599 = vmatprep.mubr.msk.f32.mxu1 %vm56_vm0, %v3971_v34  ;;  %v2645_v34 = vadd.f32 %v10668_v56, %v10667_v1  ;;  %v10673_v15 = vld [vmem:[#allocation106_spill] sm:$0xff] }
 0xf57   :  { %v8873_v14 = vadd.f32 %v3892_v12, %v2644_v55  ;;  %6600 = vmatmul.mubr.msk.f32.vlgmr.msra.gmra.mrb[96].mxu1 %vm56_vm0, %v3972_v51  ;;  %v3974_v21 = vsub.f32 %v10666_v61, %v3892_v12  ;;  %v10671_v55 = vld [vmem:[#allocation104_spill] sm:$0xff]  ;;  %v10672_v12 = vld [vmem:[#allocation51_spill] sm:$0xff]  ;;  %v10681_v56 = vld [vmem:[#allocation110_spill] sm:$0xff] }
 0xf58   :  { %v8876_v50 = vadd.f32 %v3887_v8, %v2643_v0  ;;  %v3973_v47 = vsub.f32 %v10663_v53, %v3887_v8  ;;  %v6581_v5 = vpop.f32.mrb[84].mxu0  ;;  %v2648_v2 = vadd.f32 %v10673_v15, %v10672_v12  ;;  %v10683_v15 = vld [vmem:[#allocation54_spill] sm:$0xff] }
 0xf59   :  { %10661 = vst [vmem:[#allocation94_spill] sm:$0xff] %v8873_v14  ;;  %v3902_v32 = vadd.f32 %v6581_v5, %v8852_v42  ;;  %v3896_v43 = vpop.f32.mrb[85].mxu0  ;;  %v10675_v5 = vld [vmem:[#allocation52_spill] sm:$0xff] }
 0xf5a   :  { %10662 = vst [vmem:[#allocation46_spill] sm:$0xff] %v8876_v50  ;;  %v3897_v36 = vadd.f32 %v8852_v42, %v3896_v43  ;;  %6602 = vmatprep.mubr.msk.f32.mxu1 %vm56_vm0, %v3973_v47  ;;  %v2647_v47 = vadd.f32 %v10676_v41, %v10675_v5  ;;  %v10687_v5 = vld [vmem:[#allocation112_spill] sm:$0xff] }
 0xf5b   :  { %v8887_v58 = vadd.f32 %v3902_v32, %v2646_v59  ;;  %6603 = vmatmul.mubr.msk.f32.gmra.mrb[98].mxu1 %vm56_vm0, %v3974_v21  ;;  %v3976_v0 = vsub.f32 %v10674_v4, %v3902_v32  ;;  %v10679_v21 = vld [vmem:[#allocation108_spill] sm:$0xff]  ;;  %v10680_v32 = vld [vmem:[#allocation53_spill] sm:$0xff]  ;;  %v10684_v4 = vld [vmem:[#allocation111_spill] sm:$0xff] }
 0xf5c   :  { %v8890_v44 = vadd.f32 %v3897_v36, %v2645_v34  ;;  %v3975_v38 = vsub.f32 %v10671_v55, %v3897_v36  ;;  %v6584_v51 = vpop.f32.mrb[86].mxu0  ;;  %v2650_v34 = vadd.f32 %v10681_v56, %v10680_v32  ;;  %v10682_v36 = vld [vmem:[#allocation109_spill] sm:$0xff] }
 0xf5d   :  { %10669 = vst [vmem:[#allocation95_spill] sm:$0xff] %v8887_v58  ;;  %v3912_v8 = vadd.f32 %v6584_v51, %v8852_v42  ;;  %v3906_v53 = vpop.f32.mrb[87].mxu0 }
 0xf5e   :  { %10670 = vst [vmem:[#allocation96_spill] sm:$0xff] %v8890_v44  ;;  %v3907_v60 = vadd.f32 %v8852_v42, %v3906_v53  ;;  %6605 = vmatprep.mubr.msk.f32.mxu1 %vm56_vm0, %v3975_v38  ;;  %v2649_v38 = vadd.f32 %v10684_v4, %v10683_v15  ;;  %v10692_v15 = vld [vmem:[#allocation115_spill] sm:$0xff] }
 0xf5f   :  { %v8901_v59 = vadd.f32 %v3912_v8, %v2648_v2  ;;  %6606 = vmatmul.mubr.msk.f32.gmra.mrb[100].mxu1 %vm56_vm0, %v3976_v0  ;;  %v3978_v55 = vsub.f32 %v10682_v36, %v3912_v8  ;;  %v10688_v8 = vld [vmem:[#allocation55_spill] sm:$0xff] }
 0xf60   :  { %v8904_v61 = vadd.f32 %v3907_v60, %v2647_v47  ;;  %v3977_v43 = vsub.f32 %v10679_v21, %v3907_v60  ;;  %v6587_v1 = vpop.f32.mrb[88].mxu0  ;;  %v10689_v60 = vld [vmem:[#allocation114_spill] sm:$0xff] }
 0xf61   :  { %10677 = vst [vmem:[#allocation47_spill] sm:$0xff] %v8901_v59  ;;  %v3922_v51 = vadd.f32 %v6587_v1, %v8852_v42  ;;  %v3916_v12 = vpop.f32.mrb[89].mxu0  ;;  %v2652_v21 = vadd.f32 %v10689_v60, %v10688_v8  ;;  %v10690_v1 = vld [vmem:[#allocation113_spill] sm:$0xff]  ;;  %v10697_v8 = vld [vmem:[#allocation118_spill] sm:$0xff] }
 0xf62   :  { %10678 = vst [vmem:[#allocation98_spill] sm:$0xff] %v8904_v61  ;;  %v3917_v2 = vadd.f32 %v8852_v42, %v3916_v12  ;;  %6608 = vmatprep.mubr.msk.f32.mxu1 %vm56_vm0, %v3977_v43  ;;  %v10691_v12 = vld [vmem:[#allocation56_spill] sm:$0xff]  ;;  %v10698_v60 = vld [vmem:[#allocation117_spill] sm:$0xff] }
 0xf63   :  { %v8915_v0 = vadd.f32 %v3922_v51, %v2650_v34  ;;  %6609 = vmatmul.mubr.msk.f32.gmra.mrb[102].mxu1 %vm56_vm0, %v3978_v55  ;;  %v3980_v32 = vsub.f32 %v10690_v1, %v3922_v51  ;;  %v2651_v43 = vadd.f32 %v10692_v15, %v10691_v12  ;;  %v10696_v51 = vld [vmem:[#allocation57_spill] sm:$0xff] }
 0xf64   :  { %v8918_v53 = vadd.f32 %v3917_v2, %v2649_v38  ;;  %v3979_v41 = vsub.f32 %v10687_v5, %v3917_v2  ;;  %v6590_v47 = vpop.f32.mrb[90].mxu0  ;;  %v10695_v38 = vld [vmem:[#allocation116_spill] sm:$0xff] }
 0xf65   :  { %10685 = vst [vmem:[#allocation97_spill] sm:$0xff] %v8915_v0  ;;  %v3932_v56 = vadd.f32 %v6590_v47, %v8852_v42  ;;  %v3926_v36 = vpop.f32.mrb[91].mxu0  ;;  %v2654_v47 = vadd.f32 %v10697_v8, %v10696_v51  ;;  %v10705_v8 = vld [vmem:[#allocation122_spill] sm:$0xff] }
 0xf66   :  { %10686 = vst [vmem:[#allocation48_spill] sm:$0xff] %v8918_v53  ;;  %v3927_v34 = vadd.f32 %v8852_v42, %v3926_v36  ;;  %6611 = vmatprep.mubr.msk.f32.mxu1 %vm56_vm0, %v3979_v41  ;;  %v10699_v36 = vld [vmem:[#allocation58_spill] sm:$0xff]  ;;  %v10700_v53 = vld [vmem:[#allocation119_spill] sm:$0xff] }
 0xf67   :  { %v8929_v55 = vadd.f32 %v3932_v56, %v2652_v21  ;;  %6612 = vmatmul.mubr.msk.f32.gmra.mrb[104].mxu1 %vm56_vm0, %v3980_v32  ;;  %v3982_v1 = vsub.f32 %v10698_v60, %v3932_v56  ;;  %v2653_v41 = vadd.f32 %v10700_v53, %v10699_v36  ;;  %v10704_v56 = vld [vmem:[#allocation59_spill] sm:$0xff]  ;;  %v10706_v60 = vld [vmem:[#allocation121_spill] sm:$0xff] }
 0xf68   :  { %v8932_v4 = vadd.f32 %v3927_v34, %v2651_v43  ;;  %v3981_v2 = vsub.f32 %v10695_v38, %v3927_v34  ;;  %v6593_v5 = vpop.f32.mrb[92].mxu0  ;;  %v10703_v34 = vld [vmem:[#allocation120_spill] sm:$0xff] }
 0xf69   :  { %10693 = vst [vmem:[#allocation99_spill] sm:$0xff] %v8929_v55  ;;  %v3942_v12 = vadd.f32 %v6593_v5, %v8852_v42  ;;  %v3936_v15 = vpop.f32.mrb[93].mxu0  ;;  %v2656_v5 = vadd.f32 %v10705_v8, %v10704_v56  ;;  %v10708_v55 = vld [vmem:[#allocation123_spill] sm:$0xff]  ;;  %v10712_v56 = vld [vmem:[#allocation125_spill] sm:$0xff] }
 0xf6a   :  { %10694 = vst [vmem:[#allocation100_spill] sm:$0xff] %v8932_v4  ;;  %v3937_v21 = vadd.f32 %v8852_v42, %v3936_v15  ;;  %6614 = vmatprep.mubr.msk.f32.mxu1 %vm56_vm0, %v3981_v2  ;;  %v10707_v15 = vld [vmem:[#allocation60_spill] sm:$0xff] }
 0xf6b   :  { %v8943_v32 = vadd.f32 %v3942_v12, %v2654_v47  ;;  %6615 = vmatmul.mubr.msk.f32.gmra.mrb[106].mxu1 %vm56_vm0, %v3982_v1  ;;  %v3984_v4 = vsub.f32 %v10706_v60, %v3942_v12  ;;  %v2655_v2 = vadd.f32 %v10708_v55, %v10707_v15 }
 0xf6c   :  { %v8946_v43 = vadd.f32 %v3937_v21, %v2653_v41  ;;  %v3983_v38 = vsub.f32 %v10703_v34, %v3937_v21  ;;  %v6596_v51 = vpop.f32.mrb[94].mxu0  ;;  %v10711_v21 = vld [vmem:[#allocation124_spill] sm:$0xff] }
 0xf6d   :  { %10701 = vst [vmem:[#allocation49_spill] sm:$0xff] %v8943_v32  ;;  %v3952_v53 = vadd.f32 %v6596_v51, %v8852_v42  ;;  %v3946_v36 = vpop.f32.mrb[95].mxu0 }
 0xf6e   :  { %10702 = vst [vmem:[#allocation102_spill] sm:$0xff] %v8946_v43  ;;  %v3947_v47 = vadd.f32 %v8852_v42, %v3946_v36  ;;  %6617 = vmatprep.mubr.msk.f32.mxu1 %vm56_vm0, %v3983_v38  ;;  %v5925_v42 = vld [vmem:[%s10251_s2 + $0x3] ss:$0 sm:$0xff] }
 0xf6f   :  { %v8957_v1 = vadd.f32 %v3952_v53, %v2656_v5  ;;  %6618 = vmatmul.mubr.msk.f32.gmra.mrb[108].mxu1 %vm56_vm0, %v3984_v4  ;;  %v3986_v12 = vsub.f32 %v10712_v56, %v3952_v53 }
 0xf70   :  { %v8960_v41 = vadd.f32 %v3947_v47, %v2655_v2  ;;  %v3985_v34 = vsub.f32 %v10711_v21, %v3947_v47 }
 0xf71   :  { %10709 = vst [vmem:[#allocation101_spill] sm:$0xff] %v8957_v1 }
 0xf72   :  { %10710 = vst [vmem:[#allocation50_spill] sm:$0xff] %v8960_v41  ;;  %6620 = vmatprep.mubr.msk.f32.mxu1 %vm56_vm0, %v3985_v34 }
 0xf73   :  { %6621 = vmatmul.mubr.msk.f32.gmra.mrb[110].mxu1 %vm56_vm0, %v3986_v12 }
0x102a   :  { %v6601_v55 = vpop.f32.mrb[96].mxu1 }
0x102b   :  { %v4114_v38 = vpop.f32.mrb[97].mxu1  ;;  %v8971_v8 = vadd.f32 %v6601_v55, %v5925_v42 }
0x102c   :  { %v8969_v51 = vadd.f32 %v5925_v42, %v4114_v38 }
0x102d   :  { %10714 = vst [vmem:[#allocation104_spill] sm:$0xff] %v8971_v8 }
0x102e   :  { %10713 = vst [vmem:[#allocation103_spill] sm:$0xff] %v8969_v51  ;;  %v6604_v4 = vpop.f32.mrb[98].mxu1  ;;  %6625 = vmatprep.mubr.msk.f32.mxu0 %vm254_vm1, %v8969_v51 }
0x102f   :  { %v4124_v5 = vpop.f32.mrb[99].mxu1  ;;  %6626 = vmatmul.mubr.msk.f32.vlgmr.msra.gmra.mrb[96].mxu0 %vm254_vm1, %v8971_v8  ;;  %v8979_v53 = vadd.f32 %v6604_v4, %v5925_v42 }
0x1030   :  { %v8977_v60 = vadd.f32 %v5925_v42, %v4124_v5 }
0x1031   :  { %10716 = vst [vmem:[#allocation106_spill] sm:$0xff] %v8979_v53 }
0x1032   :  { %10715 = vst [vmem:[#allocation51_spill] sm:$0xff] %v8977_v60  ;;  %v6607_v36 = vpop.f32.mrb[100].mxu1  ;;  %6628 = vmatprep.mubr.msk.f32.mxu0 %vm254_vm1, %v8977_v60 }
0x1033   :  { %v4134_v15 = vpop.f32.mrb[101].mxu1  ;;  %6629 = vmatmul.mubr.msk.f32.gmra.mrb[98].mxu0 %vm254_vm1, %v8979_v53  ;;  %v8987_v47 = vadd.f32 %v6607_v36, %v5925_v42 }
0x1034   :  { %v8985_v2 = vadd.f32 %v5925_v42, %v4134_v15 }
0x1035   :  { %10718 = vst [vmem:[#allocation52_spill] sm:$0xff] %v8987_v47 }
0x1036   :  { %10717 = vst [vmem:[#allocation105_spill] sm:$0xff] %v8985_v2  ;;  %v6610_v21 = vpop.f32.mrb[102].mxu1  ;;  %6631 = vmatprep.mubr.msk.f32.mxu0 %vm254_vm1, %v8985_v2 }
0x1037   :  { %v4144_v34 = vpop.f32.mrb[103].mxu1  ;;  %6632 = vmatmul.mubr.msk.f32.gmra.mrb[100].mxu0 %vm254_vm1, %v8987_v47  ;;  %v8995_v12 = vadd.f32 %v6610_v21, %v5925_v42 }
0x1038   :  { %v8993_v56 = vadd.f32 %v5925_v42, %v4144_v34 }
0x1039   :  { %10720 = vst [vmem:[#allocation108_spill] sm:$0xff] %v8995_v12 }
0x103a   :  { %10719 = vst [vmem:[#allocation107_spill] sm:$0xff] %v8993_v56  ;;  %v6613_v55 = vpop.f32.mrb[104].mxu1  ;;  %6634 = vmatprep.mubr.msk.f32.mxu0 %vm254_vm1, %v8993_v56 }
0x103b   :  { %v4154_v38 = vpop.f32.mrb[105].mxu1  ;;  %6635 = vmatmul.mubr.msk.f32.gmra.mrb[102].mxu0 %vm254_vm1, %v8995_v12  ;;  %v9003_v5 = vadd.f32 %v6613_v55, %v5925_v42 }
0x103c   :  { %v9001_v4 = vadd.f32 %v5925_v42, %v4154_v38 }
0x103d   :  { %10722 = vst [vmem:[#allocation110_spill] sm:$0xff] %v9003_v5 }
0x103e   :  { %10721 = vst [vmem:[#allocation53_spill] sm:$0xff] %v9001_v4  ;;  %v6616_v36 = vpop.f32.mrb[106].mxu1  ;;  %6637 = vmatprep.mubr.msk.f32.mxu0 %vm254_vm1, %v9001_v4 }
0x103f   :  { %v4164_v15 = vpop.f32.mrb[107].mxu1  ;;  %6638 = vmatmul.mubr.msk.f32.gmra.mrb[104].mxu0 %vm254_vm1, %v9003_v5  ;;  %v9011_v34 = vadd.f32 %v6616_v36, %v5925_v42 }
0x1040   :  { %v9009_v21 = vadd.f32 %v5925_v42, %v4164_v15 }
0x1041   :  { %10724 = vst [vmem:[#allocation54_spill] sm:$0xff] %v9011_v34 }
0x1042   :  { %10723 = vst [vmem:[#allocation109_spill] sm:$0xff] %v9009_v21  ;;  %v6619_v41 = vpop.f32.mrb[108].mxu1  ;;  %6640 = vmatprep.mubr.msk.f32.mxu0 %vm254_vm1, %v9009_v21 }
0x1043   :  { %v4174_v38 = vpop.f32.mrb[109].mxu1  ;;  %6641 = vmatmul.mubr.msk.f32.gmra.mrb[106].mxu0 %vm254_vm1, %v9011_v34  ;;  %v9019_v1 = vadd.f32 %v6619_v41, %v5925_v42 }
0x1044   :  { %v9017_v55 = vadd.f32 %v5925_v42, %v4174_v38 }
0x1045   :  { %10726 = vst [vmem:[#allocation112_spill] sm:$0xff] %v9019_v1 }
0x1046   :  { %10725 = vst [vmem:[#allocation111_spill] sm:$0xff] %v9017_v55  ;;  %v6622_v43 = vpop.f32.mrb[110].mxu1  ;;  %6643 = vmatprep.mubr.msk.f32.mxu0 %vm254_vm1, %v9017_v55 }
0x1047   :  { %v4184_v15 = vpop.f32.mrb[111].mxu1  ;;  %6644 = vmatmul.mubr.msk.f32.gmra.mrb[108].mxu0 %vm254_vm1, %v9019_v1  ;;  %v9027_v32 = vadd.f32 %v6622_v43, %v5925_v42 }
0x1048   :  { %v9025_v36 = vadd.f32 %v5925_v42, %v4184_v15 }
0x1049   :  { %10728 = vst [vmem:[#allocation114_spill] sm:$0xff] %v9027_v32 }
0x104a   :  { %10727 = vst [vmem:[#allocation55_spill] sm:$0xff] %v9025_v36  ;;  %6646 = vmatprep.mubr.msk.f32.mxu0 %vm254_vm1, %v9025_v36 }
0x104b   :  { %6647 = vmatmul.mubr.msk.f32.gmra.mrb[110].mxu0 %vm254_vm1, %v9027_v32 }
0x1102   :  { %v6627_v41 = vpop.f32.mrb[96].mxu0 }
0x1103   :  { %v4309_v38 = vpop.f32.mrb[97].mxu0  ;;  %v4391_v0 = vsel %vm448_vm2, %v6627_v41, -inf }
0x1104   :  { %4392 = vmax.xlane.f32.xlu1 %v4391_v0  ;;  %v4388_v61 = vsel %vm448_vm2, %v4309_v38, -inf }
0x1105   :  { %4389 = vmax.xlane.f32.xlu0 %v4388_v61 }
0x1106   :  { %v6630_v59 = vpop.f32.mrb[98].mxu0 }
0x1107   :  { %v4319_v44 = vpop.f32.mrb[99].mxu0  ;;  %v4397_v15 = vsel %vm448_vm2, %v6630_v59, -inf }
0x1108   :  { %4398 = vmax.xlane.f32.xlu1 %v4397_v15  ;;  %v4394_v43 = vsel %vm448_vm2, %v4319_v44, -inf }
0x1109   :  { %4395 = vmax.xlane.f32.xlu0 %v4394_v43 }
0x110a   :  { %v9037_v42 = vpop.f32.mrb[100].mxu0 }
0x110b   :  { %v9039_v58 = vpop.f32.mrb[101].mxu0  ;;  %v4403_v50 = vsel %vm448_vm2, %v9037_v42, -inf }
0x110c   :  { %4404 = vmax.xlane.f32.xlu1 %v4403_v50  ;;  %v4400_v0 = vsel %vm448_vm2, %v9039_v58, -inf }
0x110d   :  { %4401 = vmax.xlane.f32.xlu0 %v4400_v0 }
0x110e   :  { %v9045_v61 = vpop.f32.mrb[102].mxu0 }
0x110f   :  { %v9047_v14 = vpop.f32.mrb[103].mxu0  ;;  %v4409_v15 = vsel %vm448_vm2, %v9045_v61, -inf }
0x1110   :  { %4410 = vmax.xlane.f32.xlu1 %v4409_v15  ;;  %v4406_v43 = vsel %vm448_vm2, %v9047_v14, -inf }
0x1111   :  { %4407 = vmax.xlane.f32.xlu0 %v4406_v43 }
0x1112   :  { %v9053_v40 = vpop.f32.mrb[104].mxu0 }
0x1113   :  { %v9055_v19 = vpop.f32.mrb[105].mxu0  ;;  %v4415_v50 = vsel %vm448_vm2, %v9053_v40, -inf }
0x1114   :  { %4416 = vmax.xlane.f32.xlu1 %v4415_v50  ;;  %v4412_v0 = vsel %vm448_vm2, %v9055_v19, -inf }
0x1115   :  { %4413 = vmax.xlane.f32.xlu0 %v4412_v0 }
0x1116   :  { %v9061_v36 = vpop.f32.mrb[106].mxu0 }
0x1117   :  { %v9063_v32 = vpop.f32.mrb[107].mxu0  ;;  %v4421_v15 = vsel %vm448_vm2, %v9061_v36, -inf }
0x1118   :  { %4422 = vmax.xlane.f32.xlu1 %v4421_v15  ;;  %v4418_v43 = vsel %vm448_vm2, %v9063_v32, -inf }
0x1119   :  { %4419 = vmax.xlane.f32.xlu0 %v4418_v43 }
0x111a   :  { %v9069_v1 = vpop.f32.mrb[108].mxu0 }
0x111b   :  { %v9071_v55 = vpop.f32.mrb[109].mxu0  ;;  %v4427_v50 = vsel %vm448_vm2, %v9069_v1, -inf }
0x111c   :  { %4428 = vmax.xlane.f32.xlu1 %v4427_v50  ;;  %v4424_v0 = vsel %vm448_vm2, %v9071_v55, -inf }
0x111d   :  { %4425 = vmax.xlane.f32.xlu0 %v4424_v0 }
0x111e   :  { %v9077_v34 = vpop.f32.mrb[110].mxu0 }
0x111f   :  { %v9079_v21 = vpop.f32.mrb[111].mxu0  ;;  %v4433_v15 = vsel %vm448_vm2, %v9077_v34, -inf }
0x1120   :  { %4434 = vmax.xlane.f32.xlu1 %v4433_v15  ;;  %v4430_v43 = vsel %vm448_vm2, %v9079_v21, -inf }
0x1121   :  { %4431 = vmax.xlane.f32.xlu0 %v4430_v43 }
0x1191   :  { %v4393_v5 = vpop.xlane.xlu1 %4392 }
0x1192   :  { %vm4437_vm6 = vcmp.eq.f32.partialorder %v6627_v41, %v4393_v5  ;;  %v4390_v4 = vpop.xlane.xlu0 %4389 }
0x1193   :  { %v4453_v50 = vsel %vm4437_vm6, %v6971_v20, 64  ;;  %vm4436_vm9 = vcmp.eq.f32.partialorder %v4309_v38, %v4390_v4 }
0x1194   :  { %v9087_v0 = vsel %vm448_vm2, %v4453_v50, 2147483647  ;;  %v4452_v12 = vsel %vm4436_vm9, %v6971_v20, 64 }
0x1195   :  { %v9091_v56 = vsel %vm448_vm2, %v4452_v12, 2147483647  ;;  %v4399_v47 = vpop.xlane.xlu1 %4398  ;;  %v4485_v15 = vshra.s32 %v9087_v0, 16 }
0x1196   :  { %vm4439_vm10 = vcmp.eq.f32.partialorder %v6630_v59, %v4399_v47  ;;  %v4396_v2 = vpop.xlane.xlu0 %4395  ;;  %v4470_v43 = vshra.s32 %v9091_v56, 16 }
0x1197   :  { %v4455_v5 = vsel %vm4439_vm10, %v6971_v20, 64  ;;  %vm4438_vm11 = vcmp.eq.f32.partialorder %v4319_v44, %v4396_v2  ;;  %v9096_v41 = vcvt.s32.f32 %v4485_v15 }
0x1198   :  { %v9099_v4 = vsel %vm448_vm2, %v4455_v5, 2147483647  ;;  %v4454_v38 = vsel %vm4438_vm11, %v6971_v20, 64  ;;  %v9102_v50 = vcvt.s32.f32 %v4470_v43 }
0x1199   :  { %v9105_v12 = vsel %vm448_vm2, %v4454_v38, 2147483647  ;;  %v4405_v53 = vpop.xlane.xlu1 %4404  ;;  %4488 = vmin.xlane.f32.xlu1 %v9096_v41  ;;  %v4515_v59 = vshra.s32 %v9099_v4, 16  ;;  %v4514_v63 = vand.u32 65535, %v9099_v4 }
0x119a   :  { %vm4441_vm12 = vcmp.eq.f32.partialorder %v9037_v42, %v4405_v53  ;;  %v4402_v44 = vpop.xlane.xlu0 %4401  ;;  %4473 = vmin.xlane.f32.xlu0 %v9102_v50  ;;  %v4500_v2 = vshra.s32 %v9105_v12, 16  ;;  %v4499_v54 = vand.u32 65535, %v9105_v12 }
0x119b   :  { %v4457_v47 = vsel %vm4441_vm12, %v6971_v20, 64  ;;  %vm4440_vm13 = vcmp.eq.f32.partialorder %v9039_v58, %v4402_v44  ;;  %v9114_v15 = vcvt.s32.f32 %v4515_v59 }
0x119c   :  { %v9117_v43 = vsel %vm448_vm2, %v4457_v47, 2147483647  ;;  %v4456_v5 = vsel %vm4440_vm13, %v6971_v20, 64  ;;  %v9120_v38 = vcvt.s32.f32 %v4500_v2 }
0x119d   :  { %v9123_v53 = vsel %vm448_vm2, %v4456_v5, 2147483647  ;;  %v4411_v42 = vpop.xlane.xlu1 %4410  ;;  %4518 = vmin.xlane.f32.xlu1 %v9114_v15  ;;  %v4545_v60 = vshra.s32 %v9117_v43, 16  ;;  %v4544_v4 = vand.u32 65535, %v9117_v43 }
0x119e   :  { %vm4443_vm14 = vcmp.eq.f32.partialorder %v9045_v61, %v4411_v42  ;;  %v4408_v58 = vpop.xlane.xlu0 %4407  ;;  %4503 = vmin.xlane.f32.xlu0 %v9120_v38  ;;  %v4530_v59 = vshra.s32 %v9123_v53, 16  ;;  %v4529_v12 = vand.u32 65535, %v9123_v53 }
0x119f   :  { %v4459_v44 = vsel %vm4443_vm14, %v6971_v20, 64  ;;  %vm4442_vm15 = vcmp.eq.f32.partialorder %v9047_v14, %v4408_v58  ;;  %v9132_v2 = vcvt.s32.f32 %v4545_v60 }
0x11a0   :  { %v9135_v47 = vsel %vm448_vm2, %v4459_v44, 2147483647  ;;  %v4458_v5 = vsel %vm4442_vm15, %v6971_v20, 64  ;;  %v9138_v8 = vcvt.s32.f32 %v4530_v59 }
0x11a1   :  { %v9141_v61 = vsel %vm448_vm2, %v4458_v5, 2147483647  ;;  %v4417_v42 = vpop.xlane.xlu1 %4416  ;;  %4548 = vmin.xlane.f32.xlu1 %v9132_v2  ;;  %v4575_v51 = vshra.s32 %v9135_v47, 16 }
0x11a2   :  { %vm4445_vm3 = vcmp.eq.f32.partialorder %v9053_v40, %v4417_v42  ;;  %v4414_v14 = vpop.xlane.xlu0 %4413  ;;  %4533 = vmin.xlane.f32.xlu0 %v9138_v8  ;;  %v4560_v60 = vshra.s32 %v9141_v61, 16 }
0x11a3   :  { %v4461_v58 = vsel %vm4445_vm3, %v6971_v20, 64  ;;  %vm4444_vm4 = vcmp.eq.f32.partialorder %v9055_v19, %v4414_v14  ;;  %v9150_v59 = vcvt.s32.f32 %v4575_v51 }
0x11a4   :  { %v9153_v44 = vsel %vm448_vm2, %v4461_v58, 2147483647  ;;  %v4460_v5 = vsel %vm4444_vm4, %v6971_v20, 64  ;;  %v9156_v33 = vcvt.s32.f32 %v4560_v60 }
0x11a5   :  { %v9159_v40 = vsel %vm448_vm2, %v4460_v5, 2147483647  ;;  %v4423_v42 = vpop.xlane.xlu1 %4422  ;;  %4578 = vmin.xlane.f32.xlu1 %v9150_v59  ;;  %v4605_v24 = vshra.s32 %v9153_v44, 16 }
0x11a6   :  { %vm4447_vm5 = vcmp.eq.f32.partialorder %v9061_v36, %v4423_v42  ;;  %v4420_v19 = vpop.xlane.xlu0 %4419  ;;  %4563 = vmin.xlane.f32.xlu0 %v9156_v33  ;;  %v4590_v51 = vshra.s32 %v9159_v40, 16 }
0x11a7   :  { %v4463_v14 = vsel %vm4447_vm5, %v6971_v20, 64  ;;  %vm4446_vm6 = vcmp.eq.f32.partialorder %v9063_v32, %v4420_v19  ;;  %v9168_v60 = vcvt.s32.f32 %v4605_v24 }
0x11a8   :  { %v9171_v58 = vsel %vm448_vm2, %v4463_v14, 2147483647  ;;  %v4462_v5 = vsel %vm4446_vm6, %v6971_v20, 64  ;;  %v9174_v6 = vcvt.s32.f32 %v4590_v51 }
0x11a9   :  { %v9177_v36 = vsel %vm448_vm2, %v4462_v5, 2147483647  ;;  %v4429_v42 = vpop.xlane.xlu1 %4428  ;;  %4608 = vmin.xlane.f32.xlu1 %v9168_v60  ;;  %v4635_v23 = vshra.s32 %v9171_v58, 16 }
0x11aa   :  { %vm4449_vm9 = vcmp.eq.f32.partialorder %v9069_v1, %v4429_v42  ;;  %v4426_v32 = vpop.xlane.xlu0 %4425  ;;  %4593 = vmin.xlane.f32.xlu0 %v9174_v6  ;;  %v4620_v24 = vshra.s32 %v9177_v36, 16 }
0x11ab   :  { %v4465_v19 = vsel %vm4449_vm9, %v6971_v20, 64  ;;  %vm4448_vm10 = vcmp.eq.f32.partialorder %v9071_v55, %v4426_v32  ;;  %v9186_v51 = vcvt.s32.f32 %v4635_v23 }
0x11ac   :  { %v9189_v14 = vsel %vm448_vm2, %v4465_v19, 2147483647  ;;  %v4464_v5 = vsel %vm4448_vm10, %v6971_v20, 64  ;;  %v9192_v46 = vcvt.s32.f32 %v4620_v24 }
0x11ad   :  { %v9195_v1 = vsel %vm448_vm2, %v4464_v5, 2147483647  ;;  %4638 = vmin.xlane.f32.xlu1 %v9186_v51  ;;  %v4435_v42 = vpop.xlane.xlu1 %4434  ;;  %v4665_v25 = vshra.s32 %v9189_v14, 16 }
0x11ae   :  { %vm4451_vm11 = vcmp.eq.f32.partialorder %v9077_v34, %v4435_v42  ;;  %4623 = vmin.xlane.f32.xlu0 %v9192_v46  ;;  %v4432_v23 = vpop.xlane.xlu0 %4431  ;;  %v4650_v55 = vshra.s32 %v9195_v1, 16 }
0x11af   :  { %v4467_v32 = vsel %vm4451_vm11, %v6971_v20, 64  ;;  %vm4450_vm12 = vcmp.eq.f32.partialorder %v9079_v21, %v4432_v23  ;;  %v9204_v24 = vcvt.s32.f32 %v4665_v25 }
0x11b0   :  { %v9207_v19 = vsel %vm448_vm2, %v4467_v32, 2147483647  ;;  %v4466_v5 = vsel %vm4450_vm12, %v6971_v20, 64  ;;  %v9210_v3 = vcvt.s32.f32 %v4650_v55  ;;  %v5976_v55 = vld [vmem:[%s10252_s4 + $0x18] sm:$0xff]  ;;  %v4484_v32 = vand.u32 65535, %v9087_v0  ;;  %s6722_s4 = smov 8  }
0x11b1   :  { %v9213_v34 = vsel %vm448_vm2, %v4466_v5, 2147483647  ;;  %4668 = vmin.xlane.f32.xlu1 %v9204_v24  ;;  %v4695_v42 = vshra.s32 %v9207_v19, 16  ;;  %6649 = vmatprep.subr.msk.mxu1 %vm448_vm2, %v5976_v55  ;;  %v4469_v5 = vand.u32 65535, %v9091_v56 }
0x11b2   :  { %4653 = vmin.xlane.f32.xlu0 %v9210_v3  ;;  %v4680_v21 = vshra.s32 %v9213_v34, 16  ;;  %6650 = vmatpush3.xpose.msk.msra.mxu1 %vm448_vm2, %v5976_v55  ;;  %v4516_v55 = vcvt.s32.f32 %v4514_v63  ;;  %v4546_v63 = vcvt.s32.f32 %v4544_v4 }
0x11b3   :  { %v9219_v25 = vcvt.s32.f32 %v4695_v42  ;;  %v4471_v49 = vcvt.s32.f32 %v4469_v5 }
0x11b4   :  { %v9221_v23 = vcvt.s32.f32 %v4680_v21  ;;  %v4486_v21 = vcvt.s32.f32 %v4484_v32 }
0x11b5   :  { %4698 = vmin.xlane.f32.xlu1 %v9219_v25 }
0x11b6   :  { %4683 = vmin.xlane.f32.xlu0 %v9221_v23 }
0x1226   :  { %v9232_v42 = vpop.xlane.xlu1 %4488 }
0x1227   :  { %v9235_v48 = vpop.xlane.xlu0 %4473  ;;  %vm4490_vm13 = vcmp.eq.f32.partialorder %v9096_v41, %v9232_v42  ;;  %v4501_v41 = vcvt.s32.f32 %v4499_v54  ;;  %v4531_v54 = vcvt.s32.f32 %v4529_v12 }
0x1228   :  { %v4491_v45 = vsel %vm4490_vm13, %v4486_v21, inf  ;;  %vm4475_vm14 = vcmp.eq.f32.partialorder %v9102_v50, %v9235_v48  ;;  %v4574_v50 = vand.u32 65535, %v9135_v47  ;;  %v4604_v47 = vand.u32 65535, %v9153_v44 }
0x1229   :  { %4492 = vmin.xlane.f32.xlu1 %v4491_v45  ;;  %v4476_v0 = vsel %vm4475_vm14, %v4471_v49, inf  ;;  %v4634_v44 = vand.u32 65535, %v9171_v58  ;;  %v4664_v58 = vand.u32 65535, %v9189_v14  ;;  %v4694_v14 = vand.u32 65535, %v9207_v19 }
0x122a   :  { %v9242_v56 = vpop.xlane.xlu1 %4518  ;;  %4477 = vmin.xlane.f32.xlu0 %v4476_v0  ;;  %v4576_v0 = vcvt.s32.f32 %v4574_v50  ;;  %v4606_v12 = vcvt.s32.f32 %v4604_v47  ;;  %v10730_v47 = vld [vmem:[#allocation29_spill] sm:$0xff] }
0x122b   :  { %v9245_v32 = vpop.xlane.xlu0 %4503  ;;  %vm4520_vm15 = vcmp.eq.f32.partialorder %v9114_v15, %v9242_v56  ;;  %v4559_v15 = vand.u32 65535, %v9141_v61  ;;  %v4589_v61 = vand.u32 65535, %v9159_v40  ;;  %v4619_v40 = vand.u32 65535, %v9177_v36 }
0x122c   :  { %v4521_v5 = vsel %vm4520_vm15, %v4516_v55, inf  ;;  %vm4505_vm3 = vcmp.eq.f32.partialorder %v9120_v38, %v9245_v32  ;;  %v4636_v50 = vcvt.s32.f32 %v4634_v44  ;;  %v4649_v36 = vand.u32 65535, %v9195_v1 }
0x122d   :  { %4522 = vmin.xlane.f32.xlu1 %v4521_v5  ;;  %v4506_v45 = vsel %vm4505_vm3, %v4501_v41, inf  ;;  %v4679_v1 = vand.u32 65535, %v9213_v34 }
0x122e   :  { %v9252_v49 = vpop.xlane.xlu1 %4548  ;;  %4507 = vmin.xlane.f32.xlu0 %v4506_v45 }
0x122f   :  { %v9255_v43 = vpop.xlane.xlu0 %4533  ;;  %vm4550_vm4 = vcmp.eq.f32.partialorder %v9132_v2, %v9252_v49  ;;  %v4561_v2 = vcvt.s32.f32 %v4559_v15  ;;  %v4681_v34 = vcvt.s32.f32 %v4679_v1 }
0x1230   :  { %v4551_v53 = vsel %vm4550_vm4, %v4546_v63, inf  ;;  %vm4535_vm5 = vcmp.eq.f32.partialorder %v9138_v8, %v9255_v43 }
0x1231   :  { %4552 = vmin.xlane.f32.xlu1 %v4551_v53  ;;  %v4536_v38 = vsel %vm4535_vm5, %v4531_v54, inf  ;;  %vm5545_vm5 = vcmask 23552  }
0x1232   :  { %v9262_v21 = vpop.xlane.xlu1 %4578  ;;  %4537 = vmin.xlane.f32.xlu0 %v4536_v38  ;;  %v4666_v38 = vcvt.s32.f32 %v4664_v58 }
0x1233   :  { %v9265_v55 = vpop.xlane.xlu0 %4563  ;;  %vm4580_vm6 = vcmp.eq.f32.partialorder %v9150_v59, %v9262_v21  ;;  %v4591_v59 = vcvt.s32.f32 %v4589_v61 }
0x1234   :  { %v4581_v4 = vsel %vm4580_vm6, %v4576_v0, inf  ;;  %vm4565_vm9 = vcmp.eq.f32.partialorder %v9156_v33, %v9265_v55  ;;  %vm5562_vm6 = vcmask 31744  }
0x1235   :  { %4582 = vmin.xlane.f32.xlu1 %v4581_v4  ;;  %v4566_v8 = vsel %vm4565_vm9, %v4561_v2, inf  ;;  %v10731_v2 = vld [vmem:[#allocation3_spill] sm:$0xff]  ;;  %v10732_v4 = vld [vmem:[#allocation30_spill] sm:$0xff] }
0x1236   :  { %v9272_v41 = vpop.xlane.xlu1 %4608  ;;  %4567 = vmin.xlane.f32.xlu0 %v4566_v8  ;;  %v1047_v61 = vsub.f32 %v10731_v2, %v10730_v47  ;;  %v10733_v8 = vld [vmem:[#allocation2_spill] sm:$0xff] }
0x1237   :  { %v9275_v5 = vpop.xlane.xlu0 %4593  ;;  %vm4610_vm10 = vcmp.eq.f32.partialorder %v9168_v60, %v9272_v41  ;;  %v4621_v60 = vcvt.s32.f32 %v4619_v40 }
0x1238   :  { %v4611_v45 = vsel %vm4610_vm10, %v4606_v12, inf  ;;  %vm4595_vm11 = vcmp.eq.f32.partialorder %v9174_v6, %v9275_v5  ;;  %v1046_v12 = vsub.f32 %v10733_v8, %v10732_v4  ;;  %v1063_v40 = vmul.f32 %v1047_v61, %v1047_v61  ;;  %v10742_v61 = vld [vmem:[#allocation34_spill] sm:$0xff]  ;;  %v10779_v8 = vld [vmem:[#allocation67_spill] sm:$0xff] }
0x1239   :  { %4612 = vmin.xlane.f32.xlu1 %v4611_v45  ;;  %v4596_v33 = vsel %vm4595_vm11, %v4591_v59, inf  ;;  %v4696_v59 = vcvt.s32.f32 %v4694_v14  ;;  %v10736_v45 = vld [vmem:[#allocation31_spill] sm:$0xff]  ;;  %v10740_v14 = vld [vmem:[#allocation33_spill] sm:$0xff] }
0x123a   :  { %v9282_v63 = vpop.xlane.xlu1 %4638  ;;  %4597 = vmin.xlane.f32.xlu0 %v4596_v33  ;;  %v10737_v33 = vld [vmem:[#allocation5_spill] sm:$0xff]  ;;  %v1062_v58 = vmul.f32 %v1046_v12, %v1046_v12  ;;  %v1081_v1 = vsel %vm254_vm1, %v1063_v40, 0.0 }
0x123b   :  { %v9285_v54 = vpop.xlane.xlu0 %4623  ;;  %vm4640_vm12 = vcmp.eq.f32.partialorder %v9186_v51, %v9282_v63  ;;  %v4651_v51 = vcvt.s32.f32 %v4649_v36  ;;  %v10739_v36 = vld [vmem:[#allocation4_spill] sm:$0xff] }
0x123c   :  { %v4641_v15 = vsel %vm4640_vm12, %v4636_v50, inf  ;;  %vm4625_vm13 = vcmp.eq.f32.partialorder %v9192_v46, %v9285_v54  ;;  %v1049_v50 = vsub.f32 %v10737_v33, %v10736_v45 }
0x123d   :  { %4642 = vmin.xlane.f32.xlu1 %v4641_v15  ;;  %v4626_v6 = vsel %vm4625_vm13, %v4621_v60, inf  ;;  %v10738_v60 = vld [vmem:[#allocation32_spill] sm:$0xff] }
0x123e   :  { %v9292_v53 = vpop.xlane.xlu1 %4668  ;;  %4627 = vmin.xlane.f32.xlu0 %v4626_v6  ;;  %v1048_v15 = vsub.f32 %v10739_v36, %v10738_v60  ;;  %v10747_v60 = vld [vmem:[#allocation9_spill] sm:$0xff] }
0x123f   :  { %v9295_v0 = vpop.xlane.xlu0 %4653  ;;  %vm4670_vm14 = vcmp.eq.f32.partialorder %v9204_v24, %v9292_v53 }
0x1240   :  { %10729 = vst [vmem:[#allocation113_spill] sm:$0xff] %v9295_v0  ;;  %v4671_v46 = vsel %vm4670_vm14, %v4666_v38, inf  ;;  %vm4655_vm15 = vcmp.eq.f32.partialorder %v9210_v3, %v9295_v0  ;;  %v1065_v38 = vmul.f32 %v1049_v50, %v1049_v50  ;;  %v1064_v47 = vmul.f32 %v1048_v15, %v1048_v15  ;;  %v10787_v0 = vld [vmem:[#allocation71_spill] sm:$0xff] }
0x1241   :  { %4672 = vmin.xlane.f32.xlu1 %v4671_v46  ;;  %v4656_v19 = vsel %vm4655_vm15, %v4651_v51, inf  ;;  %v10741_v51 = vld [vmem:[#allocation6_spill] sm:$0xff]  ;;  %v10743_v46 = vld [vmem:[#allocation7_spill] sm:$0xff] }
0x1242   :  { %v9306_v44 = vpop.xlane.xlu1 %4698  ;;  %4657 = vmin.xlane.f32.xlu0 %v4656_v19  ;;  %v1050_v4 = vsub.f32 %v10743_v46, %v10742_v61  ;;  %v10744_v19 = vld [vmem:[#allocation35_spill] sm:$0xff]  ;;  %v1084_v40 = vsel %vm254_vm1, %v1064_v47, 0.0 }
0x1243   :  { %10734 = vst [vmem:[#allocation56_spill] sm:$0xff] %v9306_v44  ;;  %v9308_v24 = vpop.xlane.xlu0 %4683  ;;  %vm4700_vm3 = vcmp.eq.f32.partialorder %v9219_v25, %v9306_v44  ;;  %v1051_v25 = vsub.f32 %v10741_v51, %v10740_v14  ;;  %v10748_v14 = vld [vmem:[#allocation37_spill] sm:$0xff]  ;;  %v10751_v51 = vld [vmem:[#allocation11_spill] sm:$0xff] }
0x1244   :  { %10735 = vst [vmem:[#allocation115_spill] sm:$0xff] %v9308_v24  ;;  %v4701_v3 = vsel %vm4700_vm3, %v4696_v59, inf  ;;  %vm4685_vm4 = vcmp.eq.f32.partialorder %v9221_v23, %v9308_v24  ;;  %v1078_v23 = vsel %vm254_vm1, %v1062_v58, 0.0  ;;  %v10745_v59 = vld [vmem:[#allocation8_spill] sm:$0xff]  ;;  %v1066_v50 = vmul.f32 %v1050_v4, %v1050_v4  ;;  %v10771_v46 = vld [vmem:[#allocation63_spill] sm:$0xff]  ;;  %v10783_v24 = vld [vmem:[#allocation69_spill] sm:$0xff] }
0x1245   :  { %4702 = vmin.xlane.f32.xlu1 %v4701_v3  ;;  %v4686_v6 = vsel %vm4685_vm4, %v4681_v34, inf  ;;  %v1067_v12 = vmul.f32 %v1051_v25, %v1051_v25  ;;  %v1053_v45 = vsub.f32 %v10745_v59, %v10744_v19  ;;  %v1087_v34 = vsel %vm254_vm1, %v1065_v38, 0.0  ;;  %v10746_v3 = vld [vmem:[#allocation36_spill] sm:$0xff] }
0x1246   :  { %4687 = vmin.xlane.f32.xlu0 %v4686_v6  ;;  %v1052_v6 = vsub.f32 %v10747_v60, %v10746_v3  ;;  %v1090_v38 = vsel %vm254_vm1, %v1066_v50, 0.0  ;;  %v10752_v3 = vld [vmem:[#allocation39_spill] sm:$0xff]  ;;  %v10755_v60 = vld [vmem:[#allocation13_spill] sm:$0xff] }
0x1247   :  { %v1069_v15 = vmul.f32 %v1053_v45, %v1053_v45  ;;  %v1093_v58 = vsel %vm254_vm1, %v1067_v12, 0.0 }
0x1248   :  { %v1068_v25 = vmul.f32 %v1052_v6, %v1052_v6 }
0x1249   :  { %1082 = vadd.xlane.f32.xlu1 %v1081_v1  ;;  %v10749_v1 = vld [vmem:[#allocation10_spill] sm:$0xff]  ;;  %v1099_v47 = vsel %vm254_vm1, %v1069_v15, 0.0 }
0x124a   :  { %1079 = vadd.xlane.f32.xlu0 %v1078_v23  ;;  %v1055_v61 = vsub.f32 %v10749_v1, %v10748_v14  ;;  %v10750_v23 = vld [vmem:[#allocation38_spill] sm:$0xff]  ;;  %v1096_v12 = vsel %vm254_vm1, %v1068_v25, 0.0 }
0x124b   :  { %v1054_v19 = vsub.f32 %v10751_v51, %v10750_v23  ;;  %v10756_v23 = vld [vmem:[#allocation41_spill] sm:$0xff]  ;;  %v10759_v51 = vld [vmem:[#allocation15_spill] sm:$0xff] }
0x124c   :  { %v1071_v4 = vmul.f32 %v1055_v61, %v1055_v61 }
0x124d   :  { %1088 = vadd.xlane.f32.xlu1 %v1087_v34  ;;  %v10753_v34 = vld [vmem:[#allocation12_spill] sm:$0xff]  ;;  %v1070_v45 = vmul.f32 %v1054_v19, %v1054_v19 }
0x124e   :  { %1085 = vadd.xlane.f32.xlu0 %v1084_v40  ;;  %v1057_v59 = vsub.f32 %v10753_v34, %v10752_v3  ;;  %v10754_v40 = vld [vmem:[#allocation40_spill] sm:$0xff]  ;;  %v1105_v50 = vsel %vm254_vm1, %v1071_v4, 0.0 }
0x124f   :  { %v1056_v14 = vsub.f32 %v10755_v60, %v10754_v40  ;;  %v1102_v15 = vsel %vm254_vm1, %v1070_v45, 0.0  ;;  %v10760_v40 = vld [vmem:[#allocation43_spill] sm:$0xff]  ;;  %v10763_v60 = vld [vmem:[#allocation17_spill] sm:$0xff] }
0x1250   :  { %v1073_v6 = vmul.f32 %v1057_v59, %v1057_v59 }
0x1251   :  { %1094 = vadd.xlane.f32.xlu1 %v1093_v58  ;;  %v10757_v58 = vld [vmem:[#allocation14_spill] sm:$0xff]  ;;  %v1072_v61 = vmul.f32 %v1056_v14, %v1056_v14 }
0x1252   :  { %1091 = vadd.xlane.f32.xlu0 %v1090_v38  ;;  %v1059_v1 = vsub.f32 %v10757_v58, %v10756_v23  ;;  %v10758_v38 = vld [vmem:[#allocation42_spill] sm:$0xff]  ;;  %v1111_v25 = vsel %vm254_vm1, %v1073_v6, 0.0 }
0x1253   :  { %v1058_v3 = vsub.f32 %v10759_v51, %v10758_v38  ;;  %v1108_v4 = vsel %vm254_vm1, %v1072_v61, 0.0  ;;  %v10764_v38 = vld [vmem:[#allocation78_spill] sm:$0xff]  ;;  %v10767_v51 = vld [vmem:[#allocation61_spill] sm:$0xff] }
0x1254   :  { %v1075_v19 = vmul.f32 %v1059_v1, %v1059_v1 }
0x1255   :  { %1100 = vadd.xlane.f32.xlu1 %v1099_v47  ;;  %v10761_v47 = vld [vmem:[#allocation16_spill] sm:$0xff]  ;;  %v1074_v59 = vmul.f32 %v1058_v3, %v1058_v3 }
0x1256   :  { %1097 = vadd.xlane.f32.xlu0 %v1096_v12  ;;  %v1061_v34 = vsub.f32 %v10761_v47, %v10760_v40  ;;  %v10762_v12 = vld [vmem:[#allocation44_spill] sm:$0xff]  ;;  %v1117_v45 = vsel %vm254_vm1, %v1075_v19, 0.0  ;;  %v10775_v47 = vld [vmem:[#allocation65_spill] sm:$0xff] }
0x1257   :  { %v1060_v23 = vsub.f32 %v10763_v60, %v10762_v12  ;;  %v1114_v6 = vsel %vm254_vm1, %v1074_v59, 0.0  ;;  %v10768_v12 = vld [vmem:[#allocation80_spill] sm:$0xff] }
0x1258   :  { %v1077_v14 = vmul.f32 %v1061_v34, %v1061_v34 }
0x1259   :  { %1106 = vadd.xlane.f32.xlu1 %v1105_v50  ;;  %v10765_v50 = vld [vmem:[#allocation62_spill] sm:$0xff]  ;;  %v1076_v1 = vmul.f32 %v1060_v23, %v1060_v23 }
0x125a   :  { %1103 = vadd.xlane.f32.xlu0 %v1102_v15  ;;  %v2359_v58 = vsub.f32 %v10765_v50, %v10764_v38  ;;  %v10766_v15 = vld [vmem:[#allocation79_spill] sm:$0xff]  ;;  %v1123_v61 = vsel %vm254_vm1, %v1077_v14, 0.0 }
0x125b   :  { %v2358_v40 = vsub.f32 %v10767_v51, %v10766_v15  ;;  %v1120_v19 = vsel %vm254_vm1, %v1076_v1, 0.0  ;;  %v10772_v15 = vld [vmem:[#allocation82_spill] sm:$0xff] }
0x125c   :  { %v2375_v3 = vmul.f32 %v2359_v58, %v2359_v58 }
0x125d   :  { %1112 = vadd.xlane.f32.xlu1 %v1111_v25  ;;  %v10769_v25 = vld [vmem:[#allocation64_spill] sm:$0xff]  ;;  %v2374_v34 = vmul.f32 %v2358_v40, %v2358_v40 }
0x125e   :  { %1109 = vadd.xlane.f32.xlu0 %v1108_v4  ;;  %v2361_v33 = vsub.f32 %v10769_v25, %v10768_v12  ;;  %v10770_v4 = vld [vmem:[#allocation81_spill] sm:$0xff]  ;;  %v2393_v59 = vsel %vm254_vm1, %v2375_v3, 0.0 }
0x125f   :  { %v2360_v38 = vsub.f32 %v10771_v46, %v10770_v4  ;;  %v2390_v14 = vsel %vm254_vm1, %v2374_v34, 0.0  ;;  %v10776_v4 = vld [vmem:[#allocation84_spill] sm:$0xff] }
0x1260   :  { %v2377_v23 = vmul.f32 %v2361_v33, %v2361_v33 }
0x1261   :  { %1118 = vadd.xlane.f32.xlu1 %v1117_v45  ;;  %v10773_v45 = vld [vmem:[#allocation66_spill] sm:$0xff]  ;;  %v2376_v58 = vmul.f32 %v2360_v38, %v2360_v38 }
0x1262   :  { %1115 = vadd.xlane.f32.xlu0 %v1114_v6  ;;  %v2363_v2 = vsub.f32 %v10773_v45, %v10772_v15  ;;  %v10774_v6 = vld [vmem:[#allocation83_spill] sm:$0xff]  ;;  %v2399_v1 = vsel %vm254_vm1, %v2377_v23, 0.0 }
0x1263   :  { %v2362_v12 = vsub.f32 %v10775_v47, %v10774_v6  ;;  %v2396_v3 = vsel %vm254_vm1, %v2376_v58, 0.0  ;;  %v10780_v6 = vld [vmem:[#allocation86_spill] sm:$0xff] }
0x1264   :  { %v2379_v40 = vmul.f32 %v2363_v2, %v2363_v2 }
0x1265   :  { %1124 = vadd.xlane.f32.xlu1 %v1123_v61  ;;  %v10777_v61 = vld [vmem:[#allocation68_spill] sm:$0xff]  ;;  %v2378_v33 = vmul.f32 %v2362_v12, %v2362_v12 }
0x1266   :  { %1121 = vadd.xlane.f32.xlu0 %v1120_v19  ;;  %v2365_v36 = vsub.f32 %v10777_v61, %v10776_v4  ;;  %v10778_v19 = vld [vmem:[#allocation85_spill] sm:$0xff]  ;;  %v2405_v34 = vsel %vm254_vm1, %v2379_v40, 0.0 }
0x1267   :  { %v2364_v15 = vsub.f32 %v10779_v8, %v10778_v19  ;;  %v2402_v23 = vsel %vm254_vm1, %v2378_v33, 0.0  ;;  %v10784_v19 = vld [vmem:[#allocation88_spill] sm:$0xff] }
0x1268   :  { %v2381_v38 = vmul.f32 %v2365_v36, %v2365_v36 }
0x1269   :  { %2394 = vadd.xlane.f32.xlu1 %v2393_v59  ;;  %v10781_v59 = vld [vmem:[#allocation70_spill] sm:$0xff]  ;;  %v2380_v2 = vmul.f32 %v2364_v15, %v2364_v15 }
0x126a   :  { %2391 = vadd.xlane.f32.xlu0 %v2390_v14  ;;  %v2367_v60 = vsub.f32 %v10781_v59, %v10780_v6  ;;  %v10782_v14 = vld [vmem:[#allocation87_spill] sm:$0xff]  ;;  %v2411_v58 = vsel %vm254_vm1, %v2381_v38, 0.0 }
0x126b   :  { %v2366_v4 = vsub.f32 %v10783_v24, %v10782_v14  ;;  %v2408_v40 = vsel %vm254_vm1, %v2380_v2, 0.0  ;;  %v10788_v14 = vld [vmem:[#allocation90_spill] sm:$0xff]  ;;  %v10791_v24 = vld [vmem:[#allocation73_spill] sm:$0xff] }
0x126c   :  { %v2383_v12 = vmul.f32 %v2367_v60, %v2367_v60 }
0x126d   :  { %2400 = vadd.xlane.f32.xlu1 %v2399_v1  ;;  %v10785_v1 = vld [vmem:[#allocation72_spill] sm:$0xff]  ;;  %v2382_v36 = vmul.f32 %v2366_v4, %v2366_v4 }
0x126e   :  { %2397 = vadd.xlane.f32.xlu0 %v2396_v3  ;;  %v2369_v44 = vsub.f32 %v10785_v1, %v10784_v19  ;;  %v10786_v3 = vld [vmem:[#allocation89_spill] sm:$0xff]  ;;  %v2417_v33 = vsel %vm254_vm1, %v2383_v12, 0.0 }
0x126f   :  { %v2368_v6 = vsub.f32 %v10787_v0, %v10786_v3  ;;  %v2414_v38 = vsel %vm254_vm1, %v2382_v36, 0.0  ;;  %v10792_v3 = vld [vmem:[#allocation92_spill] sm:$0xff]  ;;  %v10795_v0 = vld [vmem:[#allocation75_spill] sm:$0xff] }
0x1270   :  { %v2385_v15 = vmul.f32 %v2369_v44, %v2369_v44 }
0x1271   :  { %2406 = vadd.xlane.f32.xlu1 %v2405_v34  ;;  %v10789_v34 = vld [vmem:[#allocation74_spill] sm:$0xff]  ;;  %v2384_v60 = vmul.f32 %v2368_v6, %v2368_v6 }
0x1272   :  { %2403 = vadd.xlane.f32.xlu0 %v2402_v23  ;;  %v2371_v59 = vsub.f32 %v10789_v34, %v10788_v14  ;;  %v10790_v23 = vld [vmem:[#allocation91_spill] sm:$0xff]  ;;  %v2423_v2 = vsel %vm254_vm1, %v2385_v15, 0.0 }
0x1273   :  { %v2370_v19 = vsub.f32 %v10791_v24, %v10790_v23  ;;  %v2420_v12 = vsel %vm254_vm1, %v2384_v60, 0.0 }
0x1274   :  { %v2387_v4 = vmul.f32 %v2371_v59, %v2371_v59 }
0x1275   :  { %2412 = vadd.xlane.f32.xlu1 %v2411_v58  ;;  %v10793_v58 = vld [vmem:[#allocation76_spill] sm:$0xff]  ;;  %v2386_v44 = vmul.f32 %v2370_v19, %v2370_v19 }
0x1276   :  { %2409 = vadd.xlane.f32.xlu0 %v2408_v40  ;;  %v2373_v1 = vsub.f32 %v10793_v58, %v10792_v3  ;;  %v10794_v40 = vld [vmem:[#allocation93_spill] sm:$0xff]  ;;  %v2429_v36 = vsel %vm254_vm1, %v2387_v4, 0.0 }
0x1277   :  { %v2372_v14 = vsub.f32 %v10795_v0, %v10794_v40  ;;  %v2426_v15 = vsel %vm254_vm1, %v2386_v44, 0.0 }
0x1278   :  { %v2389_v6 = vmul.f32 %v2373_v1, %v2373_v1 }
0x1279   :  { %2418 = vadd.xlane.f32.xlu1 %v2417_v33  ;;  %v10796_v33 = vld [vmem:[#allocation127_spill] sm:$0xff]  ;;  %v2388_v59 = vmul.f32 %v2372_v14, %v2372_v14 }
0x127a   :  { %2415 = vadd.xlane.f32.xlu0 %v2414_v38  ;;  %v3673_v23 = vsub.f32 %v10796_v33, %v8782_v22  ;;  %v10797_v38 = vld [vmem:[#allocation126_spill] sm:$0xff]  ;;  %v2435_v60 = vsel %vm254_vm1, %v2389_v6, 0.0 }
0x127b   :  { %v3672_v3 = vsub.f32 %v10797_v38, %v8784_v13  ;;  %v2432_v4 = vsel %vm254_vm1, %v2388_v59, 0.0  ;;  %v10800_v13 = vld [vmem:[#allocation131_spill] sm:$0xff] }
0x127c   :  { %v3689_v19 = vmul.f32 %v3673_v23, %v3673_v23 }
0x127d   :  { %2424 = vadd.xlane.f32.xlu1 %v2423_v2  ;;  %v10798_v2 = vld [vmem:[#allocation129_spill] sm:$0xff]  ;;  %v3688_v1 = vmul.f32 %v3672_v3, %v3672_v3 }
0x127e   :  { %2421 = vadd.xlane.f32.xlu0 %v2420_v12  ;;  %v3675_v40 = vsub.f32 %v10798_v2, %v8790_v16  ;;  %v10799_v12 = vld [vmem:[#allocation128_spill] sm:$0xff]  ;;  %v3707_v44 = vsel %vm254_vm1, %v3689_v19, 0.0 }
0x127f   :  { %v3674_v22 = vsub.f32 %v10799_v12, %v8792_v10  ;;  %v3704_v6 = vsel %vm254_vm1, %v3688_v1, 0.0  ;;  %v10802_v10 = vld [vmem:[#allocation133_spill] sm:$0xff] }
0x1280   :  { %v3691_v14 = vmul.f32 %v3675_v40, %v3675_v40 }
0x1281   :  { %2430 = vadd.xlane.f32.xlu1 %v2429_v36  ;;  %v3677_v36 = vsub.f32 %v10800_v13, %v8798_v62  ;;  %v3690_v23 = vmul.f32 %v3674_v22, %v3674_v22 }
0x1282   :  { %2427 = vadd.xlane.f32.xlu0 %v2426_v15  ;;  %v10801_v15 = vld [vmem:[#allocation130_spill] sm:$0xff]  ;;  %v3713_v59 = vsel %vm254_vm1, %v3691_v14, 0.0 }
0x1283   :  { %v3676_v16 = vsub.f32 %v10801_v15, %v8800_v31  ;;  %v3693_v3 = vmul.f32 %v3677_v36, %v3677_v36  ;;  %v3710_v19 = vsel %vm254_vm1, %v3690_v23, 0.0  ;;  %v10804_v31 = vld [vmem:[#allocation135_spill] sm:$0xff] }
0x1285   :  { %2436 = vadd.xlane.f32.xlu1 %v2435_v60  ;;  %v3679_v60 = vsub.f32 %v10802_v10, %v8806_v17  ;;  %v3692_v40 = vmul.f32 %v3676_v16, %v3676_v16  ;;  %v3719_v1 = vsel %vm254_vm1, %v3693_v3, 0.0 }
0x1286   :  { %2433 = vadd.xlane.f32.xlu0 %v2432_v4  ;;  %v10803_v4 = vld [vmem:[#allocation132_spill] sm:$0xff] }
0x1287   :  { %v3678_v62 = vsub.f32 %v10803_v4, %v8808_v11  ;;  %v3695_v22 = vmul.f32 %v3679_v60, %v3679_v60  ;;  %v3716_v14 = vsel %vm254_vm1, %v3692_v40, 0.0  ;;  %v10806_v11 = vld [vmem:[#allocation137_spill] sm:$0xff] }
0x1289   :  { %3708 = vadd.xlane.f32.xlu1 %v3707_v44  ;;  %v3681_v44 = vsub.f32 %v10804_v31, %v8814_v35  ;;  %v3694_v36 = vmul.f32 %v3678_v62, %v3678_v62  ;;  %v3725_v23 = vsel %vm254_vm1, %v3695_v22, 0.0 }
0x128a   :  { %3705 = vadd.xlane.f32.xlu0 %v3704_v6  ;;  %v10805_v6 = vld [vmem:[#allocation134_spill] sm:$0xff] }
0x128b   :  { %v3680_v17 = vsub.f32 %v10805_v6, %v8816_v9  ;;  %v3697_v16 = vmul.f32 %v3681_v44, %v3681_v44  ;;  %v3722_v3 = vsel %vm254_vm1, %v3694_v36, 0.0  ;;  %v10808_v9 = vld [vmem:[#allocation139_spill] sm:$0xff] }
0x128d   :  { %3714 = vadd.xlane.f32.xlu1 %v3713_v59  ;;  %v3683_v59 = vsub.f32 %v10806_v11, %v8822_v7  ;;  %v3696_v60 = vmul.f32 %v3680_v17, %v3680_v17  ;;  %v3731_v40 = vsel %vm254_vm1, %v3697_v16, 0.0 }
0x128e   :  { %3711 = vadd.xlane.f32.xlu0 %v3710_v19  ;;  %v10807_v19 = vld [vmem:[#allocation136_spill] sm:$0xff] }
0x128f   :  { %v3682_v35 = vsub.f32 %v10807_v19, %v8824_v37  ;;  %v3699_v62 = vmul.f32 %v3683_v59, %v3683_v59  ;;  %v3728_v22 = vsel %vm254_vm1, %v3696_v60, 0.0  ;;  %v10810_v37 = vld [vmem:[#allocation141_spill] sm:$0xff] }
0x1291   :  { %3720 = vadd.xlane.f32.xlu1 %v3719_v1  ;;  %v3685_v1 = vsub.f32 %v10808_v9, %v8830_v27  ;;  %v3698_v44 = vmul.f32 %v3682_v35, %v3682_v35  ;;  %v3737_v36 = vsel %vm254_vm1, %v3699_v62, 0.0 }
0x1292   :  { %3717 = vadd.xlane.f32.xlu0 %v3716_v14  ;;  %v10809_v14 = vld [vmem:[#allocation138_spill] sm:$0xff] }
0x1293   :  { %v3684_v7 = vsub.f32 %v10809_v14, %v8832_v39  ;;  %v3701_v17 = vmul.f32 %v3685_v1, %v3685_v1  ;;  %v3734_v16 = vsel %vm254_vm1, %v3698_v44, 0.0  ;;  %v4480_v1 = vcvt.f32.s32 %v9235_v48 }
0x1294   :  { %v4525_v44 = vcvt.f32.s32 %v9242_v56  ;;  %v4615_v48 = vcvt.f32.s32 %v9272_v41 }
0x1295   :  { %3726 = vadd.xlane.f32.xlu1 %v3725_v23  ;;  %v3687_v23 = vsub.f32 %v10810_v37, %v8838_v57  ;;  %v3700_v59 = vmul.f32 %v3684_v7, %v3684_v7  ;;  %v3743_v39 = vsel %vm254_vm1, %v3701_v17, 0.0  ;;  %v4510_v7 = vcvt.f32.s32 %v9245_v32 }
0x1296   :  { %3723 = vadd.xlane.f32.xlu0 %v3722_v3  ;;  %v10811_v3 = vld [vmem:[#allocation140_spill] sm:$0xff]  ;;  %v4540_v17 = vcvt.f32.s32 %v9255_v43  ;;  %v4526_v32 = vshll.u32 %v4525_v44, 16 }
0x1297   :  { %v3686_v27 = vsub.f32 %v10811_v3, %v8840_v28  ;;  %v3703_v35 = vmul.f32 %v3687_v23, %v3687_v23  ;;  %v3740_v60 = vsel %vm254_vm1, %v3700_v59, 0.0  ;;  %v4495_v28 = vcvt.f32.s32 %v9232_v42 }
0x1298   :  { %v4585_v23 = vcvt.f32.s32 %v9262_v21  ;;  %v4511_v43 = vshll.u32 %v4510_v7, 16  ;;  %v4541_v21 = vshll.u32 %v4540_v17, 16  ;;  %v4645_v17 = vcvt.f32.s32 %v9282_v63 }
0x1299   :  { %3732 = vadd.xlane.f32.xlu1 %v3731_v40  ;;  %v3702_v40 = vmul.f32 %v3686_v27, %v3686_v27  ;;  %v3749_v57 = vsel %vm254_vm1, %v3703_v35, 0.0  ;;  %v4496_v42 = vshll.u32 %v4495_v28, 16 }
0x129a   :  { %3729 = vadd.xlane.f32.xlu0 %v3728_v22  ;;  %v4555_v22 = vcvt.f32.s32 %v9252_v49  ;;  %v4600_v49 = vcvt.f32.s32 %v9275_v5 }
0x129b   :  { %v3746_v62 = vsel %vm254_vm1, %v3702_v40, 0.0 }
0x129c   :  { %v9474_v28 = vshll.u32 %v4600_v49, 16 }
0x129d   :  { %3738 = vadd.xlane.f32.xlu1 %v3737_v36  ;;  %v4570_v36 = vcvt.f32.s32 %v9265_v55  ;;  %v9466_v55 = vshll.u32 %v4585_v23, 16 }
0x129e   :  { %3735 = vadd.xlane.f32.xlu0 %v3734_v16  ;;  %v4481_v16 = vshll.u32 %v4480_v1, 16 }
0x12a1   :  { %3744 = vadd.xlane.f32.xlu1 %v3743_v39  ;;  %v4556_v39 = vshll.u32 %v4555_v22, 16 }
0x12a2   :  { %3741 = vadd.xlane.f32.xlu0 %v3740_v60  ;;  %v9468_v60 = vshll.u32 %v4570_v36, 16 }
0x12a5   :  { %3750 = vadd.xlane.f32.xlu1 %v3749_v57  ;;  %v9472_v57 = vshll.u32 %v4615_v48, 16 }
0x12a6   :  { %3747 = vadd.xlane.f32.xlu0 %v3746_v62 }
0x12b6   :  { %5303 = vrot.lane.b32.xlu1 %v10765_v50, %s6722_s4  ;;  %v4493_v59 = vpop.xlane.xlu1 %4492 }
0x12b7   :  { %v4494_v27 = vcvt.f32.s32 %v4493_v59  ;;  %v4478_v56 = vpop.xlane.xlu0 %4477 }
0x12b8   :  { %v4479_v35 = vcvt.f32.s32 %v4478_v56 }
0x12b9   :  { %v4497_v40 = vadd.s32 %v4496_v42, %v4494_v27 }
0x12ba   :  { %v4482_v50 = vadd.s32 %v4481_v16, %v4479_v35  ;;  %5305 = vrot.lane.b32.xlu1 %v10771_v46, %s6722_s4  ;;  %v4523_v41 = vpop.xlane.xlu1 %4522  ;;  %v9507_v16 = vshll.u32 %v4645_v17, 16  ;;  %v10815_v17 = vld [vmem:[#allocation69_spill] sm:$0xff] }
0x12bb   :  { %vm4710_vm9 = vcmp.lt.s32.totalorder %v4497_v40, 63  ;;  %v4524_v5 = vcvt.f32.s32 %v4523_v41  ;;  %v4508_v62 = vpop.xlane.xlu0 %4507  ;;  %v10812_v41 = vld [vmem:[#allocation18_spill] sm:$0xff] }
0x12bc   :  { %v4711_v1 = vsel %vm4710_vm9, %v4497_v40, 63  ;;  %vm4708_vm10 = vcmp.lt.s32.totalorder %v4482_v50, 63  ;;  %v4509_v44 = vcvt.f32.s32 %v4508_v62  ;;  %5301 = vrot.lane.b32.xlu0 %v10767_v51, %s6722_s4  ;;  %v4675_v62 = vcvt.f32.s32 %v9292_v53 }
0x12bd   :  { %vm4741_vm11 = vcmp.eq.s32.totalorder %v6971_v20, %v4711_v1  ;;  %v5547_v46 = vsel %vm5545_vm5, %v8657_v52, %v4711_v1  ;;  %v4527_v7 = vadd.s32 %v4526_v32, %v4524_v5  ;;  %v4709_v22 = vsel %vm4708_vm10, %v4482_v50, 63 }
0x12be   :  { %5564 = vst.msk [vmem:[%s10255_s9 + $0x8] sm:$0xff] %vm5562_vm6, %v5547_v46  ;;  %v4512_v23 = vadd.s32 %v4511_v43, %v4509_v44  ;;  %5307 = vrot.lane.b32.xlu1 %v10769_v25, %s6722_s4  ;;  %v4553_v36 = vpop.xlane.xlu1 %4552  ;;  %vm4740_vm12 = vcmp.eq.s32.totalorder %v6971_v20, %v4709_v22  ;;  %v5546_v51 = vsel %vm5545_vm5, %v8662_v18, %v4709_v22  ;;  %v4630_v52 = vcvt.f32.s32 %v9285_v54  ;;  %v10813_v44 = vld [vmem:[#allocation20_spill] sm:$0xff]  ;;  %v10814_v46 = vld [vmem:[#allocation113_spill] sm:$0xff] }
0x12bf   :  { %vm4714_vm13 = vcmp.lt.s32.totalorder %v4527_v7, 63  ;;  %v4554_v59 = vcvt.f32.s32 %v4553_v36  ;;  %v4538_v63 = vpop.xlane.xlu0 %4537  ;;  %v5960_v42 = vsel %vm4740_vm12, 1.0, %v10559_v29  ;;  %5563 = vst.msk [vmem:[%s10255_s9] sm:$0xff] %vm5562_vm6, %v5546_v51  ;;  %v5961_v25 = vsel %vm4741_vm11, 1.0, %v10559_v29 }
0x12c0   :  { %vm4712_vm14 = vcmp.lt.s32.totalorder %v4512_v23, 63  ;;  %v4539_v48 = vcvt.f32.s32 %v4538_v63  ;;  %6651 = vmatprep.mubr.msk.f32.mxu1 %vm448_vm2, %v5960_v42  ;;  %5309 = vrot.lane.b32.xlu0 %v10775_v47, %s6722_s4  ;;  %v4715_v18 = vsel %vm4714_vm13, %v4527_v7, 63  ;;  %v9518_v35 = vshll.u32 %v4630_v52, 16 }
0x12c1   :  { %v4557_v54 = vadd.s32 %v4556_v39, %v4554_v59  ;;  %6652 = vmatmul.mubr.msk.f32.vlgmr.msra.gmra.mrb[112].mxu1 %vm448_vm2, %v5961_v25  ;;  %v4713_v27 = vsel %vm4712_vm14, %v4512_v23, 63  ;;  %vm4743_vm15 = vcmp.eq.s32.totalorder %v6971_v20, %v4715_v18  ;;  %v5549_v56 = vsel %vm5545_vm5, %v8672_v26, %v4715_v18  ;;  %v10816_v59 = vld [vmem:[#allocation19_spill] sm:$0xff] }
0x12c2   :  { %v4542_v32 = vadd.s32 %v4541_v21, %v4539_v48  ;;  %5311 = vrot.lane.b32.xlu1 %v10773_v45, %s6722_s4  ;;  %v4583_v49 = vpop.xlane.xlu1 %4582  ;;  %vm4742_vm3 = vcmp.eq.s32.totalorder %v6971_v20, %v4713_v27  ;;  %v5548_v47 = vsel %vm5545_vm5, %v8677_v30, %v4713_v27  ;;  %5566 = vst.msk [vmem:[%s10255_s9 + $0x18] sm:$0xff] %vm5562_vm6, %v5549_v56  ;;  %v5963_v30 = vsel %vm4743_vm15, 1.0, %v10559_v29  ;;  %v10817_v48 = vld [vmem:[#allocation70_spill] sm:$0xff] }
0x12c3   :  { %vm4718_vm4 = vcmp.lt.s32.totalorder %v4557_v54, 63  ;;  %v4584_v26 = vcvt.f32.s32 %v4583_v49  ;;  %v4568_v43 = vpop.xlane.xlu0 %4567  ;;  %v5962_v39 = vsel %vm4742_vm3, 1.0, %v10559_v29  ;;  %5565 = vst.msk [vmem:[%s10255_s9 + $0x10] sm:$0xff] %vm5562_vm6, %v5548_v47  ;;  %v4660_v7 = vcvt.f32.s32 %v10814_v46  ;;  %v10819_v47 = vld [vmem:[#allocation71_spill] sm:$0xff] }
0x12c4   :  { %vm4716_vm9 = vcmp.lt.s32.totalorder %v4542_v32, 63  ;;  %v4569_v45 = vcvt.f32.s32 %v4568_v43  ;;  %6654 = vmatprep.mubr.msk.f32.mxu1 %vm448_vm2, %v5962_v39  ;;  %5313 = vrot.lane.b32.xlu0 %v10779_v8, %s6722_s4  ;;  %v4719_v21 = vsel %vm4718_vm4, %v4557_v54, 63  ;;  %v4676_v42 = vshll.u32 %v4675_v62, 16  ;;  %v10818_v54 = vld [vmem:[#allocation21_spill] sm:$0xff] }
0x12c5   :  { %v4587_v40 = vadd.s32 %v9466_v55, %v4584_v26  ;;  %6655 = vmatmul.mubr.msk.f32.gmra.mrb[114].mxu1 %vm448_vm2, %v5963_v30  ;;  %v4717_v50 = vsel %vm4716_vm9, %v4542_v32, 63  ;;  %vm4745_vm10 = vcmp.eq.s32.totalorder %v6971_v20, %v4719_v21  ;;  %v5551_v5 = vsel %vm5545_vm5, %v10812_v41, %v4719_v21  ;;  %v10820_v30 = vld [vmem:[#allocation22_spill] sm:$0xff] }
0x12c6   :  { %v4572_v1 = vadd.s32 %v9468_v60, %v4569_v45  ;;  %5315 = vrot.lane.b32.xlu1 %v10777_v61, %s6722_s4  ;;  %v4613_v8 = vpop.xlane.xlu1 %4612  ;;  %vm4744_vm11 = vcmp.eq.s32.totalorder %v6971_v20, %v4717_v50  ;;  %v5550_v55 = vsel %vm5545_vm5, %v10813_v44, %v4717_v50  ;;  %5568 = vst.msk [vmem:[%s10255_s9 + $0x28] sm:$0xff] %vm5562_vm6, %v5551_v5  ;;  %v5965_v23 = vsel %vm4745_vm10, 1.0, %v10559_v29  ;;  %v10822_v5 = vld [vmem:[#allocation72_spill] sm:$0xff] }
0x12c7   :  { %vm4722_vm12 = vcmp.lt.s32.totalorder %v4587_v40, 63  ;;  %v4614_v53 = vcvt.f32.s32 %v4613_v8  ;;  %v4598_v22 = vpop.xlane.xlu0 %4597  ;;  %v5964_v60 = vsel %vm4744_vm11, 1.0, %v10559_v29  ;;  %5567 = vst.msk [vmem:[%s10255_s9 + $0x20] sm:$0xff] %vm5562_vm6, %v5550_v55  ;;  %v4661_v27 = vshll.u32 %v4660_v7, 16  ;;  %v10824_v8 = vld [vmem:[#allocation115_spill] sm:$0xff] }
0x12c8   :  { %vm4720_vm13 = vcmp.lt.s32.totalorder %v4572_v1, 63  ;;  %v4599_v61 = vcvt.f32.s32 %v4598_v22  ;;  %6657 = vmatprep.mubr.msk.f32.mxu1 %vm448_vm2, %v5964_v60  ;;  %5317 = vrot.lane.b32.xlu0 %v10815_v17, %s6722_s4  ;;  %v4723_v36 = vsel %vm4722_vm12, %v4587_v40, 63  ;;  %v10821_v40 = vld [vmem:[#allocation56_spill] sm:$0xff]  ;;  %v4690_v44 = vcvt.f32.s32 %v10824_v8 }
0x12c9   :  { %v4617_v51 = vadd.s32 %v9472_v57, %v4614_v53  ;;  %6658 = vmatmul.mubr.msk.f32.gmra.mrb[116].mxu1 %vm448_vm2, %v5965_v23  ;;  %v4721_v52 = vsel %vm4720_vm13, %v4572_v1, 63  ;;  %vm4747_vm14 = vcmp.eq.s32.totalorder %v6971_v20, %v4723_v36  ;;  %v5553_v63 = vsel %vm5545_vm5, %v10816_v59, %v4723_v36  ;;  %v10823_v1 = vld [vmem:[#allocation23_spill] sm:$0xff]  ;;  %v10825_v17 = vld [vmem:[#allocation24_spill] sm:$0xff] }
0x12ca   :  { %v4602_v25 = vadd.s32 %v9474_v28, %v4599_v61  ;;  %5319 = vrot.lane.b32.xlu1 %v10817_v48, %s6722_s4  ;;  %v4643_v18 = vpop.xlane.xlu1 %4642  ;;  %vm4746_vm15 = vcmp.eq.s32.totalorder %v6971_v20, %v4721_v52  ;;  %v5552_v57 = vsel %vm5545_vm5, %v10818_v54, %v4721_v52  ;;  %5570 = vst.msk [vmem:[%s10255_s9 + $0x38] sm:$0xff] %vm5562_vm6, %v5553_v63  ;;  %v5967_v26 = vsel %vm4747_vm14, 1.0, %v10559_v29  ;;  %v10826_v52 = vld [vmem:[#allocation26_spill] sm:$0xff] }
0x12cb   :  { %vm4726_vm3 = vcmp.lt.s32.totalorder %v4617_v51, 63  ;;  %v4644_v56 = vcvt.f32.s32 %v4643_v18  ;;  %v4628_v32 = vpop.xlane.xlu0 %4627  ;;  %v5966_v28 = vsel %vm4746_vm15, 1.0, %v10559_v29  ;;  %5569 = vst.msk [vmem:[%s10255_s9 + $0x30] sm:$0xff] %vm5562_vm6, %v5552_v57  ;;  %v4705_v50 = vcvt.f32.s32 %v10821_v40 }
0x12cc   :  { %vm4724_vm4 = vcmp.lt.s32.totalorder %v4602_v25, 63  ;;  %v4629_v49 = vcvt.f32.s32 %v4628_v32  ;;  %6660 = vmatprep.mubr.msk.f32.mxu1 %vm448_vm2, %v5966_v28  ;;  %5321 = vrot.lane.b32.xlu0 %v10819_v47, %s6722_s4  ;;  %v4727_v43 = vsel %vm4726_vm3, %v4617_v51, 63  ;;  %v4691_v63 = vshll.u32 %v4690_v44, 16  ;;  %v10833_v44 = vld [vmem:[#allocation51_spill] sm:$0xff] }
0x12cd   :  { %v4647_v39 = vadd.s32 %v9507_v16, %v4644_v56  ;;  %6661 = vmatmul.mubr.msk.f32.gmra.mrb[118].mxu1 %vm448_vm2, %v5967_v26  ;;  %v4725_v45 = vsel %vm4724_vm4, %v4602_v25, 63  ;;  %vm4749_vm9 = vcmp.eq.s32.totalorder %v6971_v20, %v4727_v43  ;;  %v5555_v21 = vsel %vm5545_vm5, %v10820_v30, %v4727_v43  ;;  %v10827_v56 = vld [vmem:[#allocation25_spill] sm:$0xff]  ;;  %v10829_v30 = vld [vmem:[#allocation28_spill] sm:$0xff] }
0x12ce   :  { %v4632_v41 = vadd.s32 %v9518_v35, %v4629_v49  ;;  %5323 = vrot.lane.b32.xlu1 %v10822_v5, %s6722_s4  ;;  %v4673_v62 = vpop.xlane.xlu1 %4672  ;;  %vm4748_vm10 = vcmp.eq.s32.totalorder %v6971_v20, %v4725_v45  ;;  %v5554_v16 = vsel %vm5545_vm5, %v10823_v1, %v4725_v45  ;;  %5572 = vst.msk [vmem:[%s10255_s9 + $0x48] sm:$0xff] %vm5562_vm6, %v5555_v21  ;;  %v5969_v53 = vsel %vm4749_vm9, 1.0, %v10559_v29 }
0x12cf   :  { %vm4730_vm11 = vcmp.lt.s32.totalorder %v4647_v39, 63  ;;  %v4674_v55 = vcvt.f32.s32 %v4673_v62  ;;  %v4658_v46 = vpop.xlane.xlu0 %4657  ;;  %v5968_v35 = vsel %vm4748_vm10, 1.0, %v10559_v29  ;;  %5571 = vst.msk [vmem:[%s10255_s9 + $0x40] sm:$0xff] %vm5562_vm6, %v5554_v16  ;;  %v4706_v36 = vshll.u32 %v4705_v50, 16 }
0x12d0   :  { %vm4728_vm12 = vcmp.lt.s32.totalorder %v4632_v41, 63  ;;  %v4659_v7 = vcvt.f32.s32 %v4658_v46  ;;  %6663 = vmatprep.mubr.msk.f32.mxu1 %vm448_vm2, %v5968_v35  ;;  %5325 = vrot.lane.b32.xlu0 %v10791_v24, %s6722_s4  ;;  %v4731_v22 = vsel %vm4730_vm11, %v4647_v39, 63  ;;  %v10835_v35 = vld [vmem:[#allocation105_spill] sm:$0xff] }
0x12d1   :  { %v4677_v60 = vadd.s32 %v4676_v42, %v4674_v55  ;;  %6664 = vmatmul.mubr.msk.f32.gmra.mrb[120].mxu1 %vm448_vm2, %v5969_v53  ;;  %v4729_v61 = vsel %vm4728_vm12, %v4632_v41, 63  ;;  %vm4751_vm13 = vcmp.eq.s32.totalorder %v6971_v20, %v4731_v22  ;;  %v5557_v23 = vsel %vm5545_vm5, %v10825_v17, %v4731_v22  ;;  %v10834_v55 = vld [vmem:[#allocation106_spill] sm:$0xff] }
0x12d2   :  { %v4662_v51 = vadd.s32 %v4661_v27, %v4659_v7  ;;  %5327 = vrot.lane.b32.xlu1 %v10789_v34, %s6722_s4  ;;  %v4703_v24 = vpop.xlane.xlu1 %4702  ;;  %vm4750_vm14 = vcmp.eq.s32.totalorder %v6971_v20, %v4729_v61  ;;  %v5556_v59 = vsel %vm5545_vm5, %v10826_v52, %v4729_v61  ;;  %5574 = vst.msk [vmem:[%s10255_s9 + $0x58] sm:$0xff] %vm5562_vm6, %v5557_v23  ;;  %v5971_v18 = vsel %vm4751_vm13, 1.0, %v10559_v29  ;;  %v10836_v7 = vld [vmem:[#allocation52_spill] sm:$0xff] }
0x12d3   :  { %vm4734_vm15 = vcmp.lt.s32.totalorder %v4677_v60, 63  ;;  %v4704_v42 = vcvt.f32.s32 %v4703_v24  ;;  %v4688_v25 = vpop.xlane.xlu0 %4687  ;;  %v5970_v48 = vsel %vm4750_vm14, 1.0, %v10559_v29  ;;  %5573 = vst.msk [vmem:[%s10255_s9 + $0x50] sm:$0xff] %vm5562_vm6, %v5556_v59  ;;  %v10838_v61 = vld [vmem:[#allocation108_spill] sm:$0xff]  ;;  %v10841_v59 = vld [vmem:[#allocation109_spill] sm:$0xff] }
0x12d4   :  { %vm4732_vm3 = vcmp.lt.s32.totalorder %v4662_v51, 63  ;;  %v4689_v34 = vcvt.f32.s32 %v4688_v25  ;;  %6666 = vmatprep.mubr.msk.f32.mxu1 %vm448_vm2, %v5970_v48  ;;  %5329 = vrot.lane.b32.xlu0 %v10795_v0, %s6722_s4  ;;  %v4735_v54 = vsel %vm4734_vm15, %v4677_v60, 63  ;;  %v10828_v0 = vld [vmem:[#allocation142_spill] sm:$0xff]  ;;  %v10837_v60 = vld [vmem:[#allocation107_spill] sm:$0xff] }
0x12d5   :  { %v4707_v57 = vadd.s32 %v4706_v36, %v4704_v42  ;;  %6667 = vmatmul.mubr.msk.f32.gmra.mrb[122].mxu1 %vm448_vm2, %v5971_v18  ;;  %v4733_v27 = vsel %vm4732_vm3, %v4662_v51, 63  ;;  %vm4753_vm4 = vcmp.eq.s32.totalorder %v6971_v20, %v4735_v54  ;;  %v5559_v32 = vsel %vm5545_vm5, %v10827_v56, %v4735_v54  ;;  %v10839_v36 = vld [vmem:[#allocation53_spill] sm:$0xff]  ;;  %v10840_v51 = vld [vmem:[#allocation110_spill] sm:$0xff]  ;;  %v10844_v18 = vld [vmem:[#allocation112_spill] sm:$0xff] }
0x12d6   :  { %v4692_v28 = vadd.s32 %v4691_v63, %v4689_v34  ;;  %5331 = vrot.lane.b32.xlu1 %v10793_v58, %s6722_s4  ;;  %v9643_v49 = vpop.xlane.xlu1 %1082  ;;  %vm4752_vm9 = vcmp.eq.s32.totalorder %v6971_v20, %v4733_v27  ;;  %v5558_v47 = vsel %vm5545_vm5, %v10828_v0, %v4733_v27  ;;  %5576 = vst.msk [vmem:[%s10255_s9 + $0x68] sm:$0xff] %vm5562_vm6, %v5559_v32  ;;  %v5973_v58 = vsel %vm4753_vm4, 1.0, %v10559_v29  ;;  %v10842_v63 = vld [vmem:[#allocation54_spill] sm:$0xff]  ;;  %v10843_v34 = vld [vmem:[#allocation111_spill] sm:$0xff] }
0x12d7   :  { %vm4738_vm10 = vcmp.lt.s32.totalorder %v4707_v57, 63  ;;  %v9652_v26 = vpop.xlane.xlu0 %1079  ;;  %v5972_v43 = vsel %vm4752_vm9, 1.0, %v10559_v29  ;;  %5575 = vst.msk [vmem:[%s10255_s9 + $0x60] sm:$0xff] %vm5562_vm6, %v5558_v47 }
0x12d8   :  { %vm4736_vm11 = vcmp.lt.s32.totalorder %v4692_v28, 63  ;;  %6669 = vmatprep.mubr.msk.f32.mxu1 %vm448_vm2, %v5972_v43  ;;  %5349 = vrot.lane.b32.xlu0 %v10797_v38, %s6723_s19  ;;  %v4739_v39 = vsel %vm4738_vm10, %v4707_v57, 63  ;;  %v10830_v38 = vld [vmem:[#allocation77_spill] sm:$0xff] }
0x12d9   :  { %6670 = vmatmul.mubr.msk.f32.gmra.mrb[124].mxu1 %vm448_vm2, %v5973_v58  ;;  %v4737_v45 = vsel %vm4736_vm11, %v4692_v28, 63  ;;  %vm4755_vm12 = vcmp.eq.s32.totalorder %v6971_v20, %v4739_v39  ;;  %v5561_v21 = vsel %vm5545_vm5, %v10829_v30, %v4739_v39 }
0x12da   :  { %5351 = vrot.lane.b32.xlu1 %v10796_v33, %s6723_s19  ;;  %v9671_v40 = vpop.xlane.xlu1 %1088  ;;  %vm4754_vm13 = vcmp.eq.s32.totalorder %v6971_v20, %v4737_v45  ;;  %v5560_v50 = vsel %vm5545_vm5, %v10830_v38, %v4737_v45  ;;  %5578 = vst.msk [vmem:[%s10255_s9 + $0x78] sm:$0xff] %vm5562_vm6, %v5561_v21  ;;  %v5975_v20 = vsel %vm4755_vm12, 1.0, %v10559_v29 }
0x12db   :  { %v9680_v41 = vpop.xlane.xlu0 %1085  ;;  %v5974_v5 = vsel %vm4754_vm13, 1.0, %v10559_v29  ;;  %5577 = vst.msk [vmem:[%s10255_s9 + $0x70] sm:$0xff] %vm5562_vm6, %v5560_v50 }
0x12dc   :  { %6672 = vmatprep.mubr.msk.f32.mxu1 %vm448_vm2, %v5974_v5  ;;  %5353 = vrot.lane.b32.xlu0 %v10799_v12, %s6723_s19 }
0x12dd   :  { %6673 = vmatmul.mubr.msk.f32.gmra.mrb[126].mxu1 %vm448_vm2, %v5975_v20  ;;  %vm5461_vm2 = vcmask 130048  }
0x12de   :  { %5355 = vrot.lane.b32.xlu1 %v10798_v2, %s6723_s19  ;;  %v9694_v33 = vpop.xlane.xlu1 %1094 }
0x12df   :  { %v9696_v62 = vpop.xlane.xlu0 %1091 }
0x12e0   :  { %5357 = vrot.lane.b32.xlu0 %v10801_v15, %s6723_s19 }
0x12e2   :  { %5359 = vrot.lane.b32.xlu1 %v10800_v13, %s6723_s19  ;;  %v9702_v1 = vpop.xlane.xlu1 %1100 }
0x12e3   :  { %v9704_v12 = vpop.xlane.xlu0 %1097 }
0x12e4   :  { %5361 = vrot.lane.b32.xlu0 %v10803_v4, %s6723_s19 }
0x12e6   :  { %5363 = vrot.lane.b32.xlu1 %v10802_v10, %s6723_s19  ;;  %v9710_v29 = vpop.xlane.xlu1 %1106 }
0x12e7   :  { %v9712_v2 = vpop.xlane.xlu0 %1103 }
0x12e8   :  { %5365 = vrot.lane.b32.xlu0 %v10805_v6, %s6723_s19 }
0x12ea   :  { %5367 = vrot.lane.b32.xlu1 %v10804_v31, %s6723_s19  ;;  %v9718_v13 = vpop.xlane.xlu1 %1112 }
0x12eb   :  { %v9720_v15 = vpop.xlane.xlu0 %1109 }
0x12ec   :  { %5369 = vrot.lane.b32.xlu0 %v10807_v19, %s6723_s19  ;;  %v5994_v19 = vld [vmem:[%s10253_s5 + $0x18] sm:$0xff] }
0x12ed   :  { %6675 = vmatprep.subr.mxu0 %v5994_v19 }
0x12ee   :  { %5371 = vrot.lane.b32.xlu1 %v10806_v11, %s6723_s19  ;;  %v9726_v10 = vpop.xlane.xlu1 %1118  ;;  %6676 = vmatpush3.msra.mxu0 %v5994_v19 }
0x12ef   :  { %v1116_v4 = vpop.xlane.xlu0 %1115 }
0x12f0   :  { %5373 = vrot.lane.b32.xlu0 %v10809_v14, %s6723_s19  ;;  %v10832_v14 = vld [vmem:[#allocation104_spill] sm:$0xff] }
0x12f2   :  { %5375 = vrot.lane.b32.xlu1 %v10808_v9, %s6723_s19  ;;  %v9732_v31 = vpop.xlane.xlu1 %1124  ;;  %v10831_v9 = vld [vmem:[#allocation103_spill] sm:$0xff] }
0x12f3   :  { %v1122_v6 = vpop.xlane.xlu0 %1121 }
0x12f4   :  { %5377 = vrot.lane.b32.xlu0 %v10811_v3, %s6723_s19 }
0x12f6   :  { %5379 = vrot.lane.b32.xlu1 %v10810_v37, %s6723_s19  ;;  %v2395_v11 = vpop.xlane.xlu1 %2394 }
0x12f7   :  { %v2392_v16 = vpop.xlane.xlu0 %2391  ;;  %v5580_v56 = vsel %vm5511_vm7, %v9643_v49, %v2395_v11 }
0x12f8   :  { %5397 = vrot.lane.b32.xlu0 %v10831_v9, %s6724_s25  ;;  %v5579_v28 = vsel %vm5511_vm7, %v9652_v26, %v2392_v16 }
0x12fa   :  { %5399 = vrot.lane.b32.xlu1 %v10832_v14, %s6724_s25  ;;  %v2401_v8 = vpop.xlane.xlu1 %2400 }
0x12fb   :  { %v2398_v3 = vpop.xlane.xlu0 %2397  ;;  %v5582_v58 = vsel %vm5511_vm7, %v9671_v40, %v2401_v8 }
0x12fc   :  { %5401 = vrot.lane.b32.xlu0 %v10833_v44, %s6724_s25  ;;  %v5581_v45 = vsel %vm5511_vm7, %v9680_v41, %v2398_v3 }
0x12fe   :  { %5403 = vrot.lane.b32.xlu1 %v10834_v55, %s6724_s25  ;;  %v2407_v37 = vpop.xlane.xlu1 %2406 }
0x12ff   :  { %v2404_v46 = vpop.xlane.xlu0 %2403  ;;  %v5584_v21 = vsel %vm5511_vm7, %v9694_v33, %v2407_v37 }
0x1300   :  { %5405 = vrot.lane.b32.xlu0 %v10835_v35, %s6724_s25  ;;  %v5583_v50 = vsel %vm5511_vm7, %v9696_v62, %v2404_v46 }
0x1302   :  { %5407 = vrot.lane.b32.xlu1 %v10836_v7, %s6724_s25  ;;  %v2413_v53 = vpop.xlane.xlu1 %2412 }
0x1303   :  { %v2410_v22 = vpop.xlane.xlu0 %2409  ;;  %v5586_v20 = vsel %vm5511_vm7, %v9702_v1, %v2413_v53 }
0x1304   :  { %5409 = vrot.lane.b32.xlu0 %v10837_v60, %s6724_s25 }
0x1306   :  { %5411 = vrot.lane.b32.xlu1 %v10838_v61, %s6724_s25  ;;  %v2419_v17 = vpop.xlane.xlu1 %2418 }
0x1307   :  { %v2416_v23 = vpop.xlane.xlu0 %2415  ;;  %v5588_v11 = vsel %vm5511_vm7, %v9710_v29, %v2419_v17 }
0x1308   :  { %5413 = vrot.lane.b32.xlu0 %v10839_v36, %s6724_s25  ;;  %v5587_v8 = vsel %vm5511_vm7, %v9712_v2, %v2416_v23 }
0x130a   :  { %5415 = vrot.lane.b32.xlu1 %v10840_v51, %s6724_s25  ;;  %v2425_v24 = vpop.xlane.xlu1 %2424 }
0x130b   :  { %v2422_v52 = vpop.xlane.xlu0 %2421  ;;  %v5590_v37 = vsel %vm5511_vm7, %v9718_v13, %v2425_v24 }
0x130c   :  { %5417 = vrot.lane.b32.xlu0 %v10841_v59, %s6724_s25  ;;  %v5589_v53 = vsel %vm5511_vm7, %v9720_v15, %v2422_v52 }
0x130e   :  { %5419 = vrot.lane.b32.xlu1 %v10842_v63, %s6724_s25  ;;  %v2431_v42 = vpop.xlane.xlu1 %2430 }
0x130f   :  { %v2428_v25 = vpop.xlane.xlu0 %2427  ;;  %v5592_v17 = vsel %vm5511_vm7, %v9726_v10, %v2431_v42 }
0x1310   :  { %v5591_v48 = vsel %vm5511_vm7, %v1116_v4, %v2428_v25  ;;  %5421 = vrot.lane.b32.xlu0 %v10843_v34, %s6724_s25 }
0x1312   :  { %5423 = vrot.lane.b32.xlu1 %v10844_v18, %s6724_s25  ;;  %v2437_v54 = vpop.xlane.xlu1 %2436 }
0x1313   :  { %v2434_v57 = vpop.xlane.xlu0 %2433  ;;  %v5594_v15 = vsel %vm5511_vm7, %v9732_v31, %v2437_v54 }
0x1314   :  { %v5593_v27 = vsel %vm5511_vm7, %v1122_v6, %v2434_v57  ;;  %v5585_v6 = vsel %vm5511_vm7, %v9704_v12, %v2410_v22  ;;  %vm5478_vm7 = vcmask 195584  }
0x1316   :  { %v3709_v32 = vpop.xlane.xlu1 %3708 }
0x1317   :  { %v9776_v0 = vsel %vm5528_vm8, %v5580_v56, %v3709_v32  ;;  %v3706_v47 = vpop.xlane.xlu0 %3705 }
0x1318   :  { %v9779_v43 = vsel %vm5528_vm8, %v5579_v28, %v3706_v47 }
0x131a   :  { %v3715_v39 = vpop.xlane.xlu1 %3714 }
0x131b   :  { %v9786_v49 = vsel %vm5528_vm8, %v5582_v58, %v3715_v39  ;;  %v3712_v30 = vpop.xlane.xlu0 %3711 }
0x131c   :  { %v9789_v26 = vsel %vm5528_vm8, %v5581_v45, %v3712_v30 }
0x131e   :  { %v3721_v38 = vpop.xlane.xlu1 %3720 }
0x131f   :  { %v9796_v40 = vsel %vm5528_vm8, %v5584_v21, %v3721_v38  ;;  %v3718_v5 = vpop.xlane.xlu0 %3717 }
0x1320   :  { %v9799_v41 = vsel %vm5528_vm8, %v5583_v50, %v3718_v5 }
0x1322   :  { %v3727_v4 = vpop.xlane.xlu1 %3726 }
0x1323   :  { %v9806_v33 = vsel %vm5528_vm8, %v5586_v20, %v3727_v4  ;;  %v3724_v19 = vpop.xlane.xlu0 %3723 }
0x1324   :  { %v9809_v62 = vsel %vm5528_vm8, %v5585_v6, %v3724_v19 }
0x1326   :  { %v3733_v16 = vpop.xlane.xlu1 %3732 }
0x1327   :  { %v9816_v1 = vsel %vm5528_vm8, %v5588_v11, %v3733_v16  ;;  %v3730_v3 = vpop.xlane.xlu0 %3729 }
0x1328   :  { %v9819_v12 = vsel %vm5528_vm8, %v5587_v8, %v3730_v3 }
0x132a   :  { %v3739_v46 = vpop.xlane.xlu1 %3738 }
0x132b   :  { %v9826_v29 = vsel %vm5528_vm8, %v5590_v37, %v3739_v46  ;;  %v3736_v22 = vpop.xlane.xlu0 %3735 }
0x132c   :  { %v9829_v2 = vsel %vm5528_vm8, %v5589_v53, %v3736_v22 }
0x132d   :  { %10845 = vst [vmem:[#allocation116_spill] sm:$0xff] %v9829_v2 }
0x132e   :  { %v3745_v23 = vpop.xlane.xlu1 %3744 }
0x132f   :  { %v9834_v25 = vsel %vm5528_vm8, %v5592_v17, %v3745_v23  ;;  %v3742_v57 = vpop.xlane.xlu0 %3741  ;;  %v10850_v23 = vld [vmem:[#allocation17_spill] sm:$0xff] }
0x1330   :  { %10846 = vst [vmem:[#allocation57_spill] sm:$0xff] %v9834_v25  ;;  %v9837_v13 = vsel %vm5528_vm8, %v5591_v48, %v3742_v57 }
0x1331   :  { %10847 = vst [vmem:[#allocation118_spill] sm:$0xff] %v9837_v13 }
0x1332   :  { %v3751_v24 = vpop.xlane.xlu1 %3750 }
0x1333   :  { %v9842_v52 = vsel %vm5528_vm8, %v5594_v15, %v3751_v24  ;;  %v3748_v56 = vpop.xlane.xlu0 %3747 }
0x1334   :  { %10848 = vst [vmem:[#allocation117_spill] sm:$0xff] %v9842_v52  ;;  %v9845_v32 = vsel %vm5528_vm8, %v5593_v27, %v3748_v56  ;;  %v10852_v56 = vld [vmem:[#allocation2_spill] sm:$0xff] }
0x1335   :  { %10849 = vst [vmem:[#allocation58_spill] sm:$0xff] %v9845_v32 }
0x1336   :  { %v5304_v10 = vpop.permute.xlu1 %5303 }
0x1337   :  { %v5302_v42 = vpop.permute.xlu0 %5301 }
0x1338   :  { %v5445_v32 = vsel %vm254_vm1, %v10852_v56, %v5302_v42 }
0x133a   :  { %v5306_v28 = vpop.permute.xlu1 %5305 }
0x133b   :  { %v5310_v47 = vpop.permute.xlu0 %5309 }
0x133e   :  { %v5308_v58 = vpop.permute.xlu1 %5307 }
0x133f   :  { %v5314_v39 = vpop.permute.xlu0 %5313 }
0x1342   :  { %v9847_v45 = vpop.permute.xlu1 %5311 }
0x1343   :  { %v9849_v48 = vpop.permute.xlu0 %5317 }
0x1346   :  { %v9851_v30 = vpop.permute.xlu1 %5315 }
0x1347   :  { %v9853_v31 = vpop.permute.xlu0 %5321 }
0x134a   :  { %v9855_v54 = vpop.permute.xlu1 %5319 }
0x134b   :  { %v9857_v21 = vpop.permute.xlu0 %5325 }
0x134e   :  { %v9859_v27 = vpop.permute.xlu1 %5323 }
0x134f   :  { %v5330_v38 = vpop.permute.xlu0 %5329 }
0x1350   :  { %v5459_v57 = vsel %vm254_vm1, %v10850_v23, %v5330_v38  ;;  %v10853_v38 = vld [vmem:[#allocation4_spill] sm:$0xff] }
0x1351   :  { %v5447_v23 = vsel %vm254_vm1, %v10853_v38, %v5306_v28 }
0x1352   :  { %v9861_v50 = vpop.permute.xlu1 %5327 }
0x1353   :  { %v5350_v5 = vpop.permute.xlu0 %5349 }
0x1354   :  { %v5462_v13 = vsel %vm5461_vm2, %v5445_v32, %v5350_v5 }
0x1356   :  { %v5332_v20 = vpop.permute.xlu1 %5331 }
0x1357   :  { %v5354_v4 = vpop.permute.xlu0 %5353 }
0x1358   :  { %v5464_v42 = vsel %vm5461_vm2, %v5447_v23, %v5354_v4 }
0x135a   :  { %v5352_v6 = vpop.permute.xlu1 %5351 }
0x135b   :  { %v5358_v19 = vpop.permute.xlu0 %5357 }
0x135e   :  { %v5356_v11 = vpop.permute.xlu1 %5355 }
0x135f   :  { %v5362_v16 = vpop.permute.xlu0 %5361 }
0x1362   :  { %v5360_v8 = vpop.permute.xlu1 %5359 }
0x1363   :  { %v5366_v3 = vpop.permute.xlu0 %5365 }
0x1366   :  { %v5364_v37 = vpop.permute.xlu1 %5363 }
0x1367   :  { %v5370_v46 = vpop.permute.xlu0 %5369 }
0x136a   :  { %v9863_v53 = vpop.permute.xlu1 %5367 }
0x136b   :  { %v9865_v22 = vpop.permute.xlu0 %5373 }
0x136e   :  { %v9867_v17 = vpop.permute.xlu1 %5371 }
0x136f   :  { %v5378_v15 = vpop.permute.xlu0 %5377 }
0x1370   :  { %v9872_v24 = vsel %vm5461_vm2, %v5459_v57, %v5378_v15  ;;  %v10854_v57 = vld [vmem:[#allocation16_spill] sm:$0xff] }
0x1371   :  { %10851 = vst [vmem:[#allocation119_spill] sm:$0xff] %v9872_v24  ;;  %v5460_v15 = vsel %vm254_vm1, %v10854_v57, %v5332_v20  ;;  %v10857_v57 = vld [vmem:[#allocation5_spill] sm:$0xff] }
0x1372   :  { %v9876_v52 = vpop.permute.xlu1 %5375 }
0x1373   :  { %v5398_v25 = vpop.permute.xlu0 %5397 }
0x1374   :  { %v5479_v2 = vsel %vm5478_vm7, %v5462_v13, %v5398_v25  ;;  %v10855_v13 = vld [vmem:[#allocation3_spill] sm:$0xff] }
0x1375   :  { %5495 = vst.msk [vmem:[%s10256_s8] sm:$0xff] %vm56_vm0, %v5479_v2  ;;  %v5446_v5 = vsel %vm254_vm1, %v10855_v13, %v5304_v10  ;;  %v10856_v2 = vld [vmem:[#allocation7_spill] sm:$0xff] }
0x1376   :  { %v5380_v24 = vpop.permute.xlu1 %5379  ;;  %v5449_v28 = vsel %vm254_vm1, %v10856_v2, %v5310_v47  ;;  %v5463_v20 = vsel %vm5461_vm2, %v5446_v5, %v5352_v6  ;;  %v10858_v47 = vld [vmem:[#allocation9_spill] sm:$0xff]  ;;  %v10859_v5 = vld [vmem:[#allocation6_spill] sm:$0xff] }
0x1377   :  { %v9890_v56 = vsel %vm5461_vm2, %v5460_v15, %v5380_v24  ;;  %v5402_v32 = vpop.permute.xlu0 %5401  ;;  %v5466_v24 = vsel %vm5461_vm2, %v5449_v28, %v5358_v19  ;;  %v5448_v15 = vsel %vm254_vm1, %v10857_v57, %v5308_v58  ;;  %v5451_v6 = vsel %vm254_vm1, %v10858_v47, %v5314_v39  ;;  %v10860_v39 = vld [vmem:[#allocation11_spill] sm:$0xff] }
0x1378   :  { %v5481_v25 = vsel %vm5478_vm7, %v5464_v42, %v5402_v32  ;;  %v5465_v19 = vsel %vm5461_vm2, %v5448_v15, %v5356_v11  ;;  %v5468_v32 = vsel %vm5461_vm2, %v5451_v6, %v5362_v16  ;;  %v5450_v2 = vsel %vm254_vm1, %v10859_v5, %v9847_v45  ;;  %v10863_v6 = vld [vmem:[#allocation10_spill] sm:$0xff] }
0x1379   :  { %5497 = vst.msk [vmem:[%s10256_s8 + $0x10] sm:$0xff] %vm56_vm0, %v5481_v25  ;;  %v5453_v11 = vsel %vm254_vm1, %v10860_v39, %v9849_v48  ;;  %v5467_v16 = vsel %vm5461_vm2, %v5450_v2, %v5360_v8  ;;  %v10862_v48 = vld [vmem:[#allocation13_spill] sm:$0xff]  ;;  %v10866_v2 = vld [vmem:[#allocation14_spill] sm:$0xff] }
0x137a   :  { %v5400_v4 = vpop.permute.xlu1 %5399  ;;  %v5455_v8 = vsel %vm254_vm1, %v10862_v48, %v9853_v31  ;;  %v10864_v31 = vld [vmem:[#allocation15_spill] sm:$0xff] }
0x137b   :  { %v5480_v38 = vsel %vm5478_vm7, %v5463_v20, %v5400_v4  ;;  %v5406_v23 = vpop.permute.xlu0 %5405  ;;  %v5470_v20 = vsel %vm5461_vm2, %v5453_v11, %v5366_v3  ;;  %v5472_v57 = vsel %vm5461_vm2, %v5455_v8, %v5370_v46 }
0x137c   :  { %5496 = vst.msk [vmem:[%s10256_s8 + $0x8] sm:$0xff] %vm56_vm0, %v5480_v38  ;;  %v5483_v10 = vsel %vm5478_vm7, %v5466_v24, %v5406_v23  ;;  %v10861_v38 = vld [vmem:[#allocation8_spill] sm:$0xff] }
0x137d   :  { %5499 = vst.msk [vmem:[%s10256_s8 + $0x20] sm:$0xff] %vm56_vm0, %v5483_v10  ;;  %v5452_v23 = vsel %vm254_vm1, %v10861_v38, %v9851_v30 }
0x137e   :  { %v5404_v42 = vpop.permute.xlu1 %5403  ;;  %v5469_v3 = vsel %vm5461_vm2, %v5452_v23, %v5364_v37  ;;  %v5457_v37 = vsel %vm254_vm1, %v10864_v31, %v9857_v21 }
0x137f   :  { %v5482_v25 = vsel %vm5478_vm7, %v5465_v19, %v5404_v42  ;;  %v5410_v13 = vpop.permute.xlu0 %5409  ;;  %v5454_v19 = vsel %vm254_vm1, %v10863_v6, %v9855_v54 }
0x1380   :  { %5498 = vst.msk [vmem:[%s10256_s8 + $0x18] sm:$0xff] %vm56_vm0, %v5482_v25  ;;  %v5485_v58 = vsel %vm5478_vm7, %v5468_v32, %v5410_v13  ;;  %v5471_v46 = vsel %vm5461_vm2, %v5454_v19, %v9863_v53  ;;  %v5474_v32 = vsel %vm5461_vm2, %v5457_v37, %v9865_v22 }
0x1381   :  { %5501 = vst.msk [vmem:[%s10256_s8 + $0x30] sm:$0xff] %vm56_vm0, %v5485_v58  ;;  %v10865_v58 = vld [vmem:[#allocation12_spill] sm:$0xff] }
0x1382   :  { %v5408_v28 = vpop.permute.xlu1 %5407  ;;  %v5456_v21 = vsel %vm254_vm1, %v10865_v58, %v9859_v27  ;;  %v5458_v27 = vsel %vm254_vm1, %v10866_v2, %v9861_v50 }
0x1383   :  { %v5484_v4 = vsel %vm5478_vm7, %v5467_v16, %v5408_v28  ;;  %v5414_v24 = vpop.permute.xlu0 %5413  ;;  %v5473_v53 = vsel %vm5461_vm2, %v5456_v21, %v9867_v17  ;;  %v5475_v39 = vsel %vm5461_vm2, %v5458_v27, %v9876_v52 }
0x1384   :  { %5500 = vst.msk [vmem:[%s10256_s8 + $0x28] sm:$0xff] %vm56_vm0, %v5484_v4  ;;  %v5487_v45 = vsel %vm5478_vm7, %v5470_v20, %v5414_v24 }
0x1385   :  { %5503 = vst.msk [vmem:[%s10256_s8 + $0x40] sm:$0xff] %vm56_vm0, %v5487_v45 }
0x1386   :  { %v5412_v10 = vpop.permute.xlu1 %5411 }
0x1387   :  { %v5486_v15 = vsel %vm5478_vm7, %v5469_v3, %v5412_v10  ;;  %v5418_v47 = vpop.permute.xlu0 %5417 }
0x1388   :  { %5502 = vst.msk [vmem:[%s10256_s8 + $0x38] sm:$0xff] %vm56_vm0, %v5486_v15  ;;  %v5489_v30 = vsel %vm5478_vm7, %v5472_v57, %v5418_v47 }
0x1389   :  { %5505 = vst.msk [vmem:[%s10256_s8 + $0x50] sm:$0xff] %vm56_vm0, %v5489_v30 }
0x138a   :  { %v5416_v42 = vpop.permute.xlu1 %5415 }
0x138b   :  { %v5488_v25 = vsel %vm5478_vm7, %v5471_v46, %v5416_v42  ;;  %v5422_v13 = vpop.permute.xlu0 %5421 }
0x138c   :  { %5504 = vst.msk [vmem:[%s10256_s8 + $0x48] sm:$0xff] %vm56_vm0, %v5488_v25  ;;  %v5491_v54 = vsel %vm5478_vm7, %v5474_v32, %v5422_v13 }
0x138d   :  { %5507 = vst.msk [vmem:[%s10256_s8 + $0x60] sm:$0xff] %vm56_vm0, %v5491_v54 }
0x138e   :  { %v5420_v22 = vpop.permute.xlu1 %5419 }
0x138f   :  { %v5490_v5 = vsel %vm5478_vm7, %v5473_v53, %v5420_v22 }
0x1390   :  { %5506 = vst.msk [vmem:[%s10256_s8 + $0x58] sm:$0xff] %vm56_vm0, %v5490_v5 }
0x1392   :  { %v5424_v11 = vpop.permute.xlu1 %5423 }
0x1393   :  { %v5492_v16 = vsel %vm5478_vm7, %v5475_v39, %v5424_v11 }
0x1394   :  { %5508 = vst.msk [vmem:[%s10256_s8 + $0x68] sm:$0xff] %vm56_vm0, %v5492_v16  ;;  %v6653_v17 = vpop.f32.mrb[112].mxu1 }
0x1395   :  { %v4987_v28 = vsub.f32 %v10832_v14, %v6653_v17  ;;  %v4907_v20 = vpop.f32.mrb[113].mxu1 }
0x1396   :  { %v4986_v4 = vsub.f32 %v10831_v9, %v4907_v20  ;;  %6677 = vmatprep.mubr.msk.f32.mxu0 %vm254_vm1, %v4907_v20 }
0x1397   :  { %v5003_v50 = vmul.f32 %v4987_v28, %v4987_v28  ;;  %6678 = vmatmul.mubr.msk.f32.vlgmr.msra.gmra.mrb[112].mxu0 %vm254_vm1, %v6653_v17 }
0x1398   :  { %v5002_v52 = vmul.f32 %v4986_v4, %v4986_v4  ;;  %v6656_v24 = vpop.f32.mrb[114].mxu1 }
0x1399   :  { %v4989_v45 = vsub.f32 %v10834_v55, %v6656_v24  ;;  %v4917_v38 = vpop.f32.mrb[115].mxu1  ;;  %v5021_v23 = vsel %vm254_vm1, %v5003_v50, 0.0 }
0x139a   :  { %v4988_v48 = vsub.f32 %v10833_v44, %v4917_v38  ;;  %5022 = vadd.xlane.f32.xlu1 %v5021_v23  ;;  %6680 = vmatprep.mubr.msk.f32.mxu0 %vm254_vm1, %v4917_v38  ;;  %v5018_v14 = vsel %vm254_vm1, %v5002_v52, 0.0  ;;  %v10867_v52 = vld [vmem:[#allocation114_spill] sm:$0xff]  ;;  %v10868_v38 = vld [vmem:[#allocation55_spill] sm:$0xff] }
0x139b   :  { %v5005_v9 = vmul.f32 %v4989_v45, %v4989_v45  ;;  %6681 = vmatmul.mubr.msk.f32.gmra.mrb[114].mxu0 %vm254_vm1, %v6656_v24  ;;  %5019 = vadd.xlane.f32.xlu0 %v5018_v14 }
0x139c   :  { %v5004_v8 = vmul.f32 %v4988_v48, %v4988_v48  ;;  %v6659_v3 = vpop.f32.mrb[116].mxu1 }
0x139d   :  { %v4991_v10 = vsub.f32 %v10836_v7, %v6659_v3  ;;  %v4927_v57 = vpop.f32.mrb[117].mxu1  ;;  %v5027_v55 = vsel %vm254_vm1, %v5005_v9, 0.0 }
0x139e   :  { %v4990_v15 = vsub.f32 %v10835_v35, %v4927_v57  ;;  %5028 = vadd.xlane.f32.xlu1 %v5027_v55  ;;  %6683 = vmatprep.mubr.msk.f32.mxu0 %vm254_vm1, %v4927_v57  ;;  %v5024_v44 = vsel %vm254_vm1, %v5004_v8, 0.0 }
0x139f   :  { %v5007_v47 = vmul.f32 %v4991_v10, %v4991_v10  ;;  %6684 = vmatmul.mubr.msk.f32.gmra.mrb[116].mxu0 %vm254_vm1, %v6659_v3  ;;  %5025 = vadd.xlane.f32.xlu0 %v5024_v44 }
0x13a0   :  { %v5006_v30 = vmul.f32 %v4990_v15, %v4990_v15  ;;  %v6662_v6 = vpop.f32.mrb[118].mxu1 }
0x13a1   :  { %v4993_v19 = vsub.f32 %v10838_v61, %v6662_v6  ;;  %v4937_v31 = vpop.f32.mrb[119].mxu1  ;;  %v5033_v7 = vsel %vm254_vm1, %v5007_v47, 0.0 }
0x13a2   :  { %v4992_v37 = vsub.f32 %v10837_v60, %v4937_v31  ;;  %5034 = vadd.xlane.f32.xlu1 %v5033_v7  ;;  %6686 = vmatprep.mubr.msk.f32.mxu0 %vm254_vm1, %v4937_v31  ;;  %v5030_v35 = vsel %vm254_vm1, %v5006_v30, 0.0 }
0x13a3   :  { %v5009_v46 = vmul.f32 %v4993_v19, %v4993_v19  ;;  %6687 = vmatmul.mubr.msk.f32.gmra.mrb[118].mxu0 %vm254_vm1, %v6662_v6  ;;  %5031 = vadd.xlane.f32.xlu0 %v5030_v35 }
0x13a4   :  { %v5008_v42 = vmul.f32 %v4992_v37, %v4992_v37  ;;  %v6665_v32 = vpop.f32.mrb[120].mxu1 }
0x13a5   :  { %v4995_v25 = vsub.f32 %v10840_v51, %v6665_v32  ;;  %v4947_v13 = vpop.f32.mrb[121].mxu1  ;;  %v5039_v61 = vsel %vm254_vm1, %v5009_v46, 0.0 }
0x13a6   :  { %v4994_v54 = vsub.f32 %v10839_v36, %v4947_v13  ;;  %5040 = vadd.xlane.f32.xlu1 %v5039_v61  ;;  %6689 = vmatprep.mubr.msk.f32.mxu0 %vm254_vm1, %v4947_v13  ;;  %v5036_v60 = vsel %vm254_vm1, %v5008_v42, 0.0 }
0x13a7   :  { %v5011_v58 = vmul.f32 %v4995_v25, %v4995_v25  ;;  %6690 = vmatmul.mubr.msk.f32.gmra.mrb[120].mxu0 %vm254_vm1, %v6665_v32  ;;  %5037 = vadd.xlane.f32.xlu0 %v5036_v60  ;;  %v10870_v32 = vld [vmem:[#allocation57_spill] sm:$0xff] }
0x13a8   :  { %v5010_v21 = vmul.f32 %v4994_v54, %v4994_v54  ;;  %v6668_v53 = vpop.f32.mrb[122].mxu1  ;;  %v10872_v60 = vld [vmem:[#allocation117_spill] sm:$0xff] }
0x13a9   :  { %v4997_v22 = vsub.f32 %v10842_v63, %v6668_v53  ;;  %v4957_v5 = vpop.f32.mrb[123].mxu1  ;;  %v5045_v51 = vsel %vm254_vm1, %v5011_v58, 0.0 }
0x13aa   :  { %v4996_v2 = vsub.f32 %v10841_v59, %v4957_v5  ;;  %5046 = vadd.xlane.f32.xlu1 %v5045_v51  ;;  %6692 = vmatprep.mubr.msk.f32.mxu0 %vm254_vm1, %v4957_v5  ;;  %v5042_v36 = vsel %vm254_vm1, %v5010_v21, 0.0 }
0x13ab   :  { %v5013_v27 = vmul.f32 %v4997_v22, %v4997_v22  ;;  %6693 = vmatmul.mubr.msk.f32.gmra.mrb[122].mxu0 %vm254_vm1, %v6668_v53  ;;  %5043 = vadd.xlane.f32.xlu0 %v5042_v36  ;;  %v10873_v53 = vld [vmem:[#allocation58_spill] sm:$0xff]  ;;  %v10874_v36 = vld [vmem:[#allocation119_spill] sm:$0xff] }
0x13ac   :  { %v5012_v39 = vmul.f32 %v4996_v2, %v4996_v2  ;;  %v6671_v11 = vpop.f32.mrb[124].mxu1 }
0x13ad   :  { %v4999_v16 = vsub.f32 %v10844_v18, %v6671_v11  ;;  %v4967_v17 = vpop.f32.mrb[125].mxu1  ;;  %v5051_v63 = vsel %vm254_vm1, %v5013_v27, 0.0 }
0x13ae   :  { %v4998_v28 = vsub.f32 %v10843_v34, %v4967_v17  ;;  %5052 = vadd.xlane.f32.xlu1 %v5051_v63  ;;  %6695 = vmatprep.mubr.msk.f32.mxu0 %vm254_vm1, %v4967_v17  ;;  %v5048_v59 = vsel %vm254_vm1, %v5012_v39, 0.0  ;;  %v5996_v39 = vld [vmem:[%s10254_s6 + $0x3] ss:$0 sm:$0xff]  ;;  %v10875_v63 = vld [vmem:[#allocation27_spill] sm:$0xff] }
0x13af   :  { %v5015_v20 = vmul.f32 %v4999_v16, %v4999_v16  ;;  %6696 = vmatmul.mubr.msk.f32.gmra.mrb[124].mxu0 %vm254_vm1, %v6671_v11  ;;  %5049 = vadd.xlane.f32.xlu0 %v5048_v59  ;;  %v10876_v59 = vld [vmem:[#allocation45_spill] sm:$0xff] }
0x13b0   :  { %v5014_v4 = vmul.f32 %v4998_v28, %v4998_v28  ;;  %v6674_v50 = vpop.f32.mrb[126].mxu1 }
0x13b1   :  { %v5001_v24 = vsub.f32 %v10867_v52, %v6674_v50  ;;  %v4977_v45 = vpop.f32.mrb[127].mxu1  ;;  %v5057_v18 = vsel %vm254_vm1, %v5015_v20, 0.0 }
0x13b2   :  { %v5000_v23 = vsub.f32 %v10868_v38, %v4977_v45  ;;  %5058 = vadd.xlane.f32.xlu1 %v5057_v18  ;;  %6698 = vmatprep.mubr.msk.f32.mxu0 %vm254_vm1, %v4977_v45  ;;  %v5054_v34 = vsel %vm254_vm1, %v5014_v4, 0.0  ;;  %v10877_v45 = vld [vmem:[#allocation94_spill] sm:$0xff] }
0x13b3   :  { %v5017_v48 = vmul.f32 %v5001_v24, %v5001_v24  ;;  %6699 = vmatmul.mubr.msk.f32.gmra.mrb[126].mxu0 %vm254_vm1, %v6674_v50  ;;  %5055 = vadd.xlane.f32.xlu0 %v5054_v34 }
0x13b4   :  { %v5016_v14 = vmul.f32 %v5000_v23, %v5000_v23 }
0x13b5   :  { %v5063_v9 = vsel %vm254_vm1, %v5017_v48, 0.0 }
0x13b6   :  { %5064 = vadd.xlane.f32.xlu1 %v5063_v9  ;;  %v5060_v8 = vsel %vm254_vm1, %v5016_v14, 0.0 }
0x13b7   :  { %5061 = vadd.xlane.f32.xlu0 %v5060_v8  ;;  %v10879_v8 = vld [vmem:[#allocation95_spill] sm:$0xff] }
0x13c7   :  { %5427 = vrot.lane.b32.xlu1 %v10867_v52, %s6724_s25 }
0x13cd   :  { %5425 = vrot.lane.b32.xlu0 %v10868_v38, %s6724_s25  ;;  %v10878_v38 = vld [vmem:[#allocation46_spill] sm:$0xff] }
0x1427   :  { %v5023_v3 = vpop.xlane.xlu1 %5022 }
0x1428   :  { %v5612_v10 = vsel %vm5545_vm5, %v9776_v0, %v5023_v3  ;;  %v5020_v57 = vpop.xlane.xlu0 %5019 }
0x1429   :  { %5628 = vst.msk [vmem:[%s10257_s10 + $0x8] sm:$0xff] %vm5562_vm6, %v5612_v10  ;;  %v5611_v55 = vsel %vm5545_vm5, %v9779_v43, %v5020_v57  ;;  %v10880_v10 = vld [vmem:[#allocation96_spill] sm:$0xff] }
0x142a   :  { %5627 = vst.msk [vmem:[%s10257_s10] sm:$0xff] %vm5562_vm6, %v5611_v55 }
0x142b   :  { %v5029_v15 = vpop.xlane.xlu1 %5028 }
0x142c   :  { %v5614_v44 = vsel %vm5545_vm5, %v9786_v49, %v5029_v15  ;;  %v5026_v47 = vpop.xlane.xlu0 %5025 }
0x142d   :  { %5630 = vst.msk [vmem:[%s10257_s10 + $0x18] sm:$0xff] %vm5562_vm6, %v5614_v44  ;;  %v5613_v0 = vsel %vm5545_vm5, %v9789_v26, %v5026_v47 }
0x142e   :  { %5629 = vst.msk [vmem:[%s10257_s10 + $0x10] sm:$0xff] %vm5562_vm6, %v5613_v0  ;;  %v10881_v0 = vld [vmem:[#allocation47_spill] sm:$0xff] }
0x142f   :  { %v5035_v43 = vpop.xlane.xlu1 %5034 }
0x1430   :  { %v5616_v30 = vsel %vm5545_vm5, %v9796_v40, %v5035_v43  ;;  %v5032_v6 = vpop.xlane.xlu0 %5031 }
0x1431   :  { %5632 = vst.msk [vmem:[%s10257_s10 + $0x28] sm:$0xff] %vm5562_vm6, %v5616_v30  ;;  %v5615_v49 = vsel %vm5545_vm5, %v9799_v41, %v5032_v6  ;;  %v10882_v30 = vld [vmem:[#allocation98_spill] sm:$0xff] }
0x1432   :  { %5631 = vst.msk [vmem:[%s10257_s10 + $0x20] sm:$0xff] %vm5562_vm6, %v5615_v49 }
0x1433   :  { %v5041_v26 = vpop.xlane.xlu1 %5040 }
0x1434   :  { %v5618_v19 = vsel %vm5545_vm5, %v9806_v33, %v5041_v26  ;;  %v5038_v31 = vpop.xlane.xlu0 %5037 }
0x1435   :  { %5634 = vst.msk [vmem:[%s10257_s10 + $0x38] sm:$0xff] %vm5562_vm6, %v5618_v19  ;;  %v5617_v40 = vsel %vm5545_vm5, %v9809_v62, %v5038_v31 }
0x1436   :  { %5633 = vst.msk [vmem:[%s10257_s10 + $0x30] sm:$0xff] %vm5562_vm6, %v5617_v40  ;;  %v10883_v40 = vld [vmem:[#allocation97_spill] sm:$0xff] }
0x1437   :  { %v5047_v41 = vpop.xlane.xlu1 %5046 }
0x1438   :  { %v5620_v7 = vsel %vm5545_vm5, %v9816_v1, %v5047_v41  ;;  %v5044_v37 = vpop.xlane.xlu0 %5043  ;;  %v10869_v1 = vld [vmem:[#allocation116_spill] sm:$0xff] }
0x1439   :  { %5636 = vst.msk [vmem:[%s10257_s10 + $0x48] sm:$0xff] %vm5562_vm6, %v5620_v7  ;;  %v5619_v33 = vsel %vm5545_vm5, %v9819_v12, %v5044_v37  ;;  %v10884_v7 = vld [vmem:[#allocation48_spill] sm:$0xff] }
0x143a   :  { %5635 = vst.msk [vmem:[%s10257_s10 + $0x40] sm:$0xff] %vm5562_vm6, %v5619_v33 }
0x143b   :  { %v5053_v62 = vpop.xlane.xlu1 %5052 }
0x143c   :  { %v5622_v35 = vsel %vm5545_vm5, %v9826_v29, %v5053_v62  ;;  %v5050_v46 = vpop.xlane.xlu0 %5049  ;;  %v10871_v29 = vld [vmem:[#allocation118_spill] sm:$0xff] }
0x143d   :  { %5638 = vst.msk [vmem:[%s10257_s10 + $0x58] sm:$0xff] %vm5562_vm6, %v5622_v35  ;;  %v5621_v42 = vsel %vm5545_vm5, %v10869_v1, %v5050_v46  ;;  %v10885_v1 = vld [vmem:[#allocation99_spill] sm:$0xff] }
0x143e   :  { %5637 = vst.msk [vmem:[%s10257_s10 + $0x50] sm:$0xff] %vm5562_vm6, %v5621_v42 }
0x143f   :  { %v5059_v12 = vpop.xlane.xlu1 %5058 }
0x1440   :  { %v5624_v25 = vsel %vm5545_vm5, %v10870_v32, %v5059_v12  ;;  %v5056_v13 = vpop.xlane.xlu0 %5055  ;;  %v10886_v12 = vld [vmem:[#allocation100_spill] sm:$0xff] }
0x1441   :  { %5640 = vst.msk [vmem:[%s10257_s10 + $0x68] sm:$0xff] %vm5562_vm6, %v5624_v25  ;;  %v5623_v61 = vsel %vm5545_vm5, %v10871_v29, %v5056_v13 }
0x1442   :  { %5639 = vst.msk [vmem:[%s10257_s10 + $0x60] sm:$0xff] %vm5562_vm6, %v5623_v61 }
0x1443   :  { %v5065_v54 = vpop.xlane.xlu1 %5064 }
0x1444   :  { %v5626_v58 = vsel %vm5545_vm5, %v10872_v60, %v5065_v54  ;;  %v5062_v21 = vpop.xlane.xlu0 %5061  ;;  %v10887_v54 = vld [vmem:[#allocation49_spill] sm:$0xff] }
0x1445   :  { %5642 = vst.msk [vmem:[%s10257_s10 + $0x78] sm:$0xff] %vm5562_vm6, %v5626_v58  ;;  %v5625_v22 = vsel %vm5545_vm5, %v10873_v53, %v5062_v21  ;;  %v10888_v58 = vld [vmem:[#allocation102_spill] sm:$0xff] }
0x1446   :  { %5641 = vst.msk [vmem:[%s10257_s10 + $0x70] sm:$0xff] %vm5562_vm6, %v5625_v22 }
0x1447   :  { %v5428_v5 = vpop.permute.xlu1 %5427 }
0x1448   :  { %v5494_v51 = vsel %vm5478_vm7, %v9890_v56, %v5428_v5  ;;  %v5426_v2 = vpop.permute.xlu0 %5425 }
0x1449   :  { %5510 = vst.msk [vmem:[%s10256_s8 + $0x78] sm:$0xff] %vm56_vm0, %v5494_v51  ;;  %v5493_v27 = vsel %vm5478_vm7, %v10874_v36, %v5426_v2  ;;  %v10889_v2 = vld [vmem:[#allocation101_spill] sm:$0xff] }
0x144a   :  { %5509 = vst.msk [vmem:[%s10256_s8 + $0x70] sm:$0xff] %vm56_vm0, %v5493_v27  ;;  %v10890_v27 = vld [vmem:[#allocation50_spill] sm:$0xff] }
0x146a   :  { %v6679_v11 = vpop.f32.mrb[112].mxu0 }
0x146b   :  { %v5196_v56 = vadd.f32 %v6679_v11, %v5996_v39  ;;  %v5190_v16 = vpop.f32.mrb[113].mxu0 }
0x146c   :  { %v5191_v17 = vadd.f32 %v5996_v39, %v5190_v16 }
0x146d   :  { %v5270_v28 = vadd.f32 %v5196_v56, %v10875_v63 }
0x146e   :  { %v5269_v20 = vadd.f32 %v5191_v17, %v10876_v59  ;;  %v6682_v4 = vpop.f32.mrb[114].mxu0 }
0x146f   :  { %5286 = vst.msk [vmem:[%s10258_s7 + $0x8] sm:$0xff] %vm56_vm0, %v5270_v28  ;;  %v5206_v50 = vadd.f32 %v6682_v4, %v5996_v39  ;;  %v5200_v52 = vpop.f32.mrb[115].mxu0 }
0x1470   :  { %5285 = vst.msk [vmem:[%s10258_s7] sm:$0xff] %vm56_vm0, %v5269_v20  ;;  %v5201_v24 = vadd.f32 %v5996_v39, %v5200_v52 }
0x1471   :  { %v5272_v18 = vadd.f32 %v5206_v50, %v10877_v45 }
0x1472   :  { %v5271_v23 = vadd.f32 %v5201_v24, %v10878_v38  ;;  %v6685_v34 = vpop.f32.mrb[116].mxu0 }
0x1473   :  { %5288 = vst.msk [vmem:[%s10258_s7 + $0x18] sm:$0xff] %vm56_vm0, %v5272_v18  ;;  %v5216_v48 = vadd.f32 %v6685_v34, %v5996_v39  ;;  %v5210_v14 = vpop.f32.mrb[117].mxu0 }
0x1474   :  { %5287 = vst.msk [vmem:[%s10258_s7 + $0x10] sm:$0xff] %vm56_vm0, %v5271_v23  ;;  %v5211_v9 = vadd.f32 %v5996_v39, %v5210_v14 }
0x1475   :  { %v5274_v3 = vadd.f32 %v5216_v48, %v10879_v8 }
0x1476   :  { %v5273_v57 = vadd.f32 %v5211_v9, %v10880_v10  ;;  %v6688_v55 = vpop.f32.mrb[118].mxu0 }
0x1477   :  { %5290 = vst.msk [vmem:[%s10258_s7 + $0x28] sm:$0xff] %vm56_vm0, %v5274_v3  ;;  %v5226_v15 = vadd.f32 %v6688_v55, %v5996_v39  ;;  %v5220_v44 = vpop.f32.mrb[119].mxu0 }
0x1478   :  { %5289 = vst.msk [vmem:[%s10258_s7 + $0x20] sm:$0xff] %vm56_vm0, %v5273_v57  ;;  %v5221_v47 = vadd.f32 %v5996_v39, %v5220_v44 }
0x1479   :  { %v5276_v43 = vadd.f32 %v5226_v15, %v10881_v0 }
0x147a   :  { %v5275_v6 = vadd.f32 %v5221_v47, %v10882_v30  ;;  %v6691_v49 = vpop.f32.mrb[120].mxu0 }
0x147b   :  { %5292 = vst.msk [vmem:[%s10258_s7 + $0x38] sm:$0xff] %vm56_vm0, %v5276_v43  ;;  %v5236_v26 = vadd.f32 %v6691_v49, %v5996_v39  ;;  %v5230_v19 = vpop.f32.mrb[121].mxu0 }
0x147c   :  { %5291 = vst.msk [vmem:[%s10258_s7 + $0x30] sm:$0xff] %vm56_vm0, %v5275_v6  ;;  %v5231_v31 = vadd.f32 %v5996_v39, %v5230_v19 }
0x147d   :  { %v5278_v41 = vadd.f32 %v5236_v26, %v10883_v40 }
0x147e   :  { %v5277_v37 = vadd.f32 %v5231_v31, %v10884_v7  ;;  %v6694_v33 = vpop.f32.mrb[122].mxu0 }
0x147f   :  { %5294 = vst.msk [vmem:[%s10258_s7 + $0x48] sm:$0xff] %vm56_vm0, %v5278_v41  ;;  %v5246_v62 = vadd.f32 %v6694_v33, %v5996_v39  ;;  %v5240_v35 = vpop.f32.mrb[123].mxu0 }
0x1480   :  { %5293 = vst.msk [vmem:[%s10258_s7 + $0x40] sm:$0xff] %vm56_vm0, %v5277_v37  ;;  %v5241_v46 = vadd.f32 %v5996_v39, %v5240_v35 }
0x1481   :  { %v5280_v42 = vadd.f32 %v5246_v62, %v10885_v1 }
0x1482   :  { %v5279_v32 = vadd.f32 %v5241_v46, %v10886_v12  ;;  %v6697_v25 = vpop.f32.mrb[124].mxu0 }
0x1483   :  { %5296 = vst.msk [vmem:[%s10258_s7 + $0x58] sm:$0xff] %vm56_vm0, %v5280_v42  ;;  %v5256_v13 = vadd.f32 %v6697_v25, %v5996_v39  ;;  %v5250_v29 = vpop.f32.mrb[125].mxu0 }
0x1484   :  { %5295 = vst.msk [vmem:[%s10258_s7 + $0x50] sm:$0xff] %vm56_vm0, %v5279_v32  ;;  %v5251_v61 = vadd.f32 %v5996_v39, %v5250_v29 }
0x1485   :  { %v5282_v60 = vadd.f32 %v5256_v13, %v10887_v54 }
0x1486   :  { %v5281_v21 = vadd.f32 %v5251_v61, %v10888_v58  ;;  %v6700_v53 = vpop.f32.mrb[126].mxu0 }
0x1487   :  { %5298 = vst.msk [vmem:[%s10258_s7 + $0x68] sm:$0xff] %vm56_vm0, %v5282_v60  ;;  %v5266_v22 = vadd.f32 %v6700_v53, %v5996_v39  ;;  %v5260_v5 = vpop.f32.mrb[127].mxu0 }
0x1488   :  { %5297 = vst.msk [vmem:[%s10258_s7 + $0x60] sm:$0xff] %vm56_vm0, %v5281_v21  ;;  %v5261_v51 = vadd.f32 %v5996_v39, %v5260_v5 }
0x1489   :  { %v5284_v36 = vadd.f32 %v5266_v22, %v10889_v2 }
0x148a   :  { %v5283_v11 = vadd.f32 %v5261_v51, %v10890_v27 }
0x148b   :  { %5300 = vst.msk [vmem:[%s10258_s7 + $0x78] sm:$0xff] %vm56_vm0, %v5284_v36 }
0x148c   :  { %5299 = vst.msk [vmem:[%s10258_s7 + $0x70] sm:$0xff] %vm56_vm0, %v5283_v11 }

</bundles_post_ra>
